<compile_context>
chip_gen: v7x
topology: tpu7x:2x2x1
jax: 0.10.0
libtpu: 0.0.40
codegen_flags: <defaults>
</compile_context>

<pallas_src>
import math

import jax
import jax.numpy as jnp
from jax import lax
from jax.experimental import pallas as pl
from jax.experimental.pallas import tpu as pltpu  # noqa: F401  (TPU backend)

# ---- small synthetic "albert-base-v2"-like config --------------------------
VOCAB = 100
VOCAB_PAD = 128       # embedding table padded to an aligned row count (zeros)
MAX_POS = 16
EMB_DIM = 16          # albert embedding_size (real: 128)
HIDDEN = 32           # albert hidden_size   (real: 768)
NUM_HEADS = 4
HEAD_DIM = HIDDEN // NUM_HEADS
FFN_DIM = 64
FFN_PAD = 128         # FFN width zero-padded to 128 lanes (exact same result)
NUM_LAYERS = 2        # albert shares one layer's parameters across layers
GRU_H = 64            # nn.GRU(hidden, 64, bidirectional=True)
N_CLASSES = 4
OUT_PAD = 128         # logits lane-padded in-kernel, sliced in the wrapper
LN_EPS = 1e-12


def _layer_norm(x, g, b):
    m = jnp.mean(x, axis=-1, keepdims=True)
    v = jnp.mean((x - m) ** 2, axis=-1, keepdims=True)
    return (x - m) * lax.rsqrt(v + LN_EPS) * g + b


# ---------------------------------------------------------------------------
# fused forward kernel (single invocation, no grid, no scratch)
# ---------------------------------------------------------------------------
def _make_fused_kernel(B, S):
    f32 = jnp.float32
    BS = B * S
    GH = GRU_H
    scale = 1.0 / math.sqrt(HEAD_DIM)

    def kernel(ids_ref, mask_ref,
               word_emb_ref, pos_emb_ref, type_emb_ref,
               emb_ln_g_ref, emb_ln_b_ref, w_proj_ref, b_proj_ref,
               wqkv_ref, bqkv_ref, wo_ref, bo_ref, ln1_g_ref, ln1_b_ref,
               w1_ref, b1_ref, w2_ref, b2_ref, ln2_g_ref, ln2_b_ref,
               wih_ref, bih_ref, whh_ref, bhh_ref,
               w_out_ref, b_out_ref,
               out_ref):
        # ---- embedding lookup in-kernel (gather-free one-hot matmul) --------
        one_hot = (ids_ref[...] ==
                   lax.broadcasted_iota(jnp.int32, (BS, VOCAB_PAD), 1)
                   ).astype(f32)                                     # (BS, VOCAB_PAD)
        emb = jnp.dot(one_hot, word_emb_ref[...], preferred_element_type=f32)
        pos_type = pos_emb_ref[0:S, :] + type_emb_ref[0:1, :]        # (S, E)
        emb = emb + jnp.concatenate([pos_type] * B, axis=0)          # (BS, E)

        # ---- embedding LayerNorm + projection to hidden size ----------------
        emb = _layer_norm(emb, emb_ln_g_ref[...], emb_ln_b_ref[...])
        x = (jnp.dot(emb, w_proj_ref[...], preferred_element_type=f32)
             + b_proj_ref[...])                                      # (BS, H)

        # ---- attention bias: key padding + cross-batch block mask -----------
        # Scores are computed over all BS keys per head in one matmul; keys of
        # a different batch element get -1e9 so exp() underflows to exactly 0,
        # identical to per-batch attention (no per-batch Python loop).
        key_bias = (1.0 - mask_ref[...].astype(f32)) * (-1e9)        # (1, BS)
        inv_s = 1.0 / S
        row_b = jnp.floor(
            lax.broadcasted_iota(jnp.int32, (BS, BS), 0).astype(f32) * inv_s)
        col_b = jnp.floor(
            lax.broadcasted_iota(jnp.int32, (BS, BS), 1).astype(f32) * inv_s)
        bias = key_bias + jnp.where(row_b == col_b, 0.0, -1e9)       # (BS, BS)

        # ---- shared-parameter Albert encoder layers -------------------------
        for _ in range(NUM_LAYERS):
            # fused QKV: ONE matmul for all rows / heads / projections
            qkv = (jnp.dot(x, wqkv_ref[...], preferred_element_type=f32)
                   + bqkv_ref[...])                                  # (BS, 3H)
            ctx_heads = []
            for n in range(NUM_HEADS):          # NH=4: tiny static head loop
                lo = n * HEAD_DIM
                q = qkv[:, lo:lo + HEAD_DIM]                         # (BS, HD)
                k = qkv[:, HIDDEN + lo:HIDDEN + lo + HEAD_DIM]
                v = qkv[:, 2 * HIDDEN + lo:2 * HIDDEN + lo + HEAD_DIM]
                s = lax.dot_general(q, k, (((1,), (1,)), ((), ())),
                                    preferred_element_type=f32) * scale + bias
                s = s - jnp.max(s, axis=-1, keepdims=True)
                p = jnp.exp(s)
                p = p * pl.reciprocal(jnp.sum(p, axis=-1, keepdims=True),
                                      approx=True)
                ctx_heads.append(jnp.dot(p, v, preferred_element_type=f32))
            ctx = jnp.concatenate(ctx_heads, axis=-1)                # (BS, H)
            # fused output projection: ONE matmul (no per-head sum)
            attn = (jnp.dot(ctx, wo_ref[...], preferred_element_type=f32)
                    + bo_ref[...])

            h1 = _layer_norm(x + attn, ln1_g_ref[...], ln1_b_ref[...])
            ff = (jnp.dot(h1, w1_ref[...], preferred_element_type=f32)
                  + b1_ref[...])                                     # (BS, FFN_PAD)
            ff = jax.nn.gelu(ff, approximate=True)   # albert gelu_new (tanh)
            ff = (jnp.dot(ff, w2_ref[...], preferred_element_type=f32)
                  + b2_ref[...])
            x = _layer_norm(h1 + ff, ln2_g_ref[...], ln2_b_ref[...])

        # ---- bidirectional GRU (PyTorch gate order r, z, n) ------------------
        # Hoisted input projection for all timesteps & both directions: ONE
        # matmul, kept vreg-resident (no VMEM scratch, no masked sub-tile
        # stores).  Columns: [fwd r|z|n | bwd r|z|n], GRU_H each.
        gi = (jnp.dot(x, wih_ref[...], preferred_element_type=f32)
              + bih_ref[...]).reshape(B, S, 6 * GH)                  # (B, S, 6GH)

        def gru_gates(gi_d, gh_d, h_d):      # (B,3GH), (B,3GH), (B,GH)
            r = jax.nn.sigmoid(gi_d[:, 0:GH] + gh_d[:, 0:GH])
            z = jax.nn.sigmoid(gi_d[:, GH:2 * GH] + gh_d[:, GH:2 * GH])
            n = jnp.tanh(gi_d[:, 2 * GH:3 * GH] + r * gh_d[:, 2 * GH:3 * GH])
            return (1.0 - z) * n + z * h_d

        # recurrent weights are block-diagonal over directions -> ONE
        # (B,128)x(128,384) MXU push per step on the serial chain.
        h = jnp.zeros((B, 2 * GH), f32)                              # [h_fwd | h_bwd]
        for t in range(S):          # static unroll; fwd/bwd share the step
            gh = (jnp.dot(h, whh_ref[...], preferred_element_type=f32)
                  + bhh_ref[...])                                    # (B, 6GH)
            h_f = gru_gates(gi[:, t, 0:3 * GH], gh[:, 0:3 * GH], h[:, 0:GH])
            h_b = gru_gates(gi[:, S - 1 - t, 3 * GH:6 * GH],
                            gh[:, 3 * GH:6 * GH], h[:, GH:2 * GH])
            h = jnp.concatenate([h_f, h_b], axis=-1)

        # ---- classifier (lane-padded logits; wrapper slices to N_CLASSES) ----
        out_ref[...] = (jnp.dot(h, w_out_ref[...], preferred_element_type=f32)
                        + b_out_ref[...])

    return kernel


# ---------------------------------------------------------------------------
# parameters (deterministic synthetic init, already in kernel-friendly layout)
# ---------------------------------------------------------------------------
def init_params(key):
    def nrm(k, shape, scale=0.02):
        return scale * jax.random.normal(k, shape, jnp.float32)

    keys = iter(jax.random.split(key, 24))
    word_emb = jnp.zeros((VOCAB_PAD, EMB_DIM), jnp.float32).at[:VOCAB].set(
        nrm(next(keys), (VOCAB, EMB_DIM)))
    p = {
        "word_emb": word_emb,
        "pos_emb": nrm(next(keys), (MAX_POS, EMB_DIM)),
        "type_emb": nrm(next(keys), (2, EMB_DIM)),
        "emb_ln_g": jnp.ones((1, EMB_DIM), jnp.float32),
        "emb_ln_b": jnp.zeros((1, EMB_DIM), jnp.float32),
        "w_proj": nrm(next(keys), (EMB_DIM, HIDDEN)),
        "b_proj": jnp.zeros((1, HIDDEN), jnp.float32),
    }
    # fused QKV columns: [q_h0..q_h3 | k_h0..k_h3 | v_h0..v_h3], HEAD_DIM each.
    # FFN weights zero-padded to FFN_PAD lanes (gelu(0)=0 -> identical result).
    w1 = jnp.zeros((HIDDEN, FFN_PAD), jnp.float32).at[:, :FFN_DIM].set(
        nrm(next(keys), (HIDDEN, FFN_DIM)))
    w2 = jnp.zeros((FFN_PAD, HIDDEN), jnp.float32).at[:FFN_DIM].set(
        nrm(next(keys), (FFN_DIM, HIDDEN)))
    p["layer"] = {
        "wqkv": nrm(next(keys), (HIDDEN, 3 * HIDDEN)),
        "bqkv": jnp.zeros((1, 3 * HIDDEN), jnp.float32),
        "wo": nrm(next(keys), (HIDDEN, HIDDEN)),
        "bo": jnp.zeros((1, HIDDEN), jnp.float32),
        "ln1_g": jnp.ones((1, HIDDEN), jnp.float32),
        "ln1_b": jnp.zeros((1, HIDDEN), jnp.float32),
        "w1": w1, "b1": jnp.zeros((1, FFN_PAD), jnp.float32),
        "w2": w2, "b2": jnp.zeros((1, HIDDEN), jnp.float32),
        "ln2_g": jnp.ones((1, HIDDEN), jnp.float32),
        "ln2_b": jnp.zeros((1, HIDDEN), jnp.float32),
    }
    # GRU: hoisted input projection columns [fwd r|z|n | bwd r|z|n]; recurrent
    # weights block-diagonal over directions (fwd rows 0:64 -> cols 0:192,
    # bwd rows 64:128 -> cols 192:384) so each step is one fused matmul.
    whh = jnp.zeros((2 * GRU_H, 6 * GRU_H), jnp.float32)
    whh = whh.at[:GRU_H, :3 * GRU_H].set(nrm(next(keys), (GRU_H, 3 * GRU_H), 0.1))
    whh = whh.at[GRU_H:, 3 * GRU_H:].set(nrm(next(keys), (GRU_H, 3 * GRU_H), 0.1))
    p["gru"] = {
        "wih": nrm(next(keys), (HIDDEN, 6 * GRU_H), 0.1),
        "bih": jnp.zeros((1, 6 * GRU_H), jnp.float32),
        "whh": whh,
        "bhh": jnp.zeros((1, 6 * GRU_H), jnp.float32),
    }
    p["w_out"] = jnp.zeros((2 * GRU_H, OUT_PAD), jnp.float32).at[:, :N_CLASSES].set(
        nrm(next(keys), (2 * GRU_H, N_CLASSES), 0.1))
    p["b_out"] = jnp.zeros((1, OUT_PAD), jnp.float32)
    return p


# ---------------------------------------------------------------------------
# forward pass:  forward(masks, input_ids) -> logits (B, n_classes)
# ---------------------------------------------------------------------------
def gpt2_classifier_forward(params, masks, input_ids):
    B, S = input_ids.shape
    ids = input_ids.reshape(B * S, 1).astype(jnp.int32)
    mask_flat = masks.reshape(1, B * S).astype(jnp.float32)
    lp, gp = params["layer"], params["gru"]

    logits_pad = pl.pallas_call(
        _make_fused_kernel(B, S),
        out_shape=jax.ShapeDtypeStruct((B, OUT_PAD), jnp.float32),
    )(ids, mask_flat,
      params["word_emb"], params["pos_emb"], params["type_emb"],
      params["emb_ln_g"], params["emb_ln_b"], params["w_proj"], params["b_proj"],
      lp["wqkv"], lp["bqkv"], lp["wo"], lp["bo"], lp["ln1_g"], lp["ln1_b"],
      lp["w1"], lp["b1"], lp["w2"], lp["b2"], lp["ln2_g"], lp["ln2_b"],
      gp["wih"], gp["bih"], gp["whh"], gp["bhh"],
      params["w_out"], params["b_out"])
    return logits_pad[:, :N_CLASSES]


if __name__ == "__main__":
    key = jax.random.PRNGKey(0)
    k_ids, k_params = jax.random.split(key)

    B, S = 2, 8
    input_ids = jax.random.randint(k_ids, (B, S), 0, VOCAB, dtype=jnp.int32)
    masks = jnp.array([[1, 1, 1, 1, 1, 1, 1, 1],
                       [1, 1, 1, 1, 1, 1, 0, 0]], dtype=jnp.float32)
    params = init_params(k_params)

    fwd = jax.jit(gpt2_classifier_forward)
    logits = fwd(params, masks, input_ids)
    jax.block_until_ready(logits)
    assert logits.shape == (B, N_CLASSES) and logits.dtype == jnp.float32
    print("KERNEL_OK")
</pallas_src>

<mosaic_0001>
module attributes {stable_mosaic.version = 11 : i64} {
  func.func @kernel(%arg0: memref<16x1xi32, #tpu.memory_space<vmem>>, %arg1: memref<1x16xf32, #tpu.memory_space<vmem>>, %arg2: memref<128x16xf32, #tpu.memory_space<vmem>>, %arg3: memref<16x16xf32, #tpu.memory_space<vmem>>, %arg4: memref<2x16xf32, #tpu.memory_space<vmem>>, %arg5: memref<1x16xf32, #tpu.memory_space<vmem>>, %arg6: memref<1x16xf32, #tpu.memory_space<vmem>>, %arg7: memref<16x32xf32, #tpu.memory_space<vmem>>, %arg8: memref<1x32xf32, #tpu.memory_space<vmem>>, %arg9: memref<32x96xf32, #tpu.memory_space<vmem>>, %arg10: memref<1x96xf32, #tpu.memory_space<vmem>>, %arg11: memref<32x32xf32, #tpu.memory_space<vmem>>, %arg12: memref<1x32xf32, #tpu.memory_space<vmem>>, %arg13: memref<1x32xf32, #tpu.memory_space<vmem>>, %arg14: memref<1x32xf32, #tpu.memory_space<vmem>>, %arg15: memref<32x128xf32, #tpu.memory_space<vmem>>, %arg16: memref<1x128xf32, #tpu.memory_space<vmem>>, %arg17: memref<128x32xf32, #tpu.memory_space<vmem>>, %arg18: memref<1x32xf32, #tpu.memory_space<vmem>>, %arg19: memref<1x32xf32, #tpu.memory_space<vmem>>, %arg20: memref<1x32xf32, #tpu.memory_space<vmem>>, %arg21: memref<32x384xf32, #tpu.memory_space<vmem>>, %arg22: memref<1x384xf32, #tpu.memory_space<vmem>>, %arg23: memref<128x384xf32, #tpu.memory_space<vmem>>, %arg24: memref<1x384xf32, #tpu.memory_space<vmem>>, %arg25: memref<128x128xf32, #tpu.memory_space<vmem>>, %arg26: memref<1x128xf32, #tpu.memory_space<vmem>>, %arg27: memref<2x128xf32, #tpu.memory_space<vmem>>) attributes {dimension_semantics = [], scalar_prefetch = 0 : i64, scratch_operands = 0 : i64, tpu.core_type = #tpu.core_type<tc>} {
    %c0 = arith.constant 0 : index
    %c0_0 = arith.constant 0 : index
    %0 = vector.load %arg0[%c0, %c0_0] : memref<16x1xi32, #tpu.memory_space<vmem>>, vector<16x1xi32>
    %1 = tpu.iota {dimensions = array<i32: 1>} : vector<16x128xi32>
    %2 = vector.broadcast %0 : vector<16x1xi32> to vector<16x128xi32>
    %3 = arith.cmpi eq, %2, %1 : vector<16x128xi32>
    %4 = arith.extui %3 : vector<16x128xi1> to vector<16x128xi32>
    %5 = arith.sitofp %4 : vector<16x128xi32> to vector<16x128xf32>
    %c0_1 = arith.constant 0 : index
    %c0_2 = arith.constant 0 : index
    %6 = vector.load %arg2[%c0_1, %c0_2] : memref<128x16xf32, #tpu.memory_space<vmem>>, vector<128x16xf32>
    %cst = arith.constant dense<0.000000e+00> : vector<16x16xf32>
    %7 = tpu.matmul %5, %6, %cst {dimension_numbers = #tpu.dot_dimension_numbers<[1], [0], [0], [1], [0, 0, 1, 1], [], []>} : vector<16x128xf32>, vector<128x16xf32>, vector<16x16xf32> -> vector<16x16xf32>
    %c0_3 = arith.constant 0 : index
    %c0_4 = arith.constant 0 : index
    %8 = vector.load %arg3[%c0_3, %c0_4] : memref<16x16xf32, #tpu.memory_space<vmem>>, vector<8x16xf32>
    %c0_5 = arith.constant 0 : index
    %c0_6 = arith.constant 0 : index
    %9 = vector.load %arg4[%c0_5, %c0_6] : memref<2x16xf32, #tpu.memory_space<vmem>>, vector<1x16xf32>
    %10 = vector.broadcast %9 : vector<1x16xf32> to vector<8x16xf32>
    %11 = arith.addf %8, %10 : vector<8x16xf32>
    %12 = tpu.concatenate %11, %11 in 0 : vector<8x16xf32>, vector<8x16xf32> -> vector<16x16xf32>
    %13 = arith.addf %7, %12 : vector<16x16xf32>
    %c0_7 = arith.constant 0 : index
    %c0_8 = arith.constant 0 : index
    %14 = vector.load %arg5[%c0_7, %c0_8] : memref<1x16xf32, #tpu.memory_space<vmem>>, vector<1x16xf32>
    %c0_9 = arith.constant 0 : index
    %c0_10 = arith.constant 0 : index
    %15 = vector.load %arg6[%c0_9, %c0_10] : memref<1x16xf32, #tpu.memory_space<vmem>>, vector<1x16xf32>
    %cst_11 = arith.constant dense<0.000000e+00> : vector<16xf32>
    %16 = vector.multi_reduction <add>, %13, %cst_11 [1] : vector<16x16xf32> to vector<16xf32>
    %17 = vector.shape_cast %16 : vector<16xf32> to vector<16x1xf32>
    %cst_12 = arith.constant 1.600000e+01 : f32
    %18 = vector.broadcast %cst_12 : f32 to vector<16x1xf32>
    %19 = arith.divf %17, %18 : vector<16x1xf32>
    %20 = vector.broadcast %19 : vector<16x1xf32> to vector<16x16xf32>
    %21 = arith.subf %13, %20 : vector<16x16xf32>
    %22 = arith.mulf %21, %21 : vector<16x16xf32>
    %cst_13 = arith.constant dense<0.000000e+00> : vector<16xf32>
    %23 = vector.multi_reduction <add>, %22, %cst_13 [1] : vector<16x16xf32> to vector<16xf32>
    %24 = vector.shape_cast %23 : vector<16xf32> to vector<16x1xf32>
    %cst_14 = arith.constant 1.600000e+01 : f32
    %25 = vector.broadcast %cst_14 : f32 to vector<16x1xf32>
    %26 = arith.divf %24, %25 : vector<16x1xf32>
    %27 = vector.broadcast %19 : vector<16x1xf32> to vector<16x16xf32>
    %28 = arith.subf %13, %27 : vector<16x16xf32>
    %cst_15 = arith.constant 9.99999996E-13 : f32
    %29 = vector.broadcast %cst_15 : f32 to vector<16x1xf32>
    %30 = arith.addf %26, %29 : vector<16x1xf32>
    %31 = math.rsqrt %30 : vector<16x1xf32>
    %32 = vector.broadcast %31 : vector<16x1xf32> to vector<16x16xf32>
    %33 = arith.mulf %28, %32 : vector<16x16xf32>
    %34 = vector.broadcast %14 : vector<1x16xf32> to vector<16x16xf32>
    %35 = arith.mulf %33, %34 : vector<16x16xf32>
    %36 = vector.broadcast %15 : vector<1x16xf32> to vector<16x16xf32>
    %37 = arith.addf %35, %36 : vector<16x16xf32>
    %c0_16 = arith.constant 0 : index
    %c0_17 = arith.constant 0 : index
    %38 = vector.load %arg7[%c0_16, %c0_17] : memref<16x32xf32, #tpu.memory_space<vmem>>, vector<16x32xf32>
    %cst_18 = arith.constant dense<0.000000e+00> : vector<16x32xf32>
    %39 = tpu.matmul %37, %38, %cst_18 {dimension_numbers = #tpu.dot_dimension_numbers<[1], [0], [0], [1], [0, 0, 1, 1], [], []>} : vector<16x16xf32>, vector<16x32xf32>, vector<16x32xf32> -> vector<16x32xf32>
    %c0_19 = arith.constant 0 : index
    %c0_20 = arith.constant 0 : index
    %40 = vector.load %arg8[%c0_19, %c0_20] : memref<1x32xf32, #tpu.memory_space<vmem>>, vector<1x32xf32>
    %41 = vector.broadcast %40 : vector<1x32xf32> to vector<16x32xf32>
    %42 = arith.addf %39, %41 : vector<16x32xf32>
    %c0_21 = arith.constant 0 : index
    %c0_22 = arith.constant 0 : index
    %43 = vector.load %arg1[%c0_21, %c0_22] : memref<1x16xf32, #tpu.memory_space<vmem>>, vector<1x16xf32>
    %cst_23 = arith.constant 1.000000e+00 : f32
    %44 = vector.broadcast %cst_23 : f32 to vector<1x16xf32>
    %45 = arith.subf %44, %43 : vector<1x16xf32>
    %cst_24 = arith.constant -1.000000e+09 : f32
    %46 = vector.broadcast %cst_24 : f32 to vector<1x16xf32>
    %47 = arith.mulf %45, %46 : vector<1x16xf32>
    %48 = tpu.iota {dimensions = array<i32: 0>} : vector<16x16xi32>
    %49 = arith.sitofp %48 : vector<16x16xi32> to vector<16x16xf32>
    %cst_25 = arith.constant 1.250000e-01 : f32
    %50 = vector.broadcast %cst_25 : f32 to vector<16x16xf32>
    %51 = arith.mulf %49, %50 : vector<16x16xf32>
    %52 = math.floor %51 : vector<16x16xf32>
    %53 = tpu.iota {dimensions = array<i32: 1>} : vector<16x16xi32>
    %54 = arith.sitofp %53 : vector<16x16xi32> to vector<16x16xf32>
    %cst_26 = arith.constant 1.250000e-01 : f32
    %55 = vector.broadcast %cst_26 : f32 to vector<16x16xf32>
    %56 = arith.mulf %54, %55 : vector<16x16xf32>
    %57 = math.floor %56 : vector<16x16xf32>
    %58 = arith.cmpf oeq, %52, %57 : vector<16x16xf32>
    %cst_27 = arith.constant 0.000000e+00 : f32
    %cst_28 = arith.constant -1.000000e+09 : f32
    %59 = vector.broadcast %cst_27 : f32 to vector<16x16xf32>
    %60 = vector.broadcast %cst_28 : f32 to vector<16x16xf32>
    %61 = arith.select %58, %59, %60 : vector<16x16xi1>, vector<16x16xf32>
    %62 = vector.broadcast %47 : vector<1x16xf32> to vector<16x16xf32>
    %63 = arith.addf %62, %61 : vector<16x16xf32>
    %c0_29 = arith.constant 0 : index
    %c0_30 = arith.constant 0 : index
    %64 = vector.load %arg9[%c0_29, %c0_30] : memref<32x96xf32, #tpu.memory_space<vmem>>, vector<32x96xf32>
    %cst_31 = arith.constant dense<0.000000e+00> : vector<16x96xf32>
    %65 = tpu.matmul %42, %64, %cst_31 {dimension_numbers = #tpu.dot_dimension_numbers<[1], [0], [0], [1], [0, 0, 1, 1], [], []>} : vector<16x32xf32>, vector<32x96xf32>, vector<16x96xf32> -> vector<16x96xf32>
    %c0_32 = arith.constant 0 : index
    %c0_33 = arith.constant 0 : index
    %66 = vector.load %arg10[%c0_32, %c0_33] : memref<1x96xf32, #tpu.memory_space<vmem>>, vector<1x96xf32>
    %67 = vector.broadcast %66 : vector<1x96xf32> to vector<16x96xf32>
    %68 = arith.addf %65, %67 : vector<16x96xf32>
    %69 = vector.extract_strided_slice %68 {offsets = [0, 0], sizes = [16, 8], strides = [1, 1]} : vector<16x96xf32> to vector<16x8xf32>
    %70 = vector.extract_strided_slice %68 {offsets = [0, 32], sizes = [16, 8], strides = [1, 1]} : vector<16x96xf32> to vector<16x8xf32>
    %71 = vector.extract_strided_slice %68 {offsets = [0, 64], sizes = [16, 8], strides = [1, 1]} : vector<16x96xf32> to vector<16x8xf32>
    %cst_34 = arith.constant dense<0.000000e+00> : vector<16x16xf32>
    %72 = tpu.matmul %69, %70, %cst_34 {dimension_numbers = #tpu.dot_dimension_numbers<[1], [1], [0], [0], [0, 0, 1, 0], [], []>} : vector<16x8xf32>, vector<16x8xf32>, vector<16x16xf32> -> vector<16x16xf32>
    %cst_35 = arith.constant 0.353553385 : f32
    %73 = vector.broadcast %cst_35 : f32 to vector<16x16xf32>
    %74 = arith.mulf %72, %73 : vector<16x16xf32>
    %75 = arith.addf %74, %63 : vector<16x16xf32>
    %cst_36 = arith.constant dense<0xFF800000> : vector<16xf32>
    %76 = vector.multi_reduction <maximumf>, %75, %cst_36 [1] : vector<16x16xf32> to vector<16xf32>
    %77 = vector.shape_cast %76 : vector<16xf32> to vector<16x1xf32>
    %78 = vector.broadcast %77 : vector<16x1xf32> to vector<16x16xf32>
    %79 = arith.subf %75, %78 : vector<16x16xf32>
    %80 = math.exp %79 : vector<16x16xf32>
    %cst_37 = arith.constant dense<0.000000e+00> : vector<16xf32>
    %81 = vector.multi_reduction <add>, %80, %cst_37 [1] : vector<16x16xf32> to vector<16xf32>
    %82 = vector.shape_cast %81 : vector<16xf32> to vector<16x1xf32>
    %83 = tpu.reciprocal %82 {approx = true} : vector<16x1xf32> -> vector<16x1xf32>
    %84 = vector.broadcast %83 : vector<16x1xf32> to vector<16x16xf32>
    %85 = arith.mulf %80, %84 : vector<16x16xf32>
    %cst_38 = arith.constant dense<0.000000e+00> : vector<16x8xf32>
    %86 = tpu.matmul %85, %71, %cst_38 {dimension_numbers = #tpu.dot_dimension_numbers<[1], [0], [0], [1], [0, 0, 1, 1], [], []>} : vector<16x16xf32>, vector<16x8xf32>, vector<16x8xf32> -> vector<16x8xf32>
    %87 = vector.extract_strided_slice %68 {offsets = [0, 8], sizes = [16, 8], strides = [1, 1]} : vector<16x96xf32> to vector<16x8xf32>
    %88 = vector.extract_strided_slice %68 {offsets = [0, 40], sizes = [16, 8], strides = [1, 1]} : vector<16x96xf32> to vector<16x8xf32>
    %89 = vector.extract_strided_slice %68 {offsets = [0, 72], sizes = [16, 8], strides = [1, 1]} : vector<16x96xf32> to vector<16x8xf32>
    %cst_39 = arith.constant dense<0.000000e+00> : vector<16x16xf32>
    %90 = tpu.matmul %87, %88, %cst_39 {dimension_numbers = #tpu.dot_dimension_numbers<[1], [1], [0], [0], [0, 0, 1, 0], [], []>} : vector<16x8xf32>, vector<16x8xf32>, vector<16x16xf32> -> vector<16x16xf32>
    %cst_40 = arith.constant 0.353553385 : f32
    %91 = vector.broadcast %cst_40 : f32 to vector<16x16xf32>
    %92 = arith.mulf %90, %91 : vector<16x16xf32>
    %93 = arith.addf %92, %63 : vector<16x16xf32>
    %cst_41 = arith.constant dense<0xFF800000> : vector<16xf32>
    %94 = vector.multi_reduction <maximumf>, %93, %cst_41 [1] : vector<16x16xf32> to vector<16xf32>
    %95 = vector.shape_cast %94 : vector<16xf32> to vector<16x1xf32>
    %96 = vector.broadcast %95 : vector<16x1xf32> to vector<16x16xf32>
    %97 = arith.subf %93, %96 : vector<16x16xf32>
    %98 = math.exp %97 : vector<16x16xf32>
    %cst_42 = arith.constant dense<0.000000e+00> : vector<16xf32>
    %99 = vector.multi_reduction <add>, %98, %cst_42 [1] : vector<16x16xf32> to vector<16xf32>
    %100 = vector.shape_cast %99 : vector<16xf32> to vector<16x1xf32>
    %101 = tpu.reciprocal %100 {approx = true} : vector<16x1xf32> -> vector<16x1xf32>
    %102 = vector.broadcast %101 : vector<16x1xf32> to vector<16x16xf32>
    %103 = arith.mulf %98, %102 : vector<16x16xf32>
    %cst_43 = arith.constant dense<0.000000e+00> : vector<16x8xf32>
    %104 = tpu.matmul %103, %89, %cst_43 {dimension_numbers = #tpu.dot_dimension_numbers<[1], [0], [0], [1], [0, 0, 1, 1], [], []>} : vector<16x16xf32>, vector<16x8xf32>, vector<16x8xf32> -> vector<16x8xf32>
    %105 = vector.extract_strided_slice %68 {offsets = [0, 16], sizes = [16, 8], strides = [1, 1]} : vector<16x96xf32> to vector<16x8xf32>
    %106 = vector.extract_strided_slice %68 {offsets = [0, 48], sizes = [16, 8], strides = [1, 1]} : vector<16x96xf32> to vector<16x8xf32>
    %107 = vector.extract_strided_slice %68 {offsets = [0, 80], sizes = [16, 8], strides = [1, 1]} : vector<16x96xf32> to vector<16x8xf32>
    %cst_44 = arith.constant dense<0.000000e+00> : vector<16x16xf32>
    %108 = tpu.matmul %105, %106, %cst_44 {dimension_numbers = #tpu.dot_dimension_numbers<[1], [1], [0], [0], [0, 0, 1, 0], [], []>} : vector<16x8xf32>, vector<16x8xf32>, vector<16x16xf32> -> vector<16x16xf32>
    %cst_45 = arith.constant 0.353553385 : f32
    %109 = vector.broadcast %cst_45 : f32 to vector<16x16xf32>
    %110 = arith.mulf %108, %109 : vector<16x16xf32>
    %111 = arith.addf %110, %63 : vector<16x16xf32>
    %cst_46 = arith.constant dense<0xFF800000> : vector<16xf32>
    %112 = vector.multi_reduction <maximumf>, %111, %cst_46 [1] : vector<16x16xf32> to vector<16xf32>
    %113 = vector.shape_cast %112 : vector<16xf32> to vector<16x1xf32>
    %114 = vector.broadcast %113 : vector<16x1xf32> to vector<16x16xf32>
    %115 = arith.subf %111, %114 : vector<16x16xf32>
    %116 = math.exp %115 : vector<16x16xf32>
    %cst_47 = arith.constant dense<0.000000e+00> : vector<16xf32>
    %117 = vector.multi_reduction <add>, %116, %cst_47 [1] : vector<16x16xf32> to vector<16xf32>
    %118 = vector.shape_cast %117 : vector<16xf32> to vector<16x1xf32>
    %119 = tpu.reciprocal %118 {approx = true} : vector<16x1xf32> -> vector<16x1xf32>
    %120 = vector.broadcast %119 : vector<16x1xf32> to vector<16x16xf32>
    %121 = arith.mulf %116, %120 : vector<16x16xf32>
    %cst_48 = arith.constant dense<0.000000e+00> : vector<16x8xf32>
    %122 = tpu.matmul %121, %107, %cst_48 {dimension_numbers = #tpu.dot_dimension_numbers<[1], [0], [0], [1], [0, 0, 1, 1], [], []>} : vector<16x16xf32>, vector<16x8xf32>, vector<16x8xf32> -> vector<16x8xf32>
    %123 = vector.extract_strided_slice %68 {offsets = [0, 24], sizes = [16, 8], strides = [1, 1]} : vector<16x96xf32> to vector<16x8xf32>
    %124 = vector.extract_strided_slice %68 {offsets = [0, 56], sizes = [16, 8], strides = [1, 1]} : vector<16x96xf32> to vector<16x8xf32>
    %125 = vector.extract_strided_slice %68 {offsets = [0, 88], sizes = [16, 8], strides = [1, 1]} : vector<16x96xf32> to vector<16x8xf32>
    %cst_49 = arith.constant dense<0.000000e+00> : vector<16x16xf32>
    %126 = tpu.matmul %123, %124, %cst_49 {dimension_numbers = #tpu.dot_dimension_numbers<[1], [1], [0], [0], [0, 0, 1, 0], [], []>} : vector<16x8xf32>, vector<16x8xf32>, vector<16x16xf32> -> vector<16x16xf32>
    %cst_50 = arith.constant 0.353553385 : f32
    %127 = vector.broadcast %cst_50 : f32 to vector<16x16xf32>
    %128 = arith.mulf %126, %127 : vector<16x16xf32>
    %129 = arith.addf %128, %63 : vector<16x16xf32>
    %cst_51 = arith.constant dense<0xFF800000> : vector<16xf32>
    %130 = vector.multi_reduction <maximumf>, %129, %cst_51 [1] : vector<16x16xf32> to vector<16xf32>
    %131 = vector.shape_cast %130 : vector<16xf32> to vector<16x1xf32>
    %132 = vector.broadcast %131 : vector<16x1xf32> to vector<16x16xf32>
    %133 = arith.subf %129, %132 : vector<16x16xf32>
    %134 = math.exp %133 : vector<16x16xf32>
    %cst_52 = arith.constant dense<0.000000e+00> : vector<16xf32>
    %135 = vector.multi_reduction <add>, %134, %cst_52 [1] : vector<16x16xf32> to vector<16xf32>
    %136 = vector.shape_cast %135 : vector<16xf32> to vector<16x1xf32>
    %137 = tpu.reciprocal %136 {approx = true} : vector<16x1xf32> -> vector<16x1xf32>
    %138 = vector.broadcast %137 : vector<16x1xf32> to vector<16x16xf32>
    %139 = arith.mulf %134, %138 : vector<16x16xf32>
    %cst_53 = arith.constant dense<0.000000e+00> : vector<16x8xf32>
    %140 = tpu.matmul %139, %125, %cst_53 {dimension_numbers = #tpu.dot_dimension_numbers<[1], [0], [0], [1], [0, 0, 1, 1], [], []>} : vector<16x16xf32>, vector<16x8xf32>, vector<16x8xf32> -> vector<16x8xf32>
    %141 = tpu.concatenate %86, %104, %122, %140 in 1 : vector<16x8xf32>, vector<16x8xf32>, vector<16x8xf32>, vector<16x8xf32> -> vector<16x32xf32>
    %c0_54 = arith.constant 0 : index
    %c0_55 = arith.constant 0 : index
    %142 = vector.load %arg11[%c0_54, %c0_55] : memref<32x32xf32, #tpu.memory_space<vmem>>, vector<32x32xf32>
    %cst_56 = arith.constant dense<0.000000e+00> : vector<16x32xf32>
    %143 = tpu.matmul %141, %142, %cst_56 {dimension_numbers = #tpu.dot_dimension_numbers<[1], [0], [0], [1], [0, 0, 1, 1], [], []>} : vector<16x32xf32>, vector<32x32xf32>, vector<16x32xf32> -> vector<16x32xf32>
    %c0_57 = arith.constant 0 : index
    %c0_58 = arith.constant 0 : index
    %144 = vector.load %arg12[%c0_57, %c0_58] : memref<1x32xf32, #tpu.memory_space<vmem>>, vector<1x32xf32>
    %145 = vector.broadcast %144 : vector<1x32xf32> to vector<16x32xf32>
    %146 = arith.addf %143, %145 : vector<16x32xf32>
    %147 = arith.addf %42, %146 : vector<16x32xf32>
    %c0_59 = arith.constant 0 : index
    %c0_60 = arith.constant 0 : index
    %148 = vector.load %arg13[%c0_59, %c0_60] : memref<1x32xf32, #tpu.memory_space<vmem>>, vector<1x32xf32>
    %c0_61 = arith.constant 0 : index
    %c0_62 = arith.constant 0 : index
    %149 = vector.load %arg14[%c0_61, %c0_62] : memref<1x32xf32, #tpu.memory_space<vmem>>, vector<1x32xf32>
    %cst_63 = arith.constant dense<0.000000e+00> : vector<16xf32>
    %150 = vector.multi_reduction <add>, %147, %cst_63 [1] : vector<16x32xf32> to vector<16xf32>
    %151 = vector.shape_cast %150 : vector<16xf32> to vector<16x1xf32>
    %cst_64 = arith.constant 3.200000e+01 : f32
    %152 = vector.broadcast %cst_64 : f32 to vector<16x1xf32>
    %153 = arith.divf %151, %152 : vector<16x1xf32>
    %154 = vector.broadcast %153 : vector<16x1xf32> to vector<16x32xf32>
    %155 = arith.subf %147, %154 : vector<16x32xf32>
    %156 = arith.mulf %155, %155 : vector<16x32xf32>
    %cst_65 = arith.constant dense<0.000000e+00> : vector<16xf32>
    %157 = vector.multi_reduction <add>, %156, %cst_65 [1] : vector<16x32xf32> to vector<16xf32>
    %158 = vector.shape_cast %157 : vector<16xf32> to vector<16x1xf32>
    %cst_66 = arith.constant 3.200000e+01 : f32
    %159 = vector.broadcast %cst_66 : f32 to vector<16x1xf32>
    %160 = arith.divf %158, %159 : vector<16x1xf32>
    %161 = vector.broadcast %153 : vector<16x1xf32> to vector<16x32xf32>
    %162 = arith.subf %147, %161 : vector<16x32xf32>
    %cst_67 = arith.constant 9.99999996E-13 : f32
    %163 = vector.broadcast %cst_67 : f32 to vector<16x1xf32>
    %164 = arith.addf %160, %163 : vector<16x1xf32>
    %165 = math.rsqrt %164 : vector<16x1xf32>
    %166 = vector.broadcast %165 : vector<16x1xf32> to vector<16x32xf32>
    %167 = arith.mulf %162, %166 : vector<16x32xf32>
    %168 = vector.broadcast %148 : vector<1x32xf32> to vector<16x32xf32>
    %169 = arith.mulf %167, %168 : vector<16x32xf32>
    %170 = vector.broadcast %149 : vector<1x32xf32> to vector<16x32xf32>
    %171 = arith.addf %169, %170 : vector<16x32xf32>
    %c0_68 = arith.constant 0 : index
    %c0_69 = arith.constant 0 : index
    %172 = vector.load %arg15[%c0_68, %c0_69] : memref<32x128xf32, #tpu.memory_space<vmem>>, vector<32x128xf32>
    %cst_70 = arith.constant dense<0.000000e+00> : vector<16x128xf32>
    %173 = tpu.matmul %171, %172, %cst_70 {dimension_numbers = #tpu.dot_dimension_numbers<[1], [0], [0], [1], [0, 0, 1, 1], [], []>} : vector<16x32xf32>, vector<32x128xf32>, vector<16x128xf32> -> vector<16x128xf32>
    %c0_71 = arith.constant 0 : index
    %c0_72 = arith.constant 0 : index
    %174 = vector.load %arg16[%c0_71, %c0_72] : memref<1x128xf32, #tpu.memory_space<vmem>>, vector<1x128xf32>
    %175 = vector.broadcast %174 : vector<1x128xf32> to vector<16x128xf32>
    %176 = arith.addf %173, %175 : vector<16x128xf32>
    %177 = arith.mulf %176, %176 : vector<16x128xf32>
    %178 = arith.mulf %176, %177 : vector<16x128xf32>
    %cst_73 = arith.constant 4.471500e-02 : f32
    %179 = vector.broadcast %cst_73 : f32 to vector<16x128xf32>
    %180 = arith.mulf %179, %178 : vector<16x128xf32>
    %181 = arith.addf %176, %180 : vector<16x128xf32>
    %cst_74 = arith.constant 0.797884583 : f32
    %182 = vector.broadcast %cst_74 : f32 to vector<16x128xf32>
    %183 = arith.mulf %182, %181 : vector<16x128xf32>
    %184 = math.tanh %183 : vector<16x128xf32>
    %cst_75 = arith.constant 1.000000e+00 : f32
    %185 = vector.broadcast %cst_75 : f32 to vector<16x128xf32>
    %186 = arith.addf %185, %184 : vector<16x128xf32>
    %cst_76 = arith.constant 5.000000e-01 : f32
    %187 = vector.broadcast %cst_76 : f32 to vector<16x128xf32>
    %188 = arith.mulf %187, %186 : vector<16x128xf32>
    %189 = arith.mulf %176, %188 : vector<16x128xf32>
    %c0_77 = arith.constant 0 : index
    %c0_78 = arith.constant 0 : index
    %190 = vector.load %arg17[%c0_77, %c0_78] : memref<128x32xf32, #tpu.memory_space<vmem>>, vector<128x32xf32>
    %cst_79 = arith.constant dense<0.000000e+00> : vector<16x32xf32>
    %191 = tpu.matmul %189, %190, %cst_79 {dimension_numbers = #tpu.dot_dimension_numbers<[1], [0], [0], [1], [0, 0, 1, 1], [], []>} : vector<16x128xf32>, vector<128x32xf32>, vector<16x32xf32> -> vector<16x32xf32>
    %c0_80 = arith.constant 0 : index
    %c0_81 = arith.constant 0 : index
    %192 = vector.load %arg18[%c0_80, %c0_81] : memref<1x32xf32, #tpu.memory_space<vmem>>, vector<1x32xf32>
    %193 = vector.broadcast %192 : vector<1x32xf32> to vector<16x32xf32>
    %194 = arith.addf %191, %193 : vector<16x32xf32>
    %195 = arith.addf %171, %194 : vector<16x32xf32>
    %c0_82 = arith.constant 0 : index
    %c0_83 = arith.constant 0 : index
    %196 = vector.load %arg19[%c0_82, %c0_83] : memref<1x32xf32, #tpu.memory_space<vmem>>, vector<1x32xf32>
    %c0_84 = arith.constant 0 : index
    %c0_85 = arith.constant 0 : index
    %197 = vector.load %arg20[%c0_84, %c0_85] : memref<1x32xf32, #tpu.memory_space<vmem>>, vector<1x32xf32>
    %cst_86 = arith.constant dense<0.000000e+00> : vector<16xf32>
    %198 = vector.multi_reduction <add>, %195, %cst_86 [1] : vector<16x32xf32> to vector<16xf32>
    %199 = vector.shape_cast %198 : vector<16xf32> to vector<16x1xf32>
    %cst_87 = arith.constant 3.200000e+01 : f32
    %200 = vector.broadcast %cst_87 : f32 to vector<16x1xf32>
    %201 = arith.divf %199, %200 : vector<16x1xf32>
    %202 = vector.broadcast %201 : vector<16x1xf32> to vector<16x32xf32>
    %203 = arith.subf %195, %202 : vector<16x32xf32>
    %204 = arith.mulf %203, %203 : vector<16x32xf32>
    %cst_88 = arith.constant dense<0.000000e+00> : vector<16xf32>
    %205 = vector.multi_reduction <add>, %204, %cst_88 [1] : vector<16x32xf32> to vector<16xf32>
    %206 = vector.shape_cast %205 : vector<16xf32> to vector<16x1xf32>
    %cst_89 = arith.constant 3.200000e+01 : f32
    %207 = vector.broadcast %cst_89 : f32 to vector<16x1xf32>
    %208 = arith.divf %206, %207 : vector<16x1xf32>
    %209 = vector.broadcast %201 : vector<16x1xf32> to vector<16x32xf32>
    %210 = arith.subf %195, %209 : vector<16x32xf32>
    %cst_90 = arith.constant 9.99999996E-13 : f32
    %211 = vector.broadcast %cst_90 : f32 to vector<16x1xf32>
    %212 = arith.addf %208, %211 : vector<16x1xf32>
    %213 = math.rsqrt %212 : vector<16x1xf32>
    %214 = vector.broadcast %213 : vector<16x1xf32> to vector<16x32xf32>
    %215 = arith.mulf %210, %214 : vector<16x32xf32>
    %216 = vector.broadcast %196 : vector<1x32xf32> to vector<16x32xf32>
    %217 = arith.mulf %215, %216 : vector<16x32xf32>
    %218 = vector.broadcast %197 : vector<1x32xf32> to vector<16x32xf32>
    %219 = arith.addf %217, %218 : vector<16x32xf32>
    %c0_91 = arith.constant 0 : index
    %c0_92 = arith.constant 0 : index
    %220 = vector.load %arg9[%c0_91, %c0_92] : memref<32x96xf32, #tpu.memory_space<vmem>>, vector<32x96xf32>
    %cst_93 = arith.constant dense<0.000000e+00> : vector<16x96xf32>
    %221 = tpu.matmul %219, %220, %cst_93 {dimension_numbers = #tpu.dot_dimension_numbers<[1], [0], [0], [1], [0, 0, 1, 1], [], []>} : vector<16x32xf32>, vector<32x96xf32>, vector<16x96xf32> -> vector<16x96xf32>
    %c0_94 = arith.constant 0 : index
    %c0_95 = arith.constant 0 : index
    %222 = vector.load %arg10[%c0_94, %c0_95] : memref<1x96xf32, #tpu.memory_space<vmem>>, vector<1x96xf32>
    %223 = vector.broadcast %222 : vector<1x96xf32> to vector<16x96xf32>
    %224 = arith.addf %221, %223 : vector<16x96xf32>
    %225 = vector.extract_strided_slice %224 {offsets = [0, 0], sizes = [16, 8], strides = [1, 1]} : vector<16x96xf32> to vector<16x8xf32>
    %226 = vector.extract_strided_slice %224 {offsets = [0, 32], sizes = [16, 8], strides = [1, 1]} : vector<16x96xf32> to vector<16x8xf32>
    %227 = vector.extract_strided_slice %224 {offsets = [0, 64], sizes = [16, 8], strides = [1, 1]} : vector<16x96xf32> to vector<16x8xf32>
    %cst_96 = arith.constant dense<0.000000e+00> : vector<16x16xf32>
    %228 = tpu.matmul %225, %226, %cst_96 {dimension_numbers = #tpu.dot_dimension_numbers<[1], [1], [0], [0], [0, 0, 1, 0], [], []>} : vector<16x8xf32>, vector<16x8xf32>, vector<16x16xf32> -> vector<16x16xf32>
    %cst_97 = arith.constant 0.353553385 : f32
    %229 = vector.broadcast %cst_97 : f32 to vector<16x16xf32>
    %230 = arith.mulf %228, %229 : vector<16x16xf32>
    %231 = arith.addf %230, %63 : vector<16x16xf32>
    %cst_98 = arith.constant dense<0xFF800000> : vector<16xf32>
    %232 = vector.multi_reduction <maximumf>, %231, %cst_98 [1] : vector<16x16xf32> to vector<16xf32>
    %233 = vector.shape_cast %232 : vector<16xf32> to vector<16x1xf32>
    %234 = vector.broadcast %233 : vector<16x1xf32> to vector<16x16xf32>
    %235 = arith.subf %231, %234 : vector<16x16xf32>
    %236 = math.exp %235 : vector<16x16xf32>
    %cst_99 = arith.constant dense<0.000000e+00> : vector<16xf32>
    %237 = vector.multi_reduction <add>, %236, %cst_99 [1] : vector<16x16xf32> to vector<16xf32>
    %238 = vector.shape_cast %237 : vector<16xf32> to vector<16x1xf32>
    %239 = tpu.reciprocal %238 {approx = true} : vector<16x1xf32> -> vector<16x1xf32>
    %240 = vector.broadcast %239 : vector<16x1xf32> to vector<16x16xf32>
    %241 = arith.mulf %236, %240 : vector<16x16xf32>
    %cst_100 = arith.constant dense<0.000000e+00> : vector<16x8xf32>
    %242 = tpu.matmul %241, %227, %cst_100 {dimension_numbers = #tpu.dot_dimension_numbers<[1], [0], [0], [1], [0, 0, 1, 1], [], []>} : vector<16x16xf32>, vector<16x8xf32>, vector<16x8xf32> -> vector<16x8xf32>
    %243 = vector.extract_strided_slice %224 {offsets = [0, 8], sizes = [16, 8], strides = [1, 1]} : vector<16x96xf32> to vector<16x8xf32>
    %244 = vector.extract_strided_slice %224 {offsets = [0, 40], sizes = [16, 8], strides = [1, 1]} : vector<16x96xf32> to vector<16x8xf32>
    %245 = vector.extract_strided_slice %224 {offsets = [0, 72], sizes = [16, 8], strides = [1, 1]} : vector<16x96xf32> to vector<16x8xf32>
    %cst_101 = arith.constant dense<0.000000e+00> : vector<16x16xf32>
    %246 = tpu.matmul %243, %244, %cst_101 {dimension_numbers = #tpu.dot_dimension_numbers<[1], [1], [0], [0], [0, 0, 1, 0], [], []>} : vector<16x8xf32>, vector<16x8xf32>, vector<16x16xf32> -> vector<16x16xf32>
    %cst_102 = arith.constant 0.353553385 : f32
    %247 = vector.broadcast %cst_102 : f32 to vector<16x16xf32>
    %248 = arith.mulf %246, %247 : vector<16x16xf32>
    %249 = arith.addf %248, %63 : vector<16x16xf32>
    %cst_103 = arith.constant dense<0xFF800000> : vector<16xf32>
    %250 = vector.multi_reduction <maximumf>, %249, %cst_103 [1] : vector<16x16xf32> to vector<16xf32>
    %251 = vector.shape_cast %250 : vector<16xf32> to vector<16x1xf32>
    %252 = vector.broadcast %251 : vector<16x1xf32> to vector<16x16xf32>
    %253 = arith.subf %249, %252 : vector<16x16xf32>
    %254 = math.exp %253 : vector<16x16xf32>
    %cst_104 = arith.constant dense<0.000000e+00> : vector<16xf32>
    %255 = vector.multi_reduction <add>, %254, %cst_104 [1] : vector<16x16xf32> to vector<16xf32>
    %256 = vector.shape_cast %255 : vector<16xf32> to vector<16x1xf32>
    %257 = tpu.reciprocal %256 {approx = true} : vector<16x1xf32> -> vector<16x1xf32>
    %258 = vector.broadcast %257 : vector<16x1xf32> to vector<16x16xf32>
    %259 = arith.mulf %254, %258 : vector<16x16xf32>
    %cst_105 = arith.constant dense<0.000000e+00> : vector<16x8xf32>
    %260 = tpu.matmul %259, %245, %cst_105 {dimension_numbers = #tpu.dot_dimension_numbers<[1], [0], [0], [1], [0, 0, 1, 1], [], []>} : vector<16x16xf32>, vector<16x8xf32>, vector<16x8xf32> -> vector<16x8xf32>
    %261 = vector.extract_strided_slice %224 {offsets = [0, 16], sizes = [16, 8], strides = [1, 1]} : vector<16x96xf32> to vector<16x8xf32>
    %262 = vector.extract_strided_slice %224 {offsets = [0, 48], sizes = [16, 8], strides = [1, 1]} : vector<16x96xf32> to vector<16x8xf32>
    %263 = vector.extract_strided_slice %224 {offsets = [0, 80], sizes = [16, 8], strides = [1, 1]} : vector<16x96xf32> to vector<16x8xf32>
    %cst_106 = arith.constant dense<0.000000e+00> : vector<16x16xf32>
    %264 = tpu.matmul %261, %262, %cst_106 {dimension_numbers = #tpu.dot_dimension_numbers<[1], [1], [0], [0], [0, 0, 1, 0], [], []>} : vector<16x8xf32>, vector<16x8xf32>, vector<16x16xf32> -> vector<16x16xf32>
    %cst_107 = arith.constant 0.353553385 : f32
    %265 = vector.broadcast %cst_107 : f32 to vector<16x16xf32>
    %266 = arith.mulf %264, %265 : vector<16x16xf32>
    %267 = arith.addf %266, %63 : vector<16x16xf32>
    %cst_108 = arith.constant dense<0xFF800000> : vector<16xf32>
    %268 = vector.multi_reduction <maximumf>, %267, %cst_108 [1] : vector<16x16xf32> to vector<16xf32>
    %269 = vector.shape_cast %268 : vector<16xf32> to vector<16x1xf32>
    %270 = vector.broadcast %269 : vector<16x1xf32> to vector<16x16xf32>
    %271 = arith.subf %267, %270 : vector<16x16xf32>
    %272 = math.exp %271 : vector<16x16xf32>
    %cst_109 = arith.constant dense<0.000000e+00> : vector<16xf32>
    %273 = vector.multi_reduction <add>, %272, %cst_109 [1] : vector<16x16xf32> to vector<16xf32>
    %274 = vector.shape_cast %273 : vector<16xf32> to vector<16x1xf32>
    %275 = tpu.reciprocal %274 {approx = true} : vector<16x1xf32> -> vector<16x1xf32>
    %276 = vector.broadcast %275 : vector<16x1xf32> to vector<16x16xf32>
    %277 = arith.mulf %272, %276 : vector<16x16xf32>
    %cst_110 = arith.constant dense<0.000000e+00> : vector<16x8xf32>
    %278 = tpu.matmul %277, %263, %cst_110 {dimension_numbers = #tpu.dot_dimension_numbers<[1], [0], [0], [1], [0, 0, 1, 1], [], []>} : vector<16x16xf32>, vector<16x8xf32>, vector<16x8xf32> -> vector<16x8xf32>
    %279 = vector.extract_strided_slice %224 {offsets = [0, 24], sizes = [16, 8], strides = [1, 1]} : vector<16x96xf32> to vector<16x8xf32>
    %280 = vector.extract_strided_slice %224 {offsets = [0, 56], sizes = [16, 8], strides = [1, 1]} : vector<16x96xf32> to vector<16x8xf32>
    %281 = vector.extract_strided_slice %224 {offsets = [0, 88], sizes = [16, 8], strides = [1, 1]} : vector<16x96xf32> to vector<16x8xf32>
    %cst_111 = arith.constant dense<0.000000e+00> : vector<16x16xf32>
    %282 = tpu.matmul %279, %280, %cst_111 {dimension_numbers = #tpu.dot_dimension_numbers<[1], [1], [0], [0], [0, 0, 1, 0], [], []>} : vector<16x8xf32>, vector<16x8xf32>, vector<16x16xf32> -> vector<16x16xf32>
    %cst_112 = arith.constant 0.353553385 : f32
    %283 = vector.broadcast %cst_112 : f32 to vector<16x16xf32>
    %284 = arith.mulf %282, %283 : vector<16x16xf32>
    %285 = arith.addf %284, %63 : vector<16x16xf32>
    %cst_113 = arith.constant dense<0xFF800000> : vector<16xf32>
    %286 = vector.multi_reduction <maximumf>, %285, %cst_113 [1] : vector<16x16xf32> to vector<16xf32>
    %287 = vector.shape_cast %286 : vector<16xf32> to vector<16x1xf32>
    %288 = vector.broadcast %287 : vector<16x1xf32> to vector<16x16xf32>
    %289 = arith.subf %285, %288 : vector<16x16xf32>
    %290 = math.exp %289 : vector<16x16xf32>
    %cst_114 = arith.constant dense<0.000000e+00> : vector<16xf32>
    %291 = vector.multi_reduction <add>, %290, %cst_114 [1] : vector<16x16xf32> to vector<16xf32>
    %292 = vector.shape_cast %291 : vector<16xf32> to vector<16x1xf32>
    %293 = tpu.reciprocal %292 {approx = true} : vector<16x1xf32> -> vector<16x1xf32>
    %294 = vector.broadcast %293 : vector<16x1xf32> to vector<16x16xf32>
    %295 = arith.mulf %290, %294 : vector<16x16xf32>
    %cst_115 = arith.constant dense<0.000000e+00> : vector<16x8xf32>
    %296 = tpu.matmul %295, %281, %cst_115 {dimension_numbers = #tpu.dot_dimension_numbers<[1], [0], [0], [1], [0, 0, 1, 1], [], []>} : vector<16x16xf32>, vector<16x8xf32>, vector<16x8xf32> -> vector<16x8xf32>
    %297 = tpu.concatenate %242, %260, %278, %296 in 1 : vector<16x8xf32>, vector<16x8xf32>, vector<16x8xf32>, vector<16x8xf32> -> vector<16x32xf32>
    %c0_116 = arith.constant 0 : index
    %c0_117 = arith.constant 0 : index
    %298 = vector.load %arg11[%c0_116, %c0_117] : memref<32x32xf32, #tpu.memory_space<vmem>>, vector<32x32xf32>
    %cst_118 = arith.constant dense<0.000000e+00> : vector<16x32xf32>
    %299 = tpu.matmul %297, %298, %cst_118 {dimension_numbers = #tpu.dot_dimension_numbers<[1], [0], [0], [1], [0, 0, 1, 1], [], []>} : vector<16x32xf32>, vector<32x32xf32>, vector<16x32xf32> -> vector<16x32xf32>
    %c0_119 = arith.constant 0 : index
    %c0_120 = arith.constant 0 : index
    %300 = vector.load %arg12[%c0_119, %c0_120] : memref<1x32xf32, #tpu.memory_space<vmem>>, vector<1x32xf32>
    %301 = vector.broadcast %300 : vector<1x32xf32> to vector<16x32xf32>
    %302 = arith.addf %299, %301 : vector<16x32xf32>
    %303 = arith.addf %219, %302 : vector<16x32xf32>
    %c0_121 = arith.constant 0 : index
    %c0_122 = arith.constant 0 : index
    %304 = vector.load %arg13[%c0_121, %c0_122] : memref<1x32xf32, #tpu.memory_space<vmem>>, vector<1x32xf32>
    %c0_123 = arith.constant 0 : index
    %c0_124 = arith.constant 0 : index
    %305 = vector.load %arg14[%c0_123, %c0_124] : memref<1x32xf32, #tpu.memory_space<vmem>>, vector<1x32xf32>
    %cst_125 = arith.constant dense<0.000000e+00> : vector<16xf32>
    %306 = vector.multi_reduction <add>, %303, %cst_125 [1] : vector<16x32xf32> to vector<16xf32>
    %307 = vector.shape_cast %306 : vector<16xf32> to vector<16x1xf32>
    %cst_126 = arith.constant 3.200000e+01 : f32
    %308 = vector.broadcast %cst_126 : f32 to vector<16x1xf32>
    %309 = arith.divf %307, %308 : vector<16x1xf32>
    %310 = vector.broadcast %309 : vector<16x1xf32> to vector<16x32xf32>
    %311 = arith.subf %303, %310 : vector<16x32xf32>
    %312 = arith.mulf %311, %311 : vector<16x32xf32>
    %cst_127 = arith.constant dense<0.000000e+00> : vector<16xf32>
    %313 = vector.multi_reduction <add>, %312, %cst_127 [1] : vector<16x32xf32> to vector<16xf32>
    %314 = vector.shape_cast %313 : vector<16xf32> to vector<16x1xf32>
    %cst_128 = arith.constant 3.200000e+01 : f32
    %315 = vector.broadcast %cst_128 : f32 to vector<16x1xf32>
    %316 = arith.divf %314, %315 : vector<16x1xf32>
    %317 = vector.broadcast %309 : vector<16x1xf32> to vector<16x32xf32>
    %318 = arith.subf %303, %317 : vector<16x32xf32>
    %cst_129 = arith.constant 9.99999996E-13 : f32
    %319 = vector.broadcast %cst_129 : f32 to vector<16x1xf32>
    %320 = arith.addf %316, %319 : vector<16x1xf32>
    %321 = math.rsqrt %320 : vector<16x1xf32>
    %322 = vector.broadcast %321 : vector<16x1xf32> to vector<16x32xf32>
    %323 = arith.mulf %318, %322 : vector<16x32xf32>
    %324 = vector.broadcast %304 : vector<1x32xf32> to vector<16x32xf32>
    %325 = arith.mulf %323, %324 : vector<16x32xf32>
    %326 = vector.broadcast %305 : vector<1x32xf32> to vector<16x32xf32>
    %327 = arith.addf %325, %326 : vector<16x32xf32>
    %c0_130 = arith.constant 0 : index
    %c0_131 = arith.constant 0 : index
    %328 = vector.load %arg15[%c0_130, %c0_131] : memref<32x128xf32, #tpu.memory_space<vmem>>, vector<32x128xf32>
    %cst_132 = arith.constant dense<0.000000e+00> : vector<16x128xf32>
    %329 = tpu.matmul %327, %328, %cst_132 {dimension_numbers = #tpu.dot_dimension_numbers<[1], [0], [0], [1], [0, 0, 1, 1], [], []>} : vector<16x32xf32>, vector<32x128xf32>, vector<16x128xf32> -> vector<16x128xf32>
    %c0_133 = arith.constant 0 : index
    %c0_134 = arith.constant 0 : index
    %330 = vector.load %arg16[%c0_133, %c0_134] : memref<1x128xf32, #tpu.memory_space<vmem>>, vector<1x128xf32>
    %331 = vector.broadcast %330 : vector<1x128xf32> to vector<16x128xf32>
    %332 = arith.addf %329, %331 : vector<16x128xf32>
    %333 = arith.mulf %332, %332 : vector<16x128xf32>
    %334 = arith.mulf %332, %333 : vector<16x128xf32>
    %cst_135 = arith.constant 4.471500e-02 : f32
    %335 = vector.broadcast %cst_135 : f32 to vector<16x128xf32>
    %336 = arith.mulf %335, %334 : vector<16x128xf32>
    %337 = arith.addf %332, %336 : vector<16x128xf32>
    %cst_136 = arith.constant 0.797884583 : f32
    %338 = vector.broadcast %cst_136 : f32 to vector<16x128xf32>
    %339 = arith.mulf %338, %337 : vector<16x128xf32>
    %340 = math.tanh %339 : vector<16x128xf32>
    %cst_137 = arith.constant 1.000000e+00 : f32
    %341 = vector.broadcast %cst_137 : f32 to vector<16x128xf32>
    %342 = arith.addf %341, %340 : vector<16x128xf32>
    %cst_138 = arith.constant 5.000000e-01 : f32
    %343 = vector.broadcast %cst_138 : f32 to vector<16x128xf32>
    %344 = arith.mulf %343, %342 : vector<16x128xf32>
    %345 = arith.mulf %332, %344 : vector<16x128xf32>
    %c0_139 = arith.constant 0 : index
    %c0_140 = arith.constant 0 : index
    %346 = vector.load %arg17[%c0_139, %c0_140] : memref<128x32xf32, #tpu.memory_space<vmem>>, vector<128x32xf32>
    %cst_141 = arith.constant dense<0.000000e+00> : vector<16x32xf32>
    %347 = tpu.matmul %345, %346, %cst_141 {dimension_numbers = #tpu.dot_dimension_numbers<[1], [0], [0], [1], [0, 0, 1, 1], [], []>} : vector<16x128xf32>, vector<128x32xf32>, vector<16x32xf32> -> vector<16x32xf32>
    %c0_142 = arith.constant 0 : index
    %c0_143 = arith.constant 0 : index
    %348 = vector.load %arg18[%c0_142, %c0_143] : memref<1x32xf32, #tpu.memory_space<vmem>>, vector<1x32xf32>
    %349 = vector.broadcast %348 : vector<1x32xf32> to vector<16x32xf32>
    %350 = arith.addf %347, %349 : vector<16x32xf32>
    %351 = arith.addf %327, %350 : vector<16x32xf32>
    %c0_144 = arith.constant 0 : index
    %c0_145 = arith.constant 0 : index
    %352 = vector.load %arg19[%c0_144, %c0_145] : memref<1x32xf32, #tpu.memory_space<vmem>>, vector<1x32xf32>
    %c0_146 = arith.constant 0 : index
    %c0_147 = arith.constant 0 : index
    %353 = vector.load %arg20[%c0_146, %c0_147] : memref<1x32xf32, #tpu.memory_space<vmem>>, vector<1x32xf32>
    %cst_148 = arith.constant dense<0.000000e+00> : vector<16xf32>
    %354 = vector.multi_reduction <add>, %351, %cst_148 [1] : vector<16x32xf32> to vector<16xf32>
    %355 = vector.shape_cast %354 : vector<16xf32> to vector<16x1xf32>
    %cst_149 = arith.constant 3.200000e+01 : f32
    %356 = vector.broadcast %cst_149 : f32 to vector<16x1xf32>
    %357 = arith.divf %355, %356 : vector<16x1xf32>
    %358 = vector.broadcast %357 : vector<16x1xf32> to vector<16x32xf32>
    %359 = arith.subf %351, %358 : vector<16x32xf32>
    %360 = arith.mulf %359, %359 : vector<16x32xf32>
    %cst_150 = arith.constant dense<0.000000e+00> : vector<16xf32>
    %361 = vector.multi_reduction <add>, %360, %cst_150 [1] : vector<16x32xf32> to vector<16xf32>
    %362 = vector.shape_cast %361 : vector<16xf32> to vector<16x1xf32>
    %cst_151 = arith.constant 3.200000e+01 : f32
    %363 = vector.broadcast %cst_151 : f32 to vector<16x1xf32>
    %364 = arith.divf %362, %363 : vector<16x1xf32>
    %365 = vector.broadcast %357 : vector<16x1xf32> to vector<16x32xf32>
    %366 = arith.subf %351, %365 : vector<16x32xf32>
    %cst_152 = arith.constant 9.99999996E-13 : f32
    %367 = vector.broadcast %cst_152 : f32 to vector<16x1xf32>
    %368 = arith.addf %364, %367 : vector<16x1xf32>
    %369 = math.rsqrt %368 : vector<16x1xf32>
    %370 = vector.broadcast %369 : vector<16x1xf32> to vector<16x32xf32>
    %371 = arith.mulf %366, %370 : vector<16x32xf32>
    %372 = vector.broadcast %352 : vector<1x32xf32> to vector<16x32xf32>
    %373 = arith.mulf %371, %372 : vector<16x32xf32>
    %374 = vector.broadcast %353 : vector<1x32xf32> to vector<16x32xf32>
    %375 = arith.addf %373, %374 : vector<16x32xf32>
    %c0_153 = arith.constant 0 : index
    %c0_154 = arith.constant 0 : index
    %376 = vector.load %arg21[%c0_153, %c0_154] : memref<32x384xf32, #tpu.memory_space<vmem>>, vector<32x384xf32>
    %cst_155 = arith.constant dense<0.000000e+00> : vector<16x384xf32>
    %377 = tpu.matmul %375, %376, %cst_155 {dimension_numbers = #tpu.dot_dimension_numbers<[1], [0], [0], [1], [0, 0, 1, 1], [], []>} : vector<16x32xf32>, vector<32x384xf32>, vector<16x384xf32> -> vector<16x384xf32>
    %c0_156 = arith.constant 0 : index
    %c0_157 = arith.constant 0 : index
    %378 = vector.load %arg22[%c0_156, %c0_157] : memref<1x384xf32, #tpu.memory_space<vmem>>, vector<1x384xf32>
    %379 = vector.broadcast %378 : vector<1x384xf32> to vector<16x384xf32>
    %380 = arith.addf %377, %379 : vector<16x384xf32>
    %381 = vector.shape_cast %380 : vector<16x384xf32> to vector<2x8x384xf32>
    %cst_158 = arith.constant 0.000000e+00 : f32
    %382 = vector.broadcast %cst_158 : f32 to vector<2x128xf32>
    %c0_159 = arith.constant 0 : index
    %c0_160 = arith.constant 0 : index
    %383 = vector.load %arg23[%c0_159, %c0_160] : memref<128x384xf32, #tpu.memory_space<vmem>>, vector<128x384xf32>
    %cst_161 = arith.constant dense<0.000000e+00> : vector<2x384xf32>
    %384 = tpu.matmul %382, %383, %cst_161 {dimension_numbers = #tpu.dot_dimension_numbers<[1], [0], [0], [1], [0, 0, 1, 1], [], []>} : vector<2x128xf32>, vector<128x384xf32>, vector<2x384xf32> -> vector<2x384xf32>
    %c0_162 = arith.constant 0 : index
    %c0_163 = arith.constant 0 : index
    %385 = vector.load %arg24[%c0_162, %c0_163] : memref<1x384xf32, #tpu.memory_space<vmem>>, vector<1x384xf32>
    %386 = vector.broadcast %385 : vector<1x384xf32> to vector<2x384xf32>
    %387 = arith.addf %384, %386 : vector<2x384xf32>
    %388 = vector.extract_strided_slice %381 {offsets = [0, 0, 0], sizes = [2, 1, 192], strides = [1, 1, 1]} : vector<2x8x384xf32> to vector<2x1x192xf32>
    %389 = vector.shape_cast %388 : vector<2x1x192xf32> to vector<2x192xf32>
    %390 = vector.extract_strided_slice %387 {offsets = [0, 0], sizes = [2, 192], strides = [1, 1]} : vector<2x384xf32> to vector<2x192xf32>
    %391 = vector.extract_strided_slice %382 {offsets = [0, 0], sizes = [2, 64], strides = [1, 1]} : vector<2x128xf32> to vector<2x64xf32>
    %392 = vector.extract_strided_slice %389 {offsets = [0, 0], sizes = [2, 64], strides = [1, 1]} : vector<2x192xf32> to vector<2x64xf32>
    %393 = vector.extract_strided_slice %390 {offsets = [0, 0], sizes = [2, 64], strides = [1, 1]} : vector<2x192xf32> to vector<2x64xf32>
    %394 = arith.addf %392, %393 : vector<2x64xf32>
    %395 = arith.negf %394 : vector<2x64xf32>
    %396 = math.exp %395 : vector<2x64xf32>
    %cst_164 = arith.constant 1.000000e+00 : f32
    %397 = vector.broadcast %cst_164 : f32 to vector<2x64xf32>
    %398 = arith.addf %397, %396 : vector<2x64xf32>
    %399 = arith.divf %397, %398 : vector<2x64xf32>
    %400 = vector.extract_strided_slice %389 {offsets = [0, 64], sizes = [2, 64], strides = [1, 1]} : vector<2x192xf32> to vector<2x64xf32>
    %401 = vector.extract_strided_slice %390 {offsets = [0, 64], sizes = [2, 64], strides = [1, 1]} : vector<2x192xf32> to vector<2x64xf32>
    %402 = arith.addf %400, %401 : vector<2x64xf32>
    %403 = arith.negf %402 : vector<2x64xf32>
    %404 = math.exp %403 : vector<2x64xf32>
    %cst_165 = arith.constant 1.000000e+00 : f32
    %405 = vector.broadcast %cst_165 : f32 to vector<2x64xf32>
    %406 = arith.addf %405, %404 : vector<2x64xf32>
    %407 = arith.divf %405, %406 : vector<2x64xf32>
    %408 = vector.extract_strided_slice %389 {offsets = [0, 128], sizes = [2, 64], strides = [1, 1]} : vector<2x192xf32> to vector<2x64xf32>
    %409 = vector.extract_strided_slice %390 {offsets = [0, 128], sizes = [2, 64], strides = [1, 1]} : vector<2x192xf32> to vector<2x64xf32>
    %410 = arith.mulf %399, %409 : vector<2x64xf32>
    %411 = arith.addf %408, %410 : vector<2x64xf32>
    %412 = math.tanh %411 : vector<2x64xf32>
    %cst_166 = arith.constant 1.000000e+00 : f32
    %413 = vector.broadcast %cst_166 : f32 to vector<2x64xf32>
    %414 = arith.subf %413, %407 : vector<2x64xf32>
    %415 = arith.mulf %414, %412 : vector<2x64xf32>
    %416 = arith.mulf %407, %391 : vector<2x64xf32>
    %417 = arith.addf %415, %416 : vector<2x64xf32>
    %418 = vector.extract_strided_slice %381 {offsets = [0, 7, 192], sizes = [2, 1, 192], strides = [1, 1, 1]} : vector<2x8x384xf32> to vector<2x1x192xf32>
    %419 = vector.shape_cast %418 : vector<2x1x192xf32> to vector<2x192xf32>
    %420 = vector.extract_strided_slice %387 {offsets = [0, 192], sizes = [2, 192], strides = [1, 1]} : vector<2x384xf32> to vector<2x192xf32>
    %421 = vector.extract_strided_slice %382 {offsets = [0, 64], sizes = [2, 64], strides = [1, 1]} : vector<2x128xf32> to vector<2x64xf32>
    %422 = vector.extract_strided_slice %419 {offsets = [0, 0], sizes = [2, 64], strides = [1, 1]} : vector<2x192xf32> to vector<2x64xf32>
    %423 = vector.extract_strided_slice %420 {offsets = [0, 0], sizes = [2, 64], strides = [1, 1]} : vector<2x192xf32> to vector<2x64xf32>
    %424 = arith.addf %422, %423 : vector<2x64xf32>
    %425 = arith.negf %424 : vector<2x64xf32>
    %426 = math.exp %425 : vector<2x64xf32>
    %cst_167 = arith.constant 1.000000e+00 : f32
    %427 = vector.broadcast %cst_167 : f32 to vector<2x64xf32>
    %428 = arith.addf %427, %426 : vector<2x64xf32>
    %429 = arith.divf %427, %428 : vector<2x64xf32>
    %430 = vector.extract_strided_slice %419 {offsets = [0, 64], sizes = [2, 64], strides = [1, 1]} : vector<2x192xf32> to vector<2x64xf32>
    %431 = vector.extract_strided_slice %420 {offsets = [0, 64], sizes = [2, 64], strides = [1, 1]} : vector<2x192xf32> to vector<2x64xf32>
    %432 = arith.addf %430, %431 : vector<2x64xf32>
    %433 = arith.negf %432 : vector<2x64xf32>
    %434 = math.exp %433 : vector<2x64xf32>
    %cst_168 = arith.constant 1.000000e+00 : f32
    %435 = vector.broadcast %cst_168 : f32 to vector<2x64xf32>
    %436 = arith.addf %435, %434 : vector<2x64xf32>
    %437 = arith.divf %435, %436 : vector<2x64xf32>
    %438 = vector.extract_strided_slice %419 {offsets = [0, 128], sizes = [2, 64], strides = [1, 1]} : vector<2x192xf32> to vector<2x64xf32>
    %439 = vector.extract_strided_slice %420 {offsets = [0, 128], sizes = [2, 64], strides = [1, 1]} : vector<2x192xf32> to vector<2x64xf32>
    %440 = arith.mulf %429, %439 : vector<2x64xf32>
    %441 = arith.addf %438, %440 : vector<2x64xf32>
    %442 = math.tanh %441 : vector<2x64xf32>
    %cst_169 = arith.constant 1.000000e+00 : f32
    %443 = vector.broadcast %cst_169 : f32 to vector<2x64xf32>
    %444 = arith.subf %443, %437 : vector<2x64xf32>
    %445 = arith.mulf %444, %442 : vector<2x64xf32>
    %446 = arith.mulf %437, %421 : vector<2x64xf32>
    %447 = arith.addf %445, %446 : vector<2x64xf32>
    %448 = tpu.concatenate %417, %447 in 1 : vector<2x64xf32>, vector<2x64xf32> -> vector<2x128xf32>
    %c0_170 = arith.constant 0 : index
    %c0_171 = arith.constant 0 : index
    %449 = vector.load %arg23[%c0_170, %c0_171] : memref<128x384xf32, #tpu.memory_space<vmem>>, vector<128x384xf32>
    %cst_172 = arith.constant dense<0.000000e+00> : vector<2x384xf32>
    %450 = tpu.matmul %448, %449, %cst_172 {dimension_numbers = #tpu.dot_dimension_numbers<[1], [0], [0], [1], [0, 0, 1, 1], [], []>} : vector<2x128xf32>, vector<128x384xf32>, vector<2x384xf32> -> vector<2x384xf32>
    %c0_173 = arith.constant 0 : index
    %c0_174 = arith.constant 0 : index
    %451 = vector.load %arg24[%c0_173, %c0_174] : memref<1x384xf32, #tpu.memory_space<vmem>>, vector<1x384xf32>
    %452 = vector.broadcast %451 : vector<1x384xf32> to vector<2x384xf32>
    %453 = arith.addf %450, %452 : vector<2x384xf32>
    %454 = vector.extract_strided_slice %381 {offsets = [0, 1, 0], sizes = [2, 1, 192], strides = [1, 1, 1]} : vector<2x8x384xf32> to vector<2x1x192xf32>
    %455 = vector.shape_cast %454 : vector<2x1x192xf32> to vector<2x192xf32>
    %456 = vector.extract_strided_slice %453 {offsets = [0, 0], sizes = [2, 192], strides = [1, 1]} : vector<2x384xf32> to vector<2x192xf32>
    %457 = vector.extract_strided_slice %448 {offsets = [0, 0], sizes = [2, 64], strides = [1, 1]} : vector<2x128xf32> to vector<2x64xf32>
    %458 = vector.extract_strided_slice %455 {offsets = [0, 0], sizes = [2, 64], strides = [1, 1]} : vector<2x192xf32> to vector<2x64xf32>
    %459 = vector.extract_strided_slice %456 {offsets = [0, 0], sizes = [2, 64], strides = [1, 1]} : vector<2x192xf32> to vector<2x64xf32>
    %460 = arith.addf %458, %459 : vector<2x64xf32>
    %461 = arith.negf %460 : vector<2x64xf32>
    %462 = math.exp %461 : vector<2x64xf32>
    %cst_175 = arith.constant 1.000000e+00 : f32
    %463 = vector.broadcast %cst_175 : f32 to vector<2x64xf32>
    %464 = arith.addf %463, %462 : vector<2x64xf32>
    %465 = arith.divf %463, %464 : vector<2x64xf32>
    %466 = vector.extract_strided_slice %455 {offsets = [0, 64], sizes = [2, 64], strides = [1, 1]} : vector<2x192xf32> to vector<2x64xf32>
    %467 = vector.extract_strided_slice %456 {offsets = [0, 64], sizes = [2, 64], strides = [1, 1]} : vector<2x192xf32> to vector<2x64xf32>
    %468 = arith.addf %466, %467 : vector<2x64xf32>
    %469 = arith.negf %468 : vector<2x64xf32>
    %470 = math.exp %469 : vector<2x64xf32>
    %cst_176 = arith.constant 1.000000e+00 : f32
    %471 = vector.broadcast %cst_176 : f32 to vector<2x64xf32>
    %472 = arith.addf %471, %470 : vector<2x64xf32>
    %473 = arith.divf %471, %472 : vector<2x64xf32>
    %474 = vector.extract_strided_slice %455 {offsets = [0, 128], sizes = [2, 64], strides = [1, 1]} : vector<2x192xf32> to vector<2x64xf32>
    %475 = vector.extract_strided_slice %456 {offsets = [0, 128], sizes = [2, 64], strides = [1, 1]} : vector<2x192xf32> to vector<2x64xf32>
    %476 = arith.mulf %465, %475 : vector<2x64xf32>
    %477 = arith.addf %474, %476 : vector<2x64xf32>
    %478 = math.tanh %477 : vector<2x64xf32>
    %cst_177 = arith.constant 1.000000e+00 : f32
    %479 = vector.broadcast %cst_177 : f32 to vector<2x64xf32>
    %480 = arith.subf %479, %473 : vector<2x64xf32>
    %481 = arith.mulf %480, %478 : vector<2x64xf32>
    %482 = arith.mulf %473, %457 : vector<2x64xf32>
    %483 = arith.addf %481, %482 : vector<2x64xf32>
    %484 = vector.extract_strided_slice %381 {offsets = [0, 6, 192], sizes = [2, 1, 192], strides = [1, 1, 1]} : vector<2x8x384xf32> to vector<2x1x192xf32>
    %485 = vector.shape_cast %484 : vector<2x1x192xf32> to vector<2x192xf32>
    %486 = vector.extract_strided_slice %453 {offsets = [0, 192], sizes = [2, 192], strides = [1, 1]} : vector<2x384xf32> to vector<2x192xf32>
    %487 = vector.extract_strided_slice %448 {offsets = [0, 64], sizes = [2, 64], strides = [1, 1]} : vector<2x128xf32> to vector<2x64xf32>
    %488 = vector.extract_strided_slice %485 {offsets = [0, 0], sizes = [2, 64], strides = [1, 1]} : vector<2x192xf32> to vector<2x64xf32>
    %489 = vector.extract_strided_slice %486 {offsets = [0, 0], sizes = [2, 64], strides = [1, 1]} : vector<2x192xf32> to vector<2x64xf32>
    %490 = arith.addf %488, %489 : vector<2x64xf32>
    %491 = arith.negf %490 : vector<2x64xf32>
    %492 = math.exp %491 : vector<2x64xf32>
    %cst_178 = arith.constant 1.000000e+00 : f32
    %493 = vector.broadcast %cst_178 : f32 to vector<2x64xf32>
    %494 = arith.addf %493, %492 : vector<2x64xf32>
    %495 = arith.divf %493, %494 : vector<2x64xf32>
    %496 = vector.extract_strided_slice %485 {offsets = [0, 64], sizes = [2, 64], strides = [1, 1]} : vector<2x192xf32> to vector<2x64xf32>
    %497 = vector.extract_strided_slice %486 {offsets = [0, 64], sizes = [2, 64], strides = [1, 1]} : vector<2x192xf32> to vector<2x64xf32>
    %498 = arith.addf %496, %497 : vector<2x64xf32>
    %499 = arith.negf %498 : vector<2x64xf32>
    %500 = math.exp %499 : vector<2x64xf32>
    %cst_179 = arith.constant 1.000000e+00 : f32
    %501 = vector.broadcast %cst_179 : f32 to vector<2x64xf32>
    %502 = arith.addf %501, %500 : vector<2x64xf32>
    %503 = arith.divf %501, %502 : vector<2x64xf32>
    %504 = vector.extract_strided_slice %485 {offsets = [0, 128], sizes = [2, 64], strides = [1, 1]} : vector<2x192xf32> to vector<2x64xf32>
    %505 = vector.extract_strided_slice %486 {offsets = [0, 128], sizes = [2, 64], strides = [1, 1]} : vector<2x192xf32> to vector<2x64xf32>
    %506 = arith.mulf %495, %505 : vector<2x64xf32>
    %507 = arith.addf %504, %506 : vector<2x64xf32>
    %508 = math.tanh %507 : vector<2x64xf32>
    %cst_180 = arith.constant 1.000000e+00 : f32
    %509 = vector.broadcast %cst_180 : f32 to vector<2x64xf32>
    %510 = arith.subf %509, %503 : vector<2x64xf32>
    %511 = arith.mulf %510, %508 : vector<2x64xf32>
    %512 = arith.mulf %503, %487 : vector<2x64xf32>
    %513 = arith.addf %511, %512 : vector<2x64xf32>
    %514 = tpu.concatenate %483, %513 in 1 : vector<2x64xf32>, vector<2x64xf32> -> vector<2x128xf32>
    %c0_181 = arith.constant 0 : index
    %c0_182 = arith.constant 0 : index
    %515 = vector.load %arg23[%c0_181, %c0_182] : memref<128x384xf32, #tpu.memory_space<vmem>>, vector<128x384xf32>
    %cst_183 = arith.constant dense<0.000000e+00> : vector<2x384xf32>
    %516 = tpu.matmul %514, %515, %cst_183 {dimension_numbers = #tpu.dot_dimension_numbers<[1], [0], [0], [1], [0, 0, 1, 1], [], []>} : vector<2x128xf32>, vector<128x384xf32>, vector<2x384xf32> -> vector<2x384xf32>
    %c0_184 = arith.constant 0 : index
    %c0_185 = arith.constant 0 : index
    %517 = vector.load %arg24[%c0_184, %c0_185] : memref<1x384xf32, #tpu.memory_space<vmem>>, vector<1x384xf32>
    %518 = vector.broadcast %517 : vector<1x384xf32> to vector<2x384xf32>
    %519 = arith.addf %516, %518 : vector<2x384xf32>
    %520 = vector.extract_strided_slice %381 {offsets = [0, 2, 0], sizes = [2, 1, 192], strides = [1, 1, 1]} : vector<2x8x384xf32> to vector<2x1x192xf32>
    %521 = vector.shape_cast %520 : vector<2x1x192xf32> to vector<2x192xf32>
    %522 = vector.extract_strided_slice %519 {offsets = [0, 0], sizes = [2, 192], strides = [1, 1]} : vector<2x384xf32> to vector<2x192xf32>
    %523 = vector.extract_strided_slice %514 {offsets = [0, 0], sizes = [2, 64], strides = [1, 1]} : vector<2x128xf32> to vector<2x64xf32>
    %524 = vector.extract_strided_slice %521 {offsets = [0, 0], sizes = [2, 64], strides = [1, 1]} : vector<2x192xf32> to vector<2x64xf32>
    %525 = vector.extract_strided_slice %522 {offsets = [0, 0], sizes = [2, 64], strides = [1, 1]} : vector<2x192xf32> to vector<2x64xf32>
    %526 = arith.addf %524, %525 : vector<2x64xf32>
    %527 = arith.negf %526 : vector<2x64xf32>
    %528 = math.exp %527 : vector<2x64xf32>
    %cst_186 = arith.constant 1.000000e+00 : f32
    %529 = vector.broadcast %cst_186 : f32 to vector<2x64xf32>
    %530 = arith.addf %529, %528 : vector<2x64xf32>
    %531 = arith.divf %529, %530 : vector<2x64xf32>
    %532 = vector.extract_strided_slice %521 {offsets = [0, 64], sizes = [2, 64], strides = [1, 1]} : vector<2x192xf32> to vector<2x64xf32>
    %533 = vector.extract_strided_slice %522 {offsets = [0, 64], sizes = [2, 64], strides = [1, 1]} : vector<2x192xf32> to vector<2x64xf32>
    %534 = arith.addf %532, %533 : vector<2x64xf32>
    %535 = arith.negf %534 : vector<2x64xf32>
    %536 = math.exp %535 : vector<2x64xf32>
    %cst_187 = arith.constant 1.000000e+00 : f32
    %537 = vector.broadcast %cst_187 : f32 to vector<2x64xf32>
    %538 = arith.addf %537, %536 : vector<2x64xf32>
    %539 = arith.divf %537, %538 : vector<2x64xf32>
    %540 = vector.extract_strided_slice %521 {offsets = [0, 128], sizes = [2, 64], strides = [1, 1]} : vector<2x192xf32> to vector<2x64xf32>
    %541 = vector.extract_strided_slice %522 {offsets = [0, 128], sizes = [2, 64], strides = [1, 1]} : vector<2x192xf32> to vector<2x64xf32>
    %542 = arith.mulf %531, %541 : vector<2x64xf32>
    %543 = arith.addf %540, %542 : vector<2x64xf32>
    %544 = math.tanh %543 : vector<2x64xf32>
    %cst_188 = arith.constant 1.000000e+00 : f32
    %545 = vector.broadcast %cst_188 : f32 to vector<2x64xf32>
    %546 = arith.subf %545, %539 : vector<2x64xf32>
    %547 = arith.mulf %546, %544 : vector<2x64xf32>
    %548 = arith.mulf %539, %523 : vector<2x64xf32>
    %549 = arith.addf %547, %548 : vector<2x64xf32>
    %550 = vector.extract_strided_slice %381 {offsets = [0, 5, 192], sizes = [2, 1, 192], strides = [1, 1, 1]} : vector<2x8x384xf32> to vector<2x1x192xf32>
    %551 = vector.shape_cast %550 : vector<2x1x192xf32> to vector<2x192xf32>
    %552 = vector.extract_strided_slice %519 {offsets = [0, 192], sizes = [2, 192], strides = [1, 1]} : vector<2x384xf32> to vector<2x192xf32>
    %553 = vector.extract_strided_slice %514 {offsets = [0, 64], sizes = [2, 64], strides = [1, 1]} : vector<2x128xf32> to vector<2x64xf32>
    %554 = vector.extract_strided_slice %551 {offsets = [0, 0], sizes = [2, 64], strides = [1, 1]} : vector<2x192xf32> to vector<2x64xf32>
    %555 = vector.extract_strided_slice %552 {offsets = [0, 0], sizes = [2, 64], strides = [1, 1]} : vector<2x192xf32> to vector<2x64xf32>
    %556 = arith.addf %554, %555 : vector<2x64xf32>
    %557 = arith.negf %556 : vector<2x64xf32>
    %558 = math.exp %557 : vector<2x64xf32>
    %cst_189 = arith.constant 1.000000e+00 : f32
    %559 = vector.broadcast %cst_189 : f32 to vector<2x64xf32>
    %560 = arith.addf %559, %558 : vector<2x64xf32>
    %561 = arith.divf %559, %560 : vector<2x64xf32>
    %562 = vector.extract_strided_slice %551 {offsets = [0, 64], sizes = [2, 64], strides = [1, 1]} : vector<2x192xf32> to vector<2x64xf32>
    %563 = vector.extract_strided_slice %552 {offsets = [0, 64], sizes = [2, 64], strides = [1, 1]} : vector<2x192xf32> to vector<2x64xf32>
    %564 = arith.addf %562, %563 : vector<2x64xf32>
    %565 = arith.negf %564 : vector<2x64xf32>
    %566 = math.exp %565 : vector<2x64xf32>
    %cst_190 = arith.constant 1.000000e+00 : f32
    %567 = vector.broadcast %cst_190 : f32 to vector<2x64xf32>
    %568 = arith.addf %567, %566 : vector<2x64xf32>
    %569 = arith.divf %567, %568 : vector<2x64xf32>
    %570 = vector.extract_strided_slice %551 {offsets = [0, 128], sizes = [2, 64], strides = [1, 1]} : vector<2x192xf32> to vector<2x64xf32>
    %571 = vector.extract_strided_slice %552 {offsets = [0, 128], sizes = [2, 64], strides = [1, 1]} : vector<2x192xf32> to vector<2x64xf32>
    %572 = arith.mulf %561, %571 : vector<2x64xf32>
    %573 = arith.addf %570, %572 : vector<2x64xf32>
    %574 = math.tanh %573 : vector<2x64xf32>
    %cst_191 = arith.constant 1.000000e+00 : f32
    %575 = vector.broadcast %cst_191 : f32 to vector<2x64xf32>
    %576 = arith.subf %575, %569 : vector<2x64xf32>
    %577 = arith.mulf %576, %574 : vector<2x64xf32>
    %578 = arith.mulf %569, %553 : vector<2x64xf32>
    %579 = arith.addf %577, %578 : vector<2x64xf32>
    %580 = tpu.concatenate %549, %579 in 1 : vector<2x64xf32>, vector<2x64xf32> -> vector<2x128xf32>
    %c0_192 = arith.constant 0 : index
    %c0_193 = arith.constant 0 : index
    %581 = vector.load %arg23[%c0_192, %c0_193] : memref<128x384xf32, #tpu.memory_space<vmem>>, vector<128x384xf32>
    %cst_194 = arith.constant dense<0.000000e+00> : vector<2x384xf32>
    %582 = tpu.matmul %580, %581, %cst_194 {dimension_numbers = #tpu.dot_dimension_numbers<[1], [0], [0], [1], [0, 0, 1, 1], [], []>} : vector<2x128xf32>, vector<128x384xf32>, vector<2x384xf32> -> vector<2x384xf32>
    %c0_195 = arith.constant 0 : index
    %c0_196 = arith.constant 0 : index
    %583 = vector.load %arg24[%c0_195, %c0_196] : memref<1x384xf32, #tpu.memory_space<vmem>>, vector<1x384xf32>
    %584 = vector.broadcast %583 : vector<1x384xf32> to vector<2x384xf32>
    %585 = arith.addf %582, %584 : vector<2x384xf32>
    %586 = vector.extract_strided_slice %381 {offsets = [0, 3, 0], sizes = [2, 1, 192], strides = [1, 1, 1]} : vector<2x8x384xf32> to vector<2x1x192xf32>
    %587 = vector.shape_cast %586 : vector<2x1x192xf32> to vector<2x192xf32>
    %588 = vector.extract_strided_slice %585 {offsets = [0, 0], sizes = [2, 192], strides = [1, 1]} : vector<2x384xf32> to vector<2x192xf32>
    %589 = vector.extract_strided_slice %580 {offsets = [0, 0], sizes = [2, 64], strides = [1, 1]} : vector<2x128xf32> to vector<2x64xf32>
    %590 = vector.extract_strided_slice %587 {offsets = [0, 0], sizes = [2, 64], strides = [1, 1]} : vector<2x192xf32> to vector<2x64xf32>
    %591 = vector.extract_strided_slice %588 {offsets = [0, 0], sizes = [2, 64], strides = [1, 1]} : vector<2x192xf32> to vector<2x64xf32>
    %592 = arith.addf %590, %591 : vector<2x64xf32>
    %593 = arith.negf %592 : vector<2x64xf32>
    %594 = math.exp %593 : vector<2x64xf32>
    %cst_197 = arith.constant 1.000000e+00 : f32
    %595 = vector.broadcast %cst_197 : f32 to vector<2x64xf32>
    %596 = arith.addf %595, %594 : vector<2x64xf32>
    %597 = arith.divf %595, %596 : vector<2x64xf32>
    %598 = vector.extract_strided_slice %587 {offsets = [0, 64], sizes = [2, 64], strides = [1, 1]} : vector<2x192xf32> to vector<2x64xf32>
    %599 = vector.extract_strided_slice %588 {offsets = [0, 64], sizes = [2, 64], strides = [1, 1]} : vector<2x192xf32> to vector<2x64xf32>
    %600 = arith.addf %598, %599 : vector<2x64xf32>
    %601 = arith.negf %600 : vector<2x64xf32>
    %602 = math.exp %601 : vector<2x64xf32>
    %cst_198 = arith.constant 1.000000e+00 : f32
    %603 = vector.broadcast %cst_198 : f32 to vector<2x64xf32>
    %604 = arith.addf %603, %602 : vector<2x64xf32>
    %605 = arith.divf %603, %604 : vector<2x64xf32>
    %606 = vector.extract_strided_slice %587 {offsets = [0, 128], sizes = [2, 64], strides = [1, 1]} : vector<2x192xf32> to vector<2x64xf32>
    %607 = vector.extract_strided_slice %588 {offsets = [0, 128], sizes = [2, 64], strides = [1, 1]} : vector<2x192xf32> to vector<2x64xf32>
    %608 = arith.mulf %597, %607 : vector<2x64xf32>
    %609 = arith.addf %606, %608 : vector<2x64xf32>
    %610 = math.tanh %609 : vector<2x64xf32>
    %cst_199 = arith.constant 1.000000e+00 : f32
    %611 = vector.broadcast %cst_199 : f32 to vector<2x64xf32>
    %612 = arith.subf %611, %605 : vector<2x64xf32>
    %613 = arith.mulf %612, %610 : vector<2x64xf32>
    %614 = arith.mulf %605, %589 : vector<2x64xf32>
    %615 = arith.addf %613, %614 : vector<2x64xf32>
    %616 = vector.extract_strided_slice %381 {offsets = [0, 4, 192], sizes = [2, 1, 192], strides = [1, 1, 1]} : vector<2x8x384xf32> to vector<2x1x192xf32>
    %617 = vector.shape_cast %616 : vector<2x1x192xf32> to vector<2x192xf32>
    %618 = vector.extract_strided_slice %585 {offsets = [0, 192], sizes = [2, 192], strides = [1, 1]} : vector<2x384xf32> to vector<2x192xf32>
    %619 = vector.extract_strided_slice %580 {offsets = [0, 64], sizes = [2, 64], strides = [1, 1]} : vector<2x128xf32> to vector<2x64xf32>
    %620 = vector.extract_strided_slice %617 {offsets = [0, 0], sizes = [2, 64], strides = [1, 1]} : vector<2x192xf32> to vector<2x64xf32>
    %621 = vector.extract_strided_slice %618 {offsets = [0, 0], sizes = [2, 64], strides = [1, 1]} : vector<2x192xf32> to vector<2x64xf32>
    %622 = arith.addf %620, %621 : vector<2x64xf32>
    %623 = arith.negf %622 : vector<2x64xf32>
    %624 = math.exp %623 : vector<2x64xf32>
    %cst_200 = arith.constant 1.000000e+00 : f32
    %625 = vector.broadcast %cst_200 : f32 to vector<2x64xf32>
    %626 = arith.addf %625, %624 : vector<2x64xf32>
    %627 = arith.divf %625, %626 : vector<2x64xf32>
    %628 = vector.extract_strided_slice %617 {offsets = [0, 64], sizes = [2, 64], strides = [1, 1]} : vector<2x192xf32> to vector<2x64xf32>
    %629 = vector.extract_strided_slice %618 {offsets = [0, 64], sizes = [2, 64], strides = [1, 1]} : vector<2x192xf32> to vector<2x64xf32>
    %630 = arith.addf %628, %629 : vector<2x64xf32>
    %631 = arith.negf %630 : vector<2x64xf32>
    %632 = math.exp %631 : vector<2x64xf32>
    %cst_201 = arith.constant 1.000000e+00 : f32
    %633 = vector.broadcast %cst_201 : f32 to vector<2x64xf32>
    %634 = arith.addf %633, %632 : vector<2x64xf32>
    %635 = arith.divf %633, %634 : vector<2x64xf32>
    %636 = vector.extract_strided_slice %617 {offsets = [0, 128], sizes = [2, 64], strides = [1, 1]} : vector<2x192xf32> to vector<2x64xf32>
    %637 = vector.extract_strided_slice %618 {offsets = [0, 128], sizes = [2, 64], strides = [1, 1]} : vector<2x192xf32> to vector<2x64xf32>
    %638 = arith.mulf %627, %637 : vector<2x64xf32>
    %639 = arith.addf %636, %638 : vector<2x64xf32>
    %640 = math.tanh %639 : vector<2x64xf32>
    %cst_202 = arith.constant 1.000000e+00 : f32
    %641 = vector.broadcast %cst_202 : f32 to vector<2x64xf32>
    %642 = arith.subf %641, %635 : vector<2x64xf32>
    %643 = arith.mulf %642, %640 : vector<2x64xf32>
    %644 = arith.mulf %635, %619 : vector<2x64xf32>
    %645 = arith.addf %643, %644 : vector<2x64xf32>
    %646 = tpu.concatenate %615, %645 in 1 : vector<2x64xf32>, vector<2x64xf32> -> vector<2x128xf32>
    %c0_203 = arith.constant 0 : index
    %c0_204 = arith.constant 0 : index
    %647 = vector.load %arg23[%c0_203, %c0_204] : memref<128x384xf32, #tpu.memory_space<vmem>>, vector<128x384xf32>
    %cst_205 = arith.constant dense<0.000000e+00> : vector<2x384xf32>
    %648 = tpu.matmul %646, %647, %cst_205 {dimension_numbers = #tpu.dot_dimension_numbers<[1], [0], [0], [1], [0, 0, 1, 1], [], []>} : vector<2x128xf32>, vector<128x384xf32>, vector<2x384xf32> -> vector<2x384xf32>
    %c0_206 = arith.constant 0 : index
    %c0_207 = arith.constant 0 : index
    %649 = vector.load %arg24[%c0_206, %c0_207] : memref<1x384xf32, #tpu.memory_space<vmem>>, vector<1x384xf32>
    %650 = vector.broadcast %649 : vector<1x384xf32> to vector<2x384xf32>
    %651 = arith.addf %648, %650 : vector<2x384xf32>
    %652 = vector.extract_strided_slice %381 {offsets = [0, 4, 0], sizes = [2, 1, 192], strides = [1, 1, 1]} : vector<2x8x384xf32> to vector<2x1x192xf32>
    %653 = vector.shape_cast %652 : vector<2x1x192xf32> to vector<2x192xf32>
    %654 = vector.extract_strided_slice %651 {offsets = [0, 0], sizes = [2, 192], strides = [1, 1]} : vector<2x384xf32> to vector<2x192xf32>
    %655 = vector.extract_strided_slice %646 {offsets = [0, 0], sizes = [2, 64], strides = [1, 1]} : vector<2x128xf32> to vector<2x64xf32>
    %656 = vector.extract_strided_slice %653 {offsets = [0, 0], sizes = [2, 64], strides = [1, 1]} : vector<2x192xf32> to vector<2x64xf32>
    %657 = vector.extract_strided_slice %654 {offsets = [0, 0], sizes = [2, 64], strides = [1, 1]} : vector<2x192xf32> to vector<2x64xf32>
    %658 = arith.addf %656, %657 : vector<2x64xf32>
    %659 = arith.negf %658 : vector<2x64xf32>
    %660 = math.exp %659 : vector<2x64xf32>
    %cst_208 = arith.constant 1.000000e+00 : f32
    %661 = vector.broadcast %cst_208 : f32 to vector<2x64xf32>
    %662 = arith.addf %661, %660 : vector<2x64xf32>
    %663 = arith.divf %661, %662 : vector<2x64xf32>
    %664 = vector.extract_strided_slice %653 {offsets = [0, 64], sizes = [2, 64], strides = [1, 1]} : vector<2x192xf32> to vector<2x64xf32>
    %665 = vector.extract_strided_slice %654 {offsets = [0, 64], sizes = [2, 64], strides = [1, 1]} : vector<2x192xf32> to vector<2x64xf32>
    %666 = arith.addf %664, %665 : vector<2x64xf32>
    %667 = arith.negf %666 : vector<2x64xf32>
    %668 = math.exp %667 : vector<2x64xf32>
    %cst_209 = arith.constant 1.000000e+00 : f32
    %669 = vector.broadcast %cst_209 : f32 to vector<2x64xf32>
    %670 = arith.addf %669, %668 : vector<2x64xf32>
    %671 = arith.divf %669, %670 : vector<2x64xf32>
    %672 = vector.extract_strided_slice %653 {offsets = [0, 128], sizes = [2, 64], strides = [1, 1]} : vector<2x192xf32> to vector<2x64xf32>
    %673 = vector.extract_strided_slice %654 {offsets = [0, 128], sizes = [2, 64], strides = [1, 1]} : vector<2x192xf32> to vector<2x64xf32>
    %674 = arith.mulf %663, %673 : vector<2x64xf32>
    %675 = arith.addf %672, %674 : vector<2x64xf32>
    %676 = math.tanh %675 : vector<2x64xf32>
    %cst_210 = arith.constant 1.000000e+00 : f32
    %677 = vector.broadcast %cst_210 : f32 to vector<2x64xf32>
    %678 = arith.subf %677, %671 : vector<2x64xf32>
    %679 = arith.mulf %678, %676 : vector<2x64xf32>
    %680 = arith.mulf %671, %655 : vector<2x64xf32>
    %681 = arith.addf %679, %680 : vector<2x64xf32>
    %682 = vector.extract_strided_slice %381 {offsets = [0, 3, 192], sizes = [2, 1, 192], strides = [1, 1, 1]} : vector<2x8x384xf32> to vector<2x1x192xf32>
    %683 = vector.shape_cast %682 : vector<2x1x192xf32> to vector<2x192xf32>
    %684 = vector.extract_strided_slice %651 {offsets = [0, 192], sizes = [2, 192], strides = [1, 1]} : vector<2x384xf32> to vector<2x192xf32>
    %685 = vector.extract_strided_slice %646 {offsets = [0, 64], sizes = [2, 64], strides = [1, 1]} : vector<2x128xf32> to vector<2x64xf32>
    %686 = vector.extract_strided_slice %683 {offsets = [0, 0], sizes = [2, 64], strides = [1, 1]} : vector<2x192xf32> to vector<2x64xf32>
    %687 = vector.extract_strided_slice %684 {offsets = [0, 0], sizes = [2, 64], strides = [1, 1]} : vector<2x192xf32> to vector<2x64xf32>
    %688 = arith.addf %686, %687 : vector<2x64xf32>
    %689 = arith.negf %688 : vector<2x64xf32>
    %690 = math.exp %689 : vector<2x64xf32>
    %cst_211 = arith.constant 1.000000e+00 : f32
    %691 = vector.broadcast %cst_211 : f32 to vector<2x64xf32>
    %692 = arith.addf %691, %690 : vector<2x64xf32>
    %693 = arith.divf %691, %692 : vector<2x64xf32>
    %694 = vector.extract_strided_slice %683 {offsets = [0, 64], sizes = [2, 64], strides = [1, 1]} : vector<2x192xf32> to vector<2x64xf32>
    %695 = vector.extract_strided_slice %684 {offsets = [0, 64], sizes = [2, 64], strides = [1, 1]} : vector<2x192xf32> to vector<2x64xf32>
    %696 = arith.addf %694, %695 : vector<2x64xf32>
    %697 = arith.negf %696 : vector<2x64xf32>
    %698 = math.exp %697 : vector<2x64xf32>
    %cst_212 = arith.constant 1.000000e+00 : f32
    %699 = vector.broadcast %cst_212 : f32 to vector<2x64xf32>
    %700 = arith.addf %699, %698 : vector<2x64xf32>
    %701 = arith.divf %699, %700 : vector<2x64xf32>
    %702 = vector.extract_strided_slice %683 {offsets = [0, 128], sizes = [2, 64], strides = [1, 1]} : vector<2x192xf32> to vector<2x64xf32>
    %703 = vector.extract_strided_slice %684 {offsets = [0, 128], sizes = [2, 64], strides = [1, 1]} : vector<2x192xf32> to vector<2x64xf32>
    %704 = arith.mulf %693, %703 : vector<2x64xf32>
    %705 = arith.addf %702, %704 : vector<2x64xf32>
    %706 = math.tanh %705 : vector<2x64xf32>
    %cst_213 = arith.constant 1.000000e+00 : f32
    %707 = vector.broadcast %cst_213 : f32 to vector<2x64xf32>
    %708 = arith.subf %707, %701 : vector<2x64xf32>
    %709 = arith.mulf %708, %706 : vector<2x64xf32>
    %710 = arith.mulf %701, %685 : vector<2x64xf32>
    %711 = arith.addf %709, %710 : vector<2x64xf32>
    %712 = tpu.concatenate %681, %711 in 1 : vector<2x64xf32>, vector<2x64xf32> -> vector<2x128xf32>
    %c0_214 = arith.constant 0 : index
    %c0_215 = arith.constant 0 : index
    %713 = vector.load %arg23[%c0_214, %c0_215] : memref<128x384xf32, #tpu.memory_space<vmem>>, vector<128x384xf32>
    %cst_216 = arith.constant dense<0.000000e+00> : vector<2x384xf32>
    %714 = tpu.matmul %712, %713, %cst_216 {dimension_numbers = #tpu.dot_dimension_numbers<[1], [0], [0], [1], [0, 0, 1, 1], [], []>} : vector<2x128xf32>, vector<128x384xf32>, vector<2x384xf32> -> vector<2x384xf32>
    %c0_217 = arith.constant 0 : index
    %c0_218 = arith.constant 0 : index
    %715 = vector.load %arg24[%c0_217, %c0_218] : memref<1x384xf32, #tpu.memory_space<vmem>>, vector<1x384xf32>
    %716 = vector.broadcast %715 : vector<1x384xf32> to vector<2x384xf32>
    %717 = arith.addf %714, %716 : vector<2x384xf32>
    %718 = vector.extract_strided_slice %381 {offsets = [0, 5, 0], sizes = [2, 1, 192], strides = [1, 1, 1]} : vector<2x8x384xf32> to vector<2x1x192xf32>
    %719 = vector.shape_cast %718 : vector<2x1x192xf32> to vector<2x192xf32>
    %720 = vector.extract_strided_slice %717 {offsets = [0, 0], sizes = [2, 192], strides = [1, 1]} : vector<2x384xf32> to vector<2x192xf32>
    %721 = vector.extract_strided_slice %712 {offsets = [0, 0], sizes = [2, 64], strides = [1, 1]} : vector<2x128xf32> to vector<2x64xf32>
    %722 = vector.extract_strided_slice %719 {offsets = [0, 0], sizes = [2, 64], strides = [1, 1]} : vector<2x192xf32> to vector<2x64xf32>
    %723 = vector.extract_strided_slice %720 {offsets = [0, 0], sizes = [2, 64], strides = [1, 1]} : vector<2x192xf32> to vector<2x64xf32>
    %724 = arith.addf %722, %723 : vector<2x64xf32>
    %725 = arith.negf %724 : vector<2x64xf32>
    %726 = math.exp %725 : vector<2x64xf32>
    %cst_219 = arith.constant 1.000000e+00 : f32
    %727 = vector.broadcast %cst_219 : f32 to vector<2x64xf32>
    %728 = arith.addf %727, %726 : vector<2x64xf32>
    %729 = arith.divf %727, %728 : vector<2x64xf32>
    %730 = vector.extract_strided_slice %719 {offsets = [0, 64], sizes = [2, 64], strides = [1, 1]} : vector<2x192xf32> to vector<2x64xf32>
    %731 = vector.extract_strided_slice %720 {offsets = [0, 64], sizes = [2, 64], strides = [1, 1]} : vector<2x192xf32> to vector<2x64xf32>
    %732 = arith.addf %730, %731 : vector<2x64xf32>
    %733 = arith.negf %732 : vector<2x64xf32>
    %734 = math.exp %733 : vector<2x64xf32>
    %cst_220 = arith.constant 1.000000e+00 : f32
    %735 = vector.broadcast %cst_220 : f32 to vector<2x64xf32>
    %736 = arith.addf %735, %734 : vector<2x64xf32>
    %737 = arith.divf %735, %736 : vector<2x64xf32>
    %738 = vector.extract_strided_slice %719 {offsets = [0, 128], sizes = [2, 64], strides = [1, 1]} : vector<2x192xf32> to vector<2x64xf32>
    %739 = vector.extract_strided_slice %720 {offsets = [0, 128], sizes = [2, 64], strides = [1, 1]} : vector<2x192xf32> to vector<2x64xf32>
    %740 = arith.mulf %729, %739 : vector<2x64xf32>
    %741 = arith.addf %738, %740 : vector<2x64xf32>
    %742 = math.tanh %741 : vector<2x64xf32>
    %cst_221 = arith.constant 1.000000e+00 : f32
    %743 = vector.broadcast %cst_221 : f32 to vector<2x64xf32>
    %744 = arith.subf %743, %737 : vector<2x64xf32>
    %745 = arith.mulf %744, %742 : vector<2x64xf32>
    %746 = arith.mulf %737, %721 : vector<2x64xf32>
    %747 = arith.addf %745, %746 : vector<2x64xf32>
    %748 = vector.extract_strided_slice %381 {offsets = [0, 2, 192], sizes = [2, 1, 192], strides = [1, 1, 1]} : vector<2x8x384xf32> to vector<2x1x192xf32>
    %749 = vector.shape_cast %748 : vector<2x1x192xf32> to vector<2x192xf32>
    %750 = vector.extract_strided_slice %717 {offsets = [0, 192], sizes = [2, 192], strides = [1, 1]} : vector<2x384xf32> to vector<2x192xf32>
    %751 = vector.extract_strided_slice %712 {offsets = [0, 64], sizes = [2, 64], strides = [1, 1]} : vector<2x128xf32> to vector<2x64xf32>
    %752 = vector.extract_strided_slice %749 {offsets = [0, 0], sizes = [2, 64], strides = [1, 1]} : vector<2x192xf32> to vector<2x64xf32>
    %753 = vector.extract_strided_slice %750 {offsets = [0, 0], sizes = [2, 64], strides = [1, 1]} : vector<2x192xf32> to vector<2x64xf32>
    %754 = arith.addf %752, %753 : vector<2x64xf32>
    %755 = arith.negf %754 : vector<2x64xf32>
    %756 = math.exp %755 : vector<2x64xf32>
    %cst_222 = arith.constant 1.000000e+00 : f32
    %757 = vector.broadcast %cst_222 : f32 to vector<2x64xf32>
    %758 = arith.addf %757, %756 : vector<2x64xf32>
    %759 = arith.divf %757, %758 : vector<2x64xf32>
    %760 = vector.extract_strided_slice %749 {offsets = [0, 64], sizes = [2, 64], strides = [1, 1]} : vector<2x192xf32> to vector<2x64xf32>
    %761 = vector.extract_strided_slice %750 {offsets = [0, 64], sizes = [2, 64], strides = [1, 1]} : vector<2x192xf32> to vector<2x64xf32>
    %762 = arith.addf %760, %761 : vector<2x64xf32>
    %763 = arith.negf %762 : vector<2x64xf32>
    %764 = math.exp %763 : vector<2x64xf32>
    %cst_223 = arith.constant 1.000000e+00 : f32
    %765 = vector.broadcast %cst_223 : f32 to vector<2x64xf32>
    %766 = arith.addf %765, %764 : vector<2x64xf32>
    %767 = arith.divf %765, %766 : vector<2x64xf32>
    %768 = vector.extract_strided_slice %749 {offsets = [0, 128], sizes = [2, 64], strides = [1, 1]} : vector<2x192xf32> to vector<2x64xf32>
    %769 = vector.extract_strided_slice %750 {offsets = [0, 128], sizes = [2, 64], strides = [1, 1]} : vector<2x192xf32> to vector<2x64xf32>
    %770 = arith.mulf %759, %769 : vector<2x64xf32>
    %771 = arith.addf %768, %770 : vector<2x64xf32>
    %772 = math.tanh %771 : vector<2x64xf32>
    %cst_224 = arith.constant 1.000000e+00 : f32
    %773 = vector.broadcast %cst_224 : f32 to vector<2x64xf32>
    %774 = arith.subf %773, %767 : vector<2x64xf32>
    %775 = arith.mulf %774, %772 : vector<2x64xf32>
    %776 = arith.mulf %767, %751 : vector<2x64xf32>
    %777 = arith.addf %775, %776 : vector<2x64xf32>
    %778 = tpu.concatenate %747, %777 in 1 : vector<2x64xf32>, vector<2x64xf32> -> vector<2x128xf32>
    %c0_225 = arith.constant 0 : index
    %c0_226 = arith.constant 0 : index
    %779 = vector.load %arg23[%c0_225, %c0_226] : memref<128x384xf32, #tpu.memory_space<vmem>>, vector<128x384xf32>
    %cst_227 = arith.constant dense<0.000000e+00> : vector<2x384xf32>
    %780 = tpu.matmul %778, %779, %cst_227 {dimension_numbers = #tpu.dot_dimension_numbers<[1], [0], [0], [1], [0, 0, 1, 1], [], []>} : vector<2x128xf32>, vector<128x384xf32>, vector<2x384xf32> -> vector<2x384xf32>
    %c0_228 = arith.constant 0 : index
    %c0_229 = arith.constant 0 : index
    %781 = vector.load %arg24[%c0_228, %c0_229] : memref<1x384xf32, #tpu.memory_space<vmem>>, vector<1x384xf32>
    %782 = vector.broadcast %781 : vector<1x384xf32> to vector<2x384xf32>
    %783 = arith.addf %780, %782 : vector<2x384xf32>
    %784 = vector.extract_strided_slice %381 {offsets = [0, 6, 0], sizes = [2, 1, 192], strides = [1, 1, 1]} : vector<2x8x384xf32> to vector<2x1x192xf32>
    %785 = vector.shape_cast %784 : vector<2x1x192xf32> to vector<2x192xf32>
    %786 = vector.extract_strided_slice %783 {offsets = [0, 0], sizes = [2, 192], strides = [1, 1]} : vector<2x384xf32> to vector<2x192xf32>
    %787 = vector.extract_strided_slice %778 {offsets = [0, 0], sizes = [2, 64], strides = [1, 1]} : vector<2x128xf32> to vector<2x64xf32>
    %788 = vector.extract_strided_slice %785 {offsets = [0, 0], sizes = [2, 64], strides = [1, 1]} : vector<2x192xf32> to vector<2x64xf32>
    %789 = vector.extract_strided_slice %786 {offsets = [0, 0], sizes = [2, 64], strides = [1, 1]} : vector<2x192xf32> to vector<2x64xf32>
    %790 = arith.addf %788, %789 : vector<2x64xf32>
    %791 = arith.negf %790 : vector<2x64xf32>
    %792 = math.exp %791 : vector<2x64xf32>
    %cst_230 = arith.constant 1.000000e+00 : f32
    %793 = vector.broadcast %cst_230 : f32 to vector<2x64xf32>
    %794 = arith.addf %793, %792 : vector<2x64xf32>
    %795 = arith.divf %793, %794 : vector<2x64xf32>
    %796 = vector.extract_strided_slice %785 {offsets = [0, 64], sizes = [2, 64], strides = [1, 1]} : vector<2x192xf32> to vector<2x64xf32>
    %797 = vector.extract_strided_slice %786 {offsets = [0, 64], sizes = [2, 64], strides = [1, 1]} : vector<2x192xf32> to vector<2x64xf32>
    %798 = arith.addf %796, %797 : vector<2x64xf32>
    %799 = arith.negf %798 : vector<2x64xf32>
    %800 = math.exp %799 : vector<2x64xf32>
    %cst_231 = arith.constant 1.000000e+00 : f32
    %801 = vector.broadcast %cst_231 : f32 to vector<2x64xf32>
    %802 = arith.addf %801, %800 : vector<2x64xf32>
    %803 = arith.divf %801, %802 : vector<2x64xf32>
    %804 = vector.extract_strided_slice %785 {offsets = [0, 128], sizes = [2, 64], strides = [1, 1]} : vector<2x192xf32> to vector<2x64xf32>
    %805 = vector.extract_strided_slice %786 {offsets = [0, 128], sizes = [2, 64], strides = [1, 1]} : vector<2x192xf32> to vector<2x64xf32>
    %806 = arith.mulf %795, %805 : vector<2x64xf32>
    %807 = arith.addf %804, %806 : vector<2x64xf32>
    %808 = math.tanh %807 : vector<2x64xf32>
    %cst_232 = arith.constant 1.000000e+00 : f32
    %809 = vector.broadcast %cst_232 : f32 to vector<2x64xf32>
    %810 = arith.subf %809, %803 : vector<2x64xf32>
    %811 = arith.mulf %810, %808 : vector<2x64xf32>
    %812 = arith.mulf %803, %787 : vector<2x64xf32>
    %813 = arith.addf %811, %812 : vector<2x64xf32>
    %814 = vector.extract_strided_slice %381 {offsets = [0, 1, 192], sizes = [2, 1, 192], strides = [1, 1, 1]} : vector<2x8x384xf32> to vector<2x1x192xf32>
    %815 = vector.shape_cast %814 : vector<2x1x192xf32> to vector<2x192xf32>
    %816 = vector.extract_strided_slice %783 {offsets = [0, 192], sizes = [2, 192], strides = [1, 1]} : vector<2x384xf32> to vector<2x192xf32>
    %817 = vector.extract_strided_slice %778 {offsets = [0, 64], sizes = [2, 64], strides = [1, 1]} : vector<2x128xf32> to vector<2x64xf32>
    %818 = vector.extract_strided_slice %815 {offsets = [0, 0], sizes = [2, 64], strides = [1, 1]} : vector<2x192xf32> to vector<2x64xf32>
    %819 = vector.extract_strided_slice %816 {offsets = [0, 0], sizes = [2, 64], strides = [1, 1]} : vector<2x192xf32> to vector<2x64xf32>
    %820 = arith.addf %818, %819 : vector<2x64xf32>
    %821 = arith.negf %820 : vector<2x64xf32>
    %822 = math.exp %821 : vector<2x64xf32>
    %cst_233 = arith.constant 1.000000e+00 : f32
    %823 = vector.broadcast %cst_233 : f32 to vector<2x64xf32>
    %824 = arith.addf %823, %822 : vector<2x64xf32>
    %825 = arith.divf %823, %824 : vector<2x64xf32>
    %826 = vector.extract_strided_slice %815 {offsets = [0, 64], sizes = [2, 64], strides = [1, 1]} : vector<2x192xf32> to vector<2x64xf32>
    %827 = vector.extract_strided_slice %816 {offsets = [0, 64], sizes = [2, 64], strides = [1, 1]} : vector<2x192xf32> to vector<2x64xf32>
    %828 = arith.addf %826, %827 : vector<2x64xf32>
    %829 = arith.negf %828 : vector<2x64xf32>
    %830 = math.exp %829 : vector<2x64xf32>
    %cst_234 = arith.constant 1.000000e+00 : f32
    %831 = vector.broadcast %cst_234 : f32 to vector<2x64xf32>
    %832 = arith.addf %831, %830 : vector<2x64xf32>
    %833 = arith.divf %831, %832 : vector<2x64xf32>
    %834 = vector.extract_strided_slice %815 {offsets = [0, 128], sizes = [2, 64], strides = [1, 1]} : vector<2x192xf32> to vector<2x64xf32>
    %835 = vector.extract_strided_slice %816 {offsets = [0, 128], sizes = [2, 64], strides = [1, 1]} : vector<2x192xf32> to vector<2x64xf32>
    %836 = arith.mulf %825, %835 : vector<2x64xf32>
    %837 = arith.addf %834, %836 : vector<2x64xf32>
    %838 = math.tanh %837 : vector<2x64xf32>
    %cst_235 = arith.constant 1.000000e+00 : f32
    %839 = vector.broadcast %cst_235 : f32 to vector<2x64xf32>
    %840 = arith.subf %839, %833 : vector<2x64xf32>
    %841 = arith.mulf %840, %838 : vector<2x64xf32>
    %842 = arith.mulf %833, %817 : vector<2x64xf32>
    %843 = arith.addf %841, %842 : vector<2x64xf32>
    %844 = tpu.concatenate %813, %843 in 1 : vector<2x64xf32>, vector<2x64xf32> -> vector<2x128xf32>
    %c0_236 = arith.constant 0 : index
    %c0_237 = arith.constant 0 : index
    %845 = vector.load %arg23[%c0_236, %c0_237] : memref<128x384xf32, #tpu.memory_space<vmem>>, vector<128x384xf32>
    %cst_238 = arith.constant dense<0.000000e+00> : vector<2x384xf32>
    %846 = tpu.matmul %844, %845, %cst_238 {dimension_numbers = #tpu.dot_dimension_numbers<[1], [0], [0], [1], [0, 0, 1, 1], [], []>} : vector<2x128xf32>, vector<128x384xf32>, vector<2x384xf32> -> vector<2x384xf32>
    %c0_239 = arith.constant 0 : index
    %c0_240 = arith.constant 0 : index
    %847 = vector.load %arg24[%c0_239, %c0_240] : memref<1x384xf32, #tpu.memory_space<vmem>>, vector<1x384xf32>
    %848 = vector.broadcast %847 : vector<1x384xf32> to vector<2x384xf32>
    %849 = arith.addf %846, %848 : vector<2x384xf32>
    %850 = vector.extract_strided_slice %381 {offsets = [0, 7, 0], sizes = [2, 1, 192], strides = [1, 1, 1]} : vector<2x8x384xf32> to vector<2x1x192xf32>
    %851 = vector.shape_cast %850 : vector<2x1x192xf32> to vector<2x192xf32>
    %852 = vector.extract_strided_slice %849 {offsets = [0, 0], sizes = [2, 192], strides = [1, 1]} : vector<2x384xf32> to vector<2x192xf32>
    %853 = vector.extract_strided_slice %844 {offsets = [0, 0], sizes = [2, 64], strides = [1, 1]} : vector<2x128xf32> to vector<2x64xf32>
    %854 = vector.extract_strided_slice %851 {offsets = [0, 0], sizes = [2, 64], strides = [1, 1]} : vector<2x192xf32> to vector<2x64xf32>
    %855 = vector.extract_strided_slice %852 {offsets = [0, 0], sizes = [2, 64], strides = [1, 1]} : vector<2x192xf32> to vector<2x64xf32>
    %856 = arith.addf %854, %855 : vector<2x64xf32>
    %857 = arith.negf %856 : vector<2x64xf32>
    %858 = math.exp %857 : vector<2x64xf32>
    %cst_241 = arith.constant 1.000000e+00 : f32
    %859 = vector.broadcast %cst_241 : f32 to vector<2x64xf32>
    %860 = arith.addf %859, %858 : vector<2x64xf32>
    %861 = arith.divf %859, %860 : vector<2x64xf32>
    %862 = vector.extract_strided_slice %851 {offsets = [0, 64], sizes = [2, 64], strides = [1, 1]} : vector<2x192xf32> to vector<2x64xf32>
    %863 = vector.extract_strided_slice %852 {offsets = [0, 64], sizes = [2, 64], strides = [1, 1]} : vector<2x192xf32> to vector<2x64xf32>
    %864 = arith.addf %862, %863 : vector<2x64xf32>
    %865 = arith.negf %864 : vector<2x64xf32>
    %866 = math.exp %865 : vector<2x64xf32>
    %cst_242 = arith.constant 1.000000e+00 : f32
    %867 = vector.broadcast %cst_242 : f32 to vector<2x64xf32>
    %868 = arith.addf %867, %866 : vector<2x64xf32>
    %869 = arith.divf %867, %868 : vector<2x64xf32>
    %870 = vector.extract_strided_slice %851 {offsets = [0, 128], sizes = [2, 64], strides = [1, 1]} : vector<2x192xf32> to vector<2x64xf32>
    %871 = vector.extract_strided_slice %852 {offsets = [0, 128], sizes = [2, 64], strides = [1, 1]} : vector<2x192xf32> to vector<2x64xf32>
    %872 = arith.mulf %861, %871 : vector<2x64xf32>
    %873 = arith.addf %870, %872 : vector<2x64xf32>
    %874 = math.tanh %873 : vector<2x64xf32>
    %cst_243 = arith.constant 1.000000e+00 : f32
    %875 = vector.broadcast %cst_243 : f32 to vector<2x64xf32>
    %876 = arith.subf %875, %869 : vector<2x64xf32>
    %877 = arith.mulf %876, %874 : vector<2x64xf32>
    %878 = arith.mulf %869, %853 : vector<2x64xf32>
    %879 = arith.addf %877, %878 : vector<2x64xf32>
    %880 = vector.extract_strided_slice %381 {offsets = [0, 0, 192], sizes = [2, 1, 192], strides = [1, 1, 1]} : vector<2x8x384xf32> to vector<2x1x192xf32>
    %881 = vector.shape_cast %880 : vector<2x1x192xf32> to vector<2x192xf32>
    %882 = vector.extract_strided_slice %849 {offsets = [0, 192], sizes = [2, 192], strides = [1, 1]} : vector<2x384xf32> to vector<2x192xf32>
    %883 = vector.extract_strided_slice %844 {offsets = [0, 64], sizes = [2, 64], strides = [1, 1]} : vector<2x128xf32> to vector<2x64xf32>
    %884 = vector.extract_strided_slice %881 {offsets = [0, 0], sizes = [2, 64], strides = [1, 1]} : vector<2x192xf32> to vector<2x64xf32>
    %885 = vector.extract_strided_slice %882 {offsets = [0, 0], sizes = [2, 64], strides = [1, 1]} : vector<2x192xf32> to vector<2x64xf32>
    %886 = arith.addf %884, %885 : vector<2x64xf32>
    %887 = arith.negf %886 : vector<2x64xf32>
    %888 = math.exp %887 : vector<2x64xf32>
    %cst_244 = arith.constant 1.000000e+00 : f32
    %889 = vector.broadcast %cst_244 : f32 to vector<2x64xf32>
    %890 = arith.addf %889, %888 : vector<2x64xf32>
    %891 = arith.divf %889, %890 : vector<2x64xf32>
    %892 = vector.extract_strided_slice %881 {offsets = [0, 64], sizes = [2, 64], strides = [1, 1]} : vector<2x192xf32> to vector<2x64xf32>
    %893 = vector.extract_strided_slice %882 {offsets = [0, 64], sizes = [2, 64], strides = [1, 1]} : vector<2x192xf32> to vector<2x64xf32>
    %894 = arith.addf %892, %893 : vector<2x64xf32>
    %895 = arith.negf %894 : vector<2x64xf32>
    %896 = math.exp %895 : vector<2x64xf32>
    %cst_245 = arith.constant 1.000000e+00 : f32
    %897 = vector.broadcast %cst_245 : f32 to vector<2x64xf32>
    %898 = arith.addf %897, %896 : vector<2x64xf32>
    %899 = arith.divf %897, %898 : vector<2x64xf32>
    %900 = vector.extract_strided_slice %881 {offsets = [0, 128], sizes = [2, 64], strides = [1, 1]} : vector<2x192xf32> to vector<2x64xf32>
    %901 = vector.extract_strided_slice %882 {offsets = [0, 128], sizes = [2, 64], strides = [1, 1]} : vector<2x192xf32> to vector<2x64xf32>
    %902 = arith.mulf %891, %901 : vector<2x64xf32>
    %903 = arith.addf %900, %902 : vector<2x64xf32>
    %904 = math.tanh %903 : vector<2x64xf32>
    %cst_246 = arith.constant 1.000000e+00 : f32
    %905 = vector.broadcast %cst_246 : f32 to vector<2x64xf32>
    %906 = arith.subf %905, %899 : vector<2x64xf32>
    %907 = arith.mulf %906, %904 : vector<2x64xf32>
    %908 = arith.mulf %899, %883 : vector<2x64xf32>
    %909 = arith.addf %907, %908 : vector<2x64xf32>
    %910 = tpu.concatenate %879, %909 in 1 : vector<2x64xf32>, vector<2x64xf32> -> vector<2x128xf32>
    %c0_247 = arith.constant 0 : index
    %c0_248 = arith.constant 0 : index
    %911 = vector.load %arg25[%c0_247, %c0_248] : memref<128x128xf32, #tpu.memory_space<vmem>>, vector<128x128xf32>
    %cst_249 = arith.constant dense<0.000000e+00> : vector<2x128xf32>
    %912 = tpu.matmul %910, %911, %cst_249 {dimension_numbers = #tpu.dot_dimension_numbers<[1], [0], [0], [1], [0, 0, 1, 1], [], []>} : vector<2x128xf32>, vector<128x128xf32>, vector<2x128xf32> -> vector<2x128xf32>
    %c0_250 = arith.constant 0 : index
    %c0_251 = arith.constant 0 : index
    %913 = vector.load %arg26[%c0_250, %c0_251] : memref<1x128xf32, #tpu.memory_space<vmem>>, vector<1x128xf32>
    %914 = vector.broadcast %913 : vector<1x128xf32> to vector<2x128xf32>
    %915 = arith.addf %912, %914 : vector<2x128xf32>
    %c0_252 = arith.constant 0 : index
    %c0_253 = arith.constant 0 : index
    %916 = vector.load %arg27[%c0_252, %c0_253] : memref<2x128xf32, #tpu.memory_space<vmem>>, vector<2x128xf32>
    tpu.vector_store %arg27[%c0_252, %c0_253], %915 {strides = array<i32>} : memref<2x128xf32, #tpu.memory_space<vmem>>, vector<2x128xf32>,
    return
  }
}

</mosaic_0001>

<bundles_post_ra>
// kernel: gpt2_classifier_forward.1
= control target key start
LH: loop header
LB: loop body
LE: loop exit
PB: predicated region body
PF: predicated region fallthrough
CT: control target
= control target key end

     0   :  { %s9961_s0 = inlined_call_operand.vmem [shape: s32[16,1], index: 0, kind: input, shape index: {}]   ;;  %s9962_s1 = inlined_call_operand.vmem [shape: f32[1,16], index: 1, kind: input, shape index: {}]   ;;  %s9963_s2 = inlined_call_operand.vmem [shape: f32[128,16], index: 2, kind: input, shape index: {}]   ;;  %s9964_s3 = inlined_call_operand.vmem [shape: f32[16,16], index: 3, kind: input, shape index: {}]   ;;  %s9965_s4 = inlined_call_operand.vmem [shape: f32[2,16], index: 4, kind: input, shape index: {}]   ;;  %s9966_s5 = inlined_call_operand.vmem [shape: f32[1,16], index: 5, kind: input, shape index: {}]   ;;  %s9967_s6 = inlined_call_operand.hbm [shape: f32[1,16], index: 6, kind: input, shape index: {}]   ;;  %s9968_s7 = inlined_call_operand.vmem [shape: f32[16,32], index: 7, kind: input, shape index: {}]   ;;  %s9969_s8 = inlined_call_operand.hbm [shape: f32[1,32], index: 8, kind: input, shape index: {}]   ;;  %s9970_s9 = inlined_call_operand.vmem [shape: f32[32,96], index: 9, kind: input, shape index: {}]   ;;  %s9971_s10 = inlined_call_operand.hbm [shape: f32[1,96], index: 10, kind: input, shape index: {}]   ;;  %s9972_s11 = inlined_call_operand.vmem [shape: f32[32,32], index: 11, kind: input, shape index: {}]   ;;  %s9973_s12 = inlined_call_operand.hbm [shape: f32[1,32], index: 12, kind: input, shape index: {}]   ;;  %s9974_s13 = inlined_call_operand.hbm [shape: f32[1,32], index: 13, kind: input, shape index: {}]   ;;  %s9975_s14 = inlined_call_operand.hbm [shape: f32[1,32], index: 14, kind: input, shape index: {}]   ;;  %s9976_s15 = inlined_call_operand.vmem [shape: f32[32,128], index: 15, kind: input, shape index: {}]   ;;  %s9977_s16 = inlined_call_operand.hbm [shape: f32[1,128], index: 16, kind: input, shape index: {}]   ;;  %s9978_s17 = inlined_call_operand.vmem [shape: f32[128,32], index: 17, kind: input, shape index: {}]   ;;  %s9979_s18 = inlined_call_operand.hbm [shape: f32[1,32], index: 18, kind: input, shape index: {}]   ;;  %s9980_s19 = inlined_call_operand.hbm [shape: f32[1,32], index: 19, kind: input, shape index: {}]   ;;  %s9981_s20 = inlined_call_operand.hbm [shape: f32[1,32], index: 20, kind: input, shape index: {}]   ;;  %s9982_s21 = inlined_call_operand.vmem [shape: f32[32,384], index: 21, kind: input, shape index: {}]   ;;  %s9983_s22 = inlined_call_operand.hbm [shape: f32[1,384], index: 22, kind: input, shape index: {}]   ;;  %s9984_s23 = inlined_call_operand.hbm [shape: f32[128,384], index: 23, kind: input, shape index: {}]   ;;  %s9985_s24 = inlined_call_operand.hbm [shape: f32[1,384], index: 24, kind: input, shape index: {}]   ;;  %s9986_s25 = inlined_call_operand.vmem [shape: f32[128,128], index: 25, kind: input, shape index: {}]   ;;  %s9987_s26 = inlined_call_operand.hbm [shape: f32[1,128], index: 26, kind: input, shape index: {}]   ;;  %s9988_s27 = inlined_call_operand.hbm [shape: f32[2,128], index: 27, kind: output, shape index: {}]  }
   0x1   :  { %9997 = sst [smem:[#allocation35_spill]] %s9961_s0 }
   0x2   :  { %9998 = sst [smem:[#allocation36_spill]] %s9962_s1 }
   0x3   :  { %9999 = sst [smem:[#allocation37_spill]] %s9963_s2 }
   0x4   :  { %10000 = sst [smem:[#allocation38_spill]] %s9964_s3 }
   0x5   :  { %10001 = sst [smem:[#allocation39_spill]] %s9965_s4 }
   0x6   :  { %10002 = sst [smem:[#allocation40_spill]] %s9966_s5 }
   0x7   :  { %10003 = sst [smem:[#allocation41_spill]] %s9967_s6 }
   0x8   :  { %10004 = sst [smem:[#allocation42_spill]] %s9968_s7 }
   0x9   :  { %10005 = sst [smem:[#allocation43_spill]] %s9969_s8 }
   0xa   :  { %10006 = sst [smem:[#allocation44_spill]] %s9970_s9 }
   0xb   :  { %10007 = sst [smem:[#allocation45_spill]] %s9971_s10 }
   0xc   :  { %10008 = sst [smem:[#allocation46_spill]] %s9972_s11 }
   0xd   :  { %32 = vsyncpa [#allocation3], 0 }
   0xe   :  { %33 = vsyncpa [#allocation6], 0 }
   0xf   :  { %34 = vsyncpa [#allocation9], 0 }
  0x10   :  { %35 = vsyncpa [#allocation12], 0 }
  0x11   :  { %36 = vsyncpa [#allocation15], 0 }
  0x12   :  { %37 = vsyncpa [#allocation18], 0 }
  0x13   :  { %38 = vsyncpa [#allocation21], 0 }
  0x14   :  { %39 = vsyncpa [#allocation24], 0 }
  0x15   :  { %40 = vsyncpa [#allocation4], 0  ;;  %s8283_s7 = smov [#allocation5]   ;;  %s8284_s8 = smov [#allocation8]  }
  0x16   :  { %s71_s4 = sshll.u32 %s8283_s7, 4  ;;  %s95_s30 = sshll.u32 %s8284_s8, 4  ;;  %s72_s4 = int_to_ptr.vmem [resolvable:$true] %s71_s4  ;;  %s96_s30 = int_to_ptr.vmem [resolvable:$true] %s95_s30 }
  0x17   :  { %s10009_s28 = sld [smem:[#allocation43_spill]] }
  0x1d   :  { %s7935_s0 = scalar_lea.hbm %s10009_s28, 16 }
  0x1e   :  { %p7936_p0 = scmp.ne.s32.totalorder %s10009_s28, %s7935_s0  ;;  %p7939_p1 = scmp.lt.u32.totalorder %s7935_s0, %s10009_s28 }
  0x20   :  { %p7941_p2 = pnand %p7939_p1, %p7936_p0 }
  0x22   :  { %7944 = shalt.err (!%p7941_p2)
}
  0x23   :  { %s7945_s11 = scalar_lea.vmem %s72_s4, 16  ;;  %s7949_s2 = scalar_lea.vmem %s72_s4, 32 }
  0x24   :  { %p7946_p3 = scmp.ne.s32.totalorder %s72_s4, %s7945_s11  ;;  %p7950_p4 = scmp.lt.s32.totalorder %s72_s4, %s72_s4 }
  0x25   :  { %p7951_p5 = scmp.lt.s32.totalorder %s7949_s2, %s7945_s11 }
  0x27   :  { %p7952_p6 = por %p7951_p5, %p7950_p4 }
  0x29   :  { %p7953_p7 = pnand %p7952_p6, %p7946_p3 }
  0x2b   :  { %7956 = shalt.err (!%p7953_p7)
}
  0x2c   :  { %74 = dma.hbm_to_vmem [thread:$0]  %s10009_s28, 16, %s72_s4, [#allocation6]  }
  0x2d   :  { %s7957_s5 = scalar_lea.hbm %s9973_s12, 16 }
  0x2e   :  { %p7958_p8 = scmp.ne.s32.totalorder %s9973_s12, %s7957_s5  ;;  %p7961_p9 = scmp.lt.u32.totalorder %s7957_s5, %s9973_s12 }
  0x30   :  { %p7963_p10 = pnand %p7961_p9, %p7958_p8 }
  0x32   :  { %7966 = shalt.err (!%p7963_p10)
}
  0x33   :  { %s7967_s6 = scalar_lea.vmem %s96_s30, 16  ;;  %s7971_s11 = scalar_lea.vmem %s96_s30, 32 }
  0x34   :  { %p7968_p11 = scmp.ne.s32.totalorder %s96_s30, %s7967_s6  ;;  %p7972_p12 = scmp.lt.s32.totalorder %s96_s30, %s96_s30 }
  0x35   :  { %p7973_p13 = scmp.lt.s32.totalorder %s7971_s11, %s7967_s6 }
  0x37   :  { %p7974_p0 = por %p7973_p13, %p7972_p12 }
  0x39   :  { %p7975_p1 = pnand %p7974_p0, %p7968_p11 }
  0x3b   :  { %7978 = shalt.err (!%p7975_p1)
}
  0x3c   :  { %98 = dma.hbm_to_vmem [thread:$0]  %s9973_s12, 16, %s96_s30, [#allocation9]  }
  0x3d   :  { %s8285_s2 = smov [#allocation11]   ;;  %s8286_s7 = smov [#allocation14]  }
  0x3e   :  { %s115_s3 = sshll.u32 %s8285_s2, 4  ;;  %s139_s8 = sshll.u32 %s8286_s7, 4  ;;  %s116_s3 = int_to_ptr.vmem [resolvable:$true] %s115_s3  ;;  %s140_s8 = int_to_ptr.vmem [resolvable:$true] %s139_s8 }
  0x3f   :  { %s7979_s10 = scalar_lea.hbm %s9975_s14, 16 }
  0x40   :  { %p7980_p2 = scmp.ne.s32.totalorder %s9975_s14, %s7979_s10  ;;  %p7983_p3 = scmp.lt.u32.totalorder %s7979_s10, %s9975_s14 }
  0x42   :  { %p7985_p4 = pnand %p7983_p3, %p7980_p2 }
  0x44   :  { %7988 = shalt.err (!%p7985_p4)
}
  0x45   :  { %s7989_s12 = scalar_lea.vmem %s116_s3, 16  ;;  %s7993_s30 = scalar_lea.vmem %s116_s3, 32 }
  0x46   :  { %p7990_p5 = scmp.ne.s32.totalorder %s116_s3, %s7989_s12  ;;  %p7994_p6 = scmp.lt.s32.totalorder %s116_s3, %s116_s3 }
  0x47   :  { %p7995_p7 = scmp.lt.s32.totalorder %s7993_s30, %s7989_s12 }
  0x49   :  { %p7996_p8 = por %p7995_p7, %p7994_p6 }
  0x4b   :  { %p7997_p9 = pnand %p7996_p8, %p7990_p5 }
  0x4d   :  { %8000 = shalt.err (!%p7997_p9)
}
  0x4e   :  { %118 = dma.hbm_to_vmem [thread:$0]  %s9975_s14, 16, %s116_s3, [#allocation12]  }
  0x4f   :  { %s8001_s7 = scalar_lea.hbm %s9979_s18, 16 }
  0x50   :  { %p8002_p10 = scmp.ne.s32.totalorder %s9979_s18, %s8001_s7  ;;  %p8005_p11 = scmp.lt.u32.totalorder %s8001_s7, %s9979_s18 }
  0x52   :  { %p8007_p12 = pnand %p8005_p11, %p8002_p10 }
  0x54   :  { %8010 = shalt.err (!%p8007_p12)
}
  0x55   :  { %s8011_s29 = scalar_lea.vmem %s140_s8, 16  ;;  %s8015_s1 = scalar_lea.vmem %s140_s8, 32 }
  0x56   :  { %p8012_p13 = scmp.ne.s32.totalorder %s140_s8, %s8011_s29  ;;  %p8016_p0 = scmp.lt.s32.totalorder %s140_s8, %s140_s8 }
  0x57   :  { %p8017_p1 = scmp.lt.s32.totalorder %s8015_s1, %s8011_s29 }
  0x59   :  { %p8018_p2 = por %p8017_p1, %p8016_p0 }
  0x5b   :  { %p8019_p3 = pnand %p8018_p2, %p8012_p13 }
  0x5d   :  { %8022 = shalt.err (!%p8019_p3)
}
  0x5e   :  { %142 = dma.hbm_to_vmem [thread:$0]  %s9979_s18, 16, %s140_s8, [#allocation15]  }
  0x5f   :  { %s8287_s6 = smov [#allocation17]   ;;  %s8288_s30 = smov [#allocation20]  }
  0x60   :  { %s159_s12 = sshll.u32 %s8287_s6, 4  ;;  %s180_s11 = sshll.u32 %s8288_s30, 4  ;;  %s160_s12 = int_to_ptr.vmem [resolvable:$true] %s159_s12  ;;  %s8507_s11 = int_to_ptr.vmem [resolvable:$true] %s180_s11 }
  0x61   :  { %s8023_s2 = scalar_lea.hbm %s9981_s20, 16 }
  0x62   :  { %p8024_p4 = scmp.ne.s32.totalorder %s9981_s20, %s8023_s2  ;;  %p8027_p5 = scmp.lt.u32.totalorder %s8023_s2, %s9981_s20 }
  0x64   :  { %p8029_p6 = pnand %p8027_p5, %p8024_p4 }
  0x66   :  { %8032 = shalt.err (!%p8029_p6)
}
  0x67   :  { %s8033_s18 = scalar_lea.vmem %s160_s12, 16  ;;  %s8037_s8 = scalar_lea.vmem %s160_s12, 32 }
  0x68   :  { %p8034_p7 = scmp.ne.s32.totalorder %s160_s12, %s8033_s18  ;;  %p8038_p8 = scmp.lt.s32.totalorder %s160_s12, %s160_s12 }
  0x69   :  { %p8039_p9 = scmp.lt.s32.totalorder %s8037_s8, %s8033_s18 }
  0x6b   :  { %p8040_p10 = por %p8039_p9, %p8038_p8 }
  0x6d   :  { %p8041_p11 = pnand %p8040_p10, %p8034_p7 }
  0x6f   :  { %8044 = shalt.err (!%p8041_p11)
}
  0x70   :  { %162 = dma.hbm_to_vmem [thread:$0]  %s9981_s20, 16, %s160_s12, [#allocation18]  }
  0x71   :  { %s8045_s3 = scalar_lea.hbm %s9984_s23, 6144 }
  0x72   :  { %p8046_p12 = scmp.ne.s32.totalorder %s9984_s23, %s8045_s3  ;;  %p8049_p13 = scmp.lt.u32.totalorder %s8045_s3, %s9984_s23 }
  0x74   :  { %p8051_p0 = pnand %p8049_p13, %p8046_p12 }
  0x76   :  { %8054 = shalt.err (!%p8051_p0)
}
  0x77   :  { %s8055_s2 = scalar_lea.vmem %s8507_s11, 6144  ;;  %p8060_p2 = scmp.lt.s32.totalorder %s8507_s11, %s8507_s11 }
  0x78   :  { %p8056_p1 = scmp.ne.s32.totalorder %s8507_s11, %s8055_s2  ;;  %p8061_p3 = scmp.lt.s32.totalorder %s8055_s2, %s8055_s2 }
  0x7a   :  { %p8062_p4 = por %p8061_p3, %p8060_p2 }
  0x7c   :  { %p8063_p5 = pnand %p8062_p4, %p8056_p1 }
  0x7e   :  { %8066 = shalt.err (!%p8063_p5)
}
  0x7f   :  { %s8289_s20 = smov 384   ;;  %s8290_s12 = smov 24  }
  0x80   :  { %186 = dma.hbm_to_vmem [thread:$0]  %s9984_s23, 6144, %s8507_s11, [#allocation21], %s8289_s20, %s8289_s20, %s8290_s12  }
  0x81   :  { %s8291_s5 = smov [#allocation2]   ;;  %s8292_s18 = smov [#allocation7]  }
  0x82   :  { %s59_s10 = sshll.u32 %s8291_s5, 4  ;;  %s83_s8 = sshll.u32 %s8292_s18, 4  ;;  %s60_s10 = int_to_ptr.vmem [resolvable:$true] %s59_s10  ;;  %s84_s8 = int_to_ptr.vmem [resolvable:$true] %s83_s8 }
  0x83   :  { %s10010_s1 = sld [smem:[#allocation41_spill]] }
  0x89   :  { %s8067_s14 = scalar_lea.hbm %s10010_s1, 16 }
  0x8a   :  { %p8068_p6 = scmp.ne.s32.totalorder %s10010_s1, %s8067_s14  ;;  %p8071_p7 = scmp.lt.u32.totalorder %s8067_s14, %s10010_s1 }
  0x8c   :  { %p8073_p8 = pnand %p8071_p7, %p8068_p6 }
  0x8e   :  { %8076 = shalt.err (!%p8073_p8)
}
  0x8f   :  { %s8077_s23 = scalar_lea.vmem %s60_s10, 16  ;;  %s8081_s11 = scalar_lea.vmem %s60_s10, 32 }
  0x90   :  { %p8078_p9 = scmp.ne.s32.totalorder %s60_s10, %s8077_s23  ;;  %p8082_p10 = scmp.lt.s32.totalorder %s60_s10, %s60_s10 }
  0x91   :  { %p8083_p11 = scmp.lt.s32.totalorder %s8081_s11, %s8077_s23 }
  0x93   :  { %p8084_p12 = por %p8083_p11, %p8082_p10 }
  0x95   :  { %p8085_p13 = pnand %p8084_p12, %p8078_p9 }
  0x97   :  { %8088 = shalt.err (!%p8085_p13)
}
  0x98   :  { %62 = dma.hbm_to_vmem [thread:$0]  %s10010_s1, 16, %s60_s10, [#allocation3]  }
  0x99   :  { %s10011_s9 = sld [smem:[#allocation45_spill]] }
  0x9f   :  { %s8089_s5 = scalar_lea.hbm %s10011_s9, 16 }
  0xa0   :  { %p8090_p0 = scmp.ne.s32.totalorder %s10011_s9, %s8089_s5  ;;  %p8093_p1 = scmp.lt.u32.totalorder %s8089_s5, %s10011_s9 }
  0xa2   :  { %p8095_p2 = pnand %p8093_p1, %p8090_p0 }
  0xa4   :  { %8098 = shalt.err (!%p8095_p2)
}
  0xa5   :  { %s8099_s3 = scalar_lea.vmem %s84_s8, 16  ;;  %s8103_s6 = scalar_lea.vmem %s84_s8, 32 }
  0xa6   :  { %p8100_p3 = scmp.ne.s32.totalorder %s84_s8, %s8099_s3  ;;  %p8104_p4 = scmp.lt.s32.totalorder %s84_s8, %s84_s8 }
  0xa7   :  { %p8105_p5 = scmp.lt.s32.totalorder %s8103_s6, %s8099_s3 }
  0xa9   :  { %p8106_p6 = por %p8105_p5, %p8104_p4 }
  0xab   :  { %p8107_p7 = pnand %p8106_p6, %p8100_p3 }
  0xad   :  { %8110 = shalt.err (!%p8107_p7)
}
  0xae   :  { %86 = dma.hbm_to_vmem [thread:$0]  %s10011_s9, 16, %s84_s8, [#allocation6]  }
  0xaf   :  { %s8293_s30 = smov [#allocation10]   ;;  %s8294_s23 = smov [#allocation13]  }
  0xb0   :  { %s105_s4 = sshll.u32 %s8293_s30, 4  ;;  %s127_s11 = sshll.u32 %s8294_s23, 4  ;;  %s106_s4 = int_to_ptr.vmem [resolvable:$true] %s105_s4  ;;  %s128_s11 = int_to_ptr.vmem [resolvable:$true] %s127_s11 }
  0xb1   :  { %s8111_s20 = scalar_lea.hbm %s9974_s13, 16 }
  0xb2   :  { %p8112_p8 = scmp.ne.s32.totalorder %s9974_s13, %s8111_s20  ;;  %p8115_p9 = scmp.lt.u32.totalorder %s8111_s20, %s9974_s13 }
  0xb4   :  { %p8117_p10 = pnand %p8115_p9, %p8112_p8 }
  0xb6   :  { %8120 = shalt.err (!%p8117_p10)
}
  0xb7   :  { %s8121_s8 = scalar_lea.vmem %s106_s4, 16  ;;  %s8125_s9 = scalar_lea.vmem %s106_s4, 32 }
  0xb8   :  { %p8122_p11 = scmp.ne.s32.totalorder %s106_s4, %s8121_s8  ;;  %p8126_p12 = scmp.lt.s32.totalorder %s106_s4, %s106_s4 }
  0xb9   :  { %p8127_p13 = scmp.lt.s32.totalorder %s8125_s9, %s8121_s8 }
  0xbb   :  { %p8128_p0 = por %p8127_p13, %p8126_p12 }
  0xbd   :  { %p8129_p1 = pnand %p8128_p0, %p8122_p11 }
  0xbf   :  { %8132 = shalt.err (!%p8129_p1)
}
  0xc0   :  { %108 = dma.hbm_to_vmem [thread:$0]  %s9974_s13, 16, %s106_s4, [#allocation9]  }
  0xc1   :  { %s8133_s10 = scalar_lea.hbm %s9977_s16, 16 }
  0xc2   :  { %p8134_p2 = scmp.ne.s32.totalorder %s9977_s16, %s8133_s10  ;;  %p8137_p3 = scmp.lt.u32.totalorder %s8133_s10, %s9977_s16 }
  0xc4   :  { %p8139_p4 = pnand %p8137_p3, %p8134_p2 }
  0xc6   :  { %8142 = shalt.err (!%p8139_p4)
}
  0xc7   :  { %s8143_s2 = scalar_lea.vmem %s128_s11, 16  ;;  %s8147_s20 = scalar_lea.vmem %s128_s11, 32 }
  0xc8   :  { %p8144_p5 = scmp.ne.s32.totalorder %s128_s11, %s8143_s2  ;;  %p8148_p6 = scmp.lt.s32.totalorder %s128_s11, %s128_s11 }
  0xc9   :  { %p8149_p7 = scmp.lt.s32.totalorder %s8147_s20, %s8143_s2 }
  0xcb   :  { %p8150_p8 = por %p8149_p7, %p8148_p6 }
  0xcd   :  { %p8151_p9 = pnand %p8150_p8, %p8144_p5 }
  0xcf   :  { %8154 = shalt.err (!%p8151_p9)
}
  0xd0   :  { %130 = dma.hbm_to_vmem [thread:$0]  %s9977_s16, 16, %s128_s11, [#allocation12]  }
  0xd1   :  { %s8295_s7 = smov [#allocation16]   ;;  %s8296_s18 = smov [#allocation19]  }
  0xd2   :  { %s149_s5 = sshll.u32 %s8295_s7, 4  ;;  %s171_s0 = sshll.u32 %s8296_s18, 4  ;;  %s150_s5 = int_to_ptr.vmem [resolvable:$true] %s149_s5  ;;  %s172_s0 = int_to_ptr.vmem [resolvable:$true] %s171_s0 }
  0xd3   :  { %s8155_s29 = scalar_lea.hbm %s9980_s19, 16 }
  0xd4   :  { %p8156_p10 = scmp.ne.s32.totalorder %s9980_s19, %s8155_s29  ;;  %p8159_p11 = scmp.lt.u32.totalorder %s8155_s29, %s9980_s19 }
  0xd6   :  { %p8161_p12 = pnand %p8159_p11, %p8156_p10 }
  0xd8   :  { %8164 = shalt.err (!%p8161_p12)
}
  0xd9   :  { %s8165_s16 = scalar_lea.vmem %s150_s5, 16  ;;  %s8169_s11 = scalar_lea.vmem %s150_s5, 32 }
  0xda   :  { %p8166_p13 = scmp.ne.s32.totalorder %s150_s5, %s8165_s16  ;;  %p8170_p0 = scmp.lt.s32.totalorder %s150_s5, %s150_s5 }
  0xdb   :  { %p8171_p1 = scmp.lt.s32.totalorder %s8169_s11, %s8165_s16 }
  0xdd   :  { %p8172_p2 = por %p8171_p1, %p8170_p0 }
  0xdf   :  { %p8173_p3 = pnand %p8172_p2, %p8166_p13 }
  0xe1   :  { %8176 = shalt.err (!%p8173_p3)
}
  0xe2   :  { %152 = dma.hbm_to_vmem [thread:$0]  %s9980_s19, 16, %s150_s5, [#allocation15]  }
  0xe3   :  { %s8177_s2 = scalar_lea.hbm %s9983_s22, 48 }
  0xe4   :  { %p8178_p4 = scmp.ne.s32.totalorder %s9983_s22, %s8177_s2  ;;  %p8181_p5 = scmp.lt.u32.totalorder %s8177_s2, %s9983_s22 }
  0xe6   :  { %p8183_p6 = pnand %p8181_p5, %p8178_p4 }
  0xe8   :  { %8186 = shalt.err (!%p8183_p6)
}
  0xe9   :  { %s8187_s18 = scalar_lea.vmem %s172_s0, 48  ;;  %s8191_s8 = scalar_lea.vmem %s172_s0, 64 }
  0xea   :  { %p8188_p7 = scmp.ne.s32.totalorder %s172_s0, %s8187_s18  ;;  %p8192_p8 = scmp.lt.s32.totalorder %s172_s0, %s172_s0 }
  0xeb   :  { %p8193_p9 = scmp.lt.s32.totalorder %s8191_s8, %s8187_s18 }
  0xed   :  { %p8194_p10 = por %p8193_p9, %p8192_p8 }
  0xef   :  { %p8195_p11 = pnand %p8194_p10, %p8188_p7 }
  0xf1   :  { %8198 = shalt.err (!%p8195_p11)
}
  0xf2   :  { %174 = dma.hbm_to_vmem [thread:$0]  %s9983_s22, 48, %s172_s0, [#allocation18]  }
  0xf3   :  { %s8297_s9 = smov [#allocation22]   ;;  %s8298_s14 = smov [#allocation23]  }
  0xf4   :  { %s193_s29 = sshll.u32 %s8297_s9, 4  ;;  %s205_s3 = sshll.u32 %s8298_s14, 4  ;;  %s194_s29 = int_to_ptr.vmem [resolvable:$true] %s193_s29  ;;  %s206_s3 = int_to_ptr.vmem [resolvable:$true] %s205_s3 }
  0xf5   :  { %s8199_s16 = scalar_lea.hbm %s9985_s24, 48 }
  0xf6   :  { %p8200_p12 = scmp.ne.s32.totalorder %s9985_s24, %s8199_s16  ;;  %p8203_p13 = scmp.lt.u32.totalorder %s8199_s16, %s9985_s24 }
  0xf8   :  { %p8205_p0 = pnand %p8203_p13, %p8200_p12 }
  0xfa   :  { %8208 = shalt.err (!%p8205_p0)
}
  0xfb   :  { %s8209_s22 = scalar_lea.vmem %s194_s29, 48  ;;  %s8213_s0 = scalar_lea.vmem %s194_s29, 64 }
  0xfc   :  { %p8210_p1 = scmp.ne.s32.totalorder %s194_s29, %s8209_s22  ;;  %p8214_p2 = scmp.lt.s32.totalorder %s194_s29, %s194_s29 }
  0xfd   :  { %p8215_p3 = scmp.lt.s32.totalorder %s8213_s0, %s8209_s22 }
  0xff   :  { %p8216_p4 = por %p8215_p3, %p8214_p2 }
 0x101   :  { %p8217_p5 = pnand %p8216_p4, %p8210_p1 }
 0x103   :  { %8220 = shalt.err (!%p8217_p5)
}
 0x104   :  { %196 = dma.hbm_to_vmem [thread:$0]  %s9985_s24, 48, %s194_s29, [#allocation21]  }
 0x105   :  { %s8221_s4 = scalar_lea.hbm %s9987_s26, 16 }
 0x106   :  { %p8222_p6 = scmp.ne.s32.totalorder %s9987_s26, %s8221_s4  ;;  %p8225_p7 = scmp.lt.u32.totalorder %s8221_s4, %s9987_s26 }
 0x108   :  { %p8227_p8 = pnand %p8225_p7, %p8222_p6 }
 0x10a   :  { %8230 = shalt.err (!%p8227_p8)
}
 0x10b   :  { %s8231_s5 = scalar_lea.vmem %s206_s3, 16  ;;  %s8235_s9 = scalar_lea.vmem %s206_s3, 32 }
 0x10c   :  { %p8232_p9 = scmp.ne.s32.totalorder %s206_s3, %s8231_s5  ;;  %p8236_p10 = scmp.lt.s32.totalorder %s206_s3, %s206_s3 }
 0x10d   :  { %p8237_p11 = scmp.lt.s32.totalorder %s8235_s9, %s8231_s5 }
 0x10f   :  { %p8238_p12 = por %p8237_p11, %p8236_p10 }
 0x111   :  { %p8239_p13 = pnand %p8238_p12, %p8232_p9 }
 0x113   :  { %8242 = shalt.err (!%p8239_p13)
}
 0x114   :  { %208 = dma.hbm_to_vmem [thread:$0]  %s9987_s26, 16, %s206_s3, [#allocation24]  }
 0x115   :  { %8265 = dma.done.wait [#allocation3], 16  }
 0x116   :  { %8266 = vsyncadd [#allocation3], 4294967280 }
 0x117   :  { %8267 = dma.done.wait [#allocation6], 32  }
 0x118   :  { %8268 = vsyncadd [#allocation6], 4294967264 }
 0x119   :  { %8269 = dma.done.wait [#allocation9], 32  }
 0x11a   :  { %8270 = vsyncadd [#allocation9], 4294967264 }
 0x11b   :  { %8271 = dma.done.wait [#allocation12], 32  }
 0x11c   :  { %8272 = vsyncadd [#allocation12], 4294967264 }
 0x11d   :  { %8273 = dma.done.wait [#allocation15], 32  }
 0x11e   :  { %8274 = vsyncadd [#allocation15], 4294967264 }
 0x11f   :  { %8275 = dma.done.wait [#allocation18], 64  }
 0x120   :  { %8276 = vsyncadd [#allocation18], 4294967232 }
 0x121   :  { %8277 = dma.done.wait [#allocation21], 6192  }
 0x122   :  { %8278 = vsyncadd [#allocation21], 4294961104 }
 0x123   :  { %8279 = dma.done.wait [#allocation24], 16  }
 0x124   :  { %8280 = vsyncadd [#allocation24], 4294967280  ;;  %v8299_v0 = vmov 0   ;;  %s10012_s3 = sld [smem:[#allocation35_spill]]  ;;  %s10013_s16 = sld [smem:[#allocation37_spill]]  ;;  %v253_v27 = vlaneseq  ;;  %v8300_v30 = vmov 1.0  }
 0x125   :  { %7496 = vset.pattern.permute.xlu0 %v8299_v0  ;;  %s10014_s13 = sld [smem:[#allocation38_spill]]  ;;  %s10015_s18 = sld [smem:[#allocation39_spill]]  ;;  %vm367_vm2 = vcmask 130048   ;;  %vm539_vm3 = vcmask 261120   ;;  %vm627_vm4 = vcmask 64512   ;;  %vm1464_vm8 = vcmask 195584  }
 0x126   :  { %v8690_v28 = vand.u32 127, %v253_v27  ;;  %s10016_s5 = sld [smem:[#allocation42_spill]]  ;;  %s10017_s26 = sld [smem:[#allocation44_spill]]  ;;  %vm8761_vm5 = vmpackc.low %vm627_vm4, %vm627_vm4  ;;  %vm8317_vm9 = vmmov 0   ;;  %vm3601_vm10 = vcmask 1041409   ;;  %vm3614_vm11 = vcmask 523264  }
 0x127   :  { %s10018_s1 = sld [smem:[#allocation40_spill]]  ;;  %s8301_s28 = smov 96   ;;  %vm3879_vm12 = vcmask 1042434   ;;  %vm4160_vm13 = vcmask 1043459   ;;  %vm4435_vm14 = vcmask 1044484   ;;  %vm4709_vm15 = vcmask 1045509  }
 0x128   :  { %s10021_s20 = sld [smem:[#allocation36_spill]]  ;;  %s8304_s4 = smov 64  }
 0x129   :  { %s8305_s7 = smov 72   ;;  %s8307_s8 = smov 104  }
 0x12a   :  { %v251_v1 = vld [vmem:[%s10012_s3] sm:$0xff]  ;;  %v268_v3 = vld [vmem:[%s10013_s16 + $0x8] sm:$0xff]  ;;  %v269_v4 = vld [vmem:[%s10013_s16 + $0x10] sm:$0xff]  ;;  %s8308_s19 = smov 80   ;;  %s8310_s9 = smov 56  }
 0x12b   :  { %v267_v2 = vld [vmem:[%s10013_s16] sm:$0xff]  ;;  %256 = vperm.xlu0 %7496, %v251_v1   ;;  %v270_v5 = vld [vmem:[%s10013_s16 + $0x18] sm:$0xff]  ;;  %v252_v6 = vld [vmem:[%s10012_s3 + $0x8] sm:$0xff]  ;;  %s8311_s24 = smov 40   ;;  %s8312_s29 = smov 48  }
 0x12c   :  { %v6744_v7 = vpack.c.bf16 %v268_v3, %v267_v2  ;;  %v6748_v8 = vpack.c.bf16 %v270_v5, %v269_v4  ;;  %v271_v9 = vld [vmem:[%s10013_s16 + $0x20] sm:$0xff]  ;;  %v272_v10 = vld [vmem:[%s10013_s16 + $0x28] sm:$0xff]  ;;  %v273_v12 = vld [vmem:[%s10013_s16 + $0x30] sm:$0xff]  ;;  %s10022_s3 = sld [smem:[#allocation46_spill]]  ;;  %s8313_s11 = smov 8  }
 0x12d   :  { %v6752_v11 = vpack.c.bf16 %v272_v10, %v271_v9  ;;  %v274_v13 = vld [vmem:[%s10013_s16 + $0x38] sm:$0xff]  ;;  %v275_v15 = vld [vmem:[%s10013_s16 + $0x40] sm:$0xff]  ;;  %v276_v16 = vld [vmem:[%s10013_s16 + $0x48] sm:$0xff]  ;;  %s8314_s0 = smov 16  }
 0x12e   :  { %6745 = vmatprep.subr.bf16.mxu0 %v6744_v7  ;;  %v6756_v14 = vpack.c.bf16 %v274_v13, %v273_v12  ;;  %v6760_v17 = vpack.c.bf16 %v276_v16, %v275_v15  ;;  %v277_v18 = vld [vmem:[%s10013_s16 + $0x50] sm:$0xff]  ;;  %v278_v19 = vld [vmem:[%s10013_s16 + $0x58] sm:$0xff]  ;;  %v279_v21 = vld [vmem:[%s10013_s16 + $0x60] sm:$0xff] }
 0x12f   :  { %259 = vperm.xlu0 %7496, %v252_v6   ;;  %6747 = vmatpush3.bf16.msra.mxu0 %v6744_v7  ;;  %v6764_v20 = vpack.c.bf16 %v278_v19, %v277_v18  ;;  %v280_v22 = vld [vmem:[%s10013_s16 + $0x68] sm:$0xff]  ;;  %v281_v24 = vld [vmem:[%s10013_s16 + $0x70] sm:$0xff]  ;;  %v282_v25 = vld [vmem:[%s10013_s16 + $0x78] sm:$0xff] }
 0x130   :  { %6749 = vmatprep.subr.bf16.mxu0 %v6748_v8  ;;  %v6768_v23 = vpack.c.bf16 %v280_v22, %v279_v21  ;;  %v6772_v26 = vpack.c.bf16 %v282_v25, %v281_v24  ;;  %v283_v32 = vld [vmem:[%s10014_s13] sm:$0xff]  ;;  %v412_v52 = vld [vmem:[%s10016_s5 + $0x8] sm:$0xff]  ;;  %v530_v9 = vld [vmem:[%s10017_s26 + $0x10] sm:$0xff]  ;;  %s8303_s13 = smov 88  }
 0x131   :  { %v5682_v33 = vld [vmem:[%s10015_s18] ss:$0 sm:$0xff]  ;;  %v529_v55 = vld [vmem:[%s10017_s26 + $0x8] sm:$0xff]  ;;  %v531_v10 = vld [vmem:[%s10017_s26 + $0x18] sm:$0xff]  ;;  %s8306_s18 = smov 112  }
 0x132   :  { %v289_v34 = vadd.f32 %v5682_v33, %v283_v32  ;;  %v411_v51 = vld [vmem:[%s10016_s5] sm:$0xff]  ;;  %v513_v33 = vcvt.s32.f32 %v8690_v28  ;;  %s8309_s5 = smov 120  }
 0x133   :  { %6751 = vmatpush3.bf16.msra.mxu0 %v6748_v8  ;;  %v6776_v53 = vpack.c.bf16 %v412_v52, %v411_v51  ;;  %v528_v54 = vld [vmem:[%s10017_s26] sm:$0xff] }
 0x134   :  { %6753 = vmatprep.subr.bf16.mxu0 %v6752_v11  ;;  %v8716_v56 = vpack.c.bf16 %v529_v55, %v528_v54  ;;  %v5685_v0 = vld [vmem:[%s10018_s1] ss:$0 sm:$0xff]  ;;  %v5687_v12 = vld [vmem:[#allocation5] ss:$0 sm:$0xff] }
 0x135   :  { %6777 = vmatprep.subr.bf16.mxu1 %v6776_v53  ;;  %v5686_v2 = vld [vmem:[#allocation2] ss:$0 sm:$0xff] }
 0x136   :  { %6779 = vmatpush3.bf16.msra.mxu1 %v6776_v53 }
 0x137   :  { %6755 = vmatpush3.bf16.msra.mxu0 %v6752_v11  ;;  %6781 = vmatprep.subr.bf16.mxu1 %v8716_v56  ;;  %v8731_v11 = vpack.c.bf16 %v531_v10, %v530_v9 }
 0x138   :  { %6757 = vmatprep.subr.bf16.mxu0 %v6756_v14 }
 0x13b   :  { %6759 = vmatpush3.bf16.msra.mxu0 %v6756_v14 }
 0x13c   :  { %6761 = vmatprep.subr.bf16.mxu0 %v6760_v17 }
 0x13f   :  { %6763 = vmatpush3.bf16.msra.mxu0 %v6760_v17  ;;  %v8743_v17 = vld [vmem:[#allocation7] ss:$0 sm:$0xff] }
 0x140   :  { %6765 = vmatprep.subr.bf16.mxu0 %v6764_v20 }
 0x143   :  { %6767 = vmatpush3.bf16.msra.mxu0 %v6764_v20 }
 0x144   :  { %6769 = vmatprep.subr.bf16.mxu0 %v6768_v23 }
 0x147   :  { %6771 = vmatpush3.bf16.msra.mxu0 %v6768_v23 }
 0x148   :  { %6773 = vmatprep.subr.bf16.mxu0 %v6772_v26 }
 0x14b   :  { %6775 = vmatpush3.bf16.msra.mxu0 %v6772_v26 }
 0x1aa   :  { %v257_v29 = vpop.permute.xlu0 %256 }
 0x1ab   :  { %vm261_vm0 = vcmp.eq.s32.totalorder %v257_v29, %v8690_v28 }
 0x1ac   :  { %6160 = vmatprep.mubr.msk.f32.mxu0 %vm261_vm0, %v8300_v30  ;;  %vm4990_vm0 = vcmask 1046534  }
 0x1ae   :  { %v260_v31 = vpop.permute.xlu0 %259 }
 0x1af   :  { %vm262_vm1 = vcmp.eq.s32.totalorder %v260_v31, %v8690_v28 }
 0x1b0   :  { %6161 = vmatmul.mubr.msk.f32.vlgmr.msra.gmra.mrb[0].mxu0 %vm262_vm1, %v8300_v30  ;;  %v8772_v30 = vshrl.u32 %v253_v27, 7  ;;  %vm5268_vm1 = vcmask 1047559  }
 0x1b2   :  { %v506_v31 = vadd.s32 8, %v8772_v30 }
 0x1b4   :  { %v508_v32 = vcvt.s32.f32 %v506_v31 }
 0x283   :  { %v6162_v35 = vpop.f32.mrb[0].mxu0 }
 0x284   :  { %v356_v36 = vpop.f32.mrb[1].mxu0  ;;  %v362_v38 = vadd.f32 %v6162_v35, %v289_v34  ;;  %v501_v35 = vld [vmem:[%s10021_s20] sm:$0x1] }
 0x285   :  { %v357_v37 = vadd.f32 %v356_v36, %v289_v34  ;;  %v507_v34 = vcvt.s32.f32 %v8772_v30  ;;  %v510_v36 = vmul.f32 0.125, %v508_v32 }
 0x286   :  { %v371_v40 = vsel %vm367_vm2, %v362_v38, 0.0 }
 0x287   :  { %v368_v39 = vsel %vm367_vm2, %v357_v37, 0.0 }
 0x288   :  { %369 = vadd.xlane.f32.xlu1 %v368_v39  ;;  %v502_v39 = vsub.f32 1.0, %v501_v35 }
 0x28a   :  { %v503_v27 = vmul.f32 -1e+09, %v502_v39 }
 0x28c   :  { %372 = vadd.xlane.f32.xlu1 %v371_v40  ;;  %v512_v40 = vfloor.f32 %v510_v36 }
 0x315   :  { %v370_v41 = vpop.xlane.xlu1 %369 }
 0x316   :  { %v375_v42 = vmul.f32 0.0625, %v370_v41 }
 0x318   :  { %v377_v43 = vsub.f32 %v357_v37, %v375_v42  ;;  %v514_v37 = vmul.f32 0.125, %v513_v33 }
 0x319   :  { %v373_v44 = vpop.xlane.xlu1 %372 }
 0x31a   :  { %v376_v45 = vmul.f32 0.0625, %v373_v44  ;;  %v379_v46 = vmul.f32 %v377_v43, %v377_v43  ;;  %v515_v41 = vfloor.f32 %v514_v37  ;;  %v8302_v44 = vmov -1e+09  }
 0x31c   :  { %v378_v47 = vsub.f32 %v362_v38, %v376_v45  ;;  %v381_v48 = vsel %vm367_vm2, %v379_v46, 0.0  ;;  %v509_v38 = vmul.f32 0.125, %v507_v34  ;;  %vm517_vm6 = vcmp.eq.f32.partialorder %v512_v40, %v515_v41 }
 0x31d   :  { %382 = vadd.xlane.f32.xlu0 %v381_v48  ;;  %v519_v45 = vsel %vm517_vm6, 0.0, %v8302_v44 }
 0x31e   :  { %v380_v49 = vmul.f32 %v378_v47, %v378_v47  ;;  %v511_v42 = vfloor.f32 %v509_v38 }
 0x320   :  { %v384_v50 = vsel %vm367_vm2, %v380_v49, 0.0  ;;  %vm516_vm7 = vcmp.eq.f32.partialorder %v511_v42, %v515_v41 }
 0x321   :  { %385 = vadd.xlane.f32.xlu1 %v384_v50  ;;  %v518_v46 = vsel %vm516_vm7, 0.0, %v8302_v44 }
 0x3aa   :  { %v383_v57 = vpop.xlane.xlu0 %382 }
 0x3ab   :  { %v387_v58 = vmul.f32 0.0625, %v383_v57 }
 0x3ad   :  { %v389_v59 = vadd.f32 1e-12, %v387_v58 }
 0x3ae   :  { %v386_v60 = vpop.xlane.xlu1 %385 }
 0x3af   :  { %7587 = vrsqrt.f32 %v389_v59  ;;  %v388_v61 = vmul.f32 0.0625, %v386_v60 }
 0x3b1   :  { %v390_v62 = vadd.f32 1e-12, %v388_v61 }
 0x3b3   :  { %7589 = vrsqrt.f32 %v390_v62 }
 0x3b9   :  { %v7588_v63 = vpop.eup %7587 }
 0x3ba   :  { %v393_v1 = vmul.f32 %v7588_v63, %v377_v43  ;;  %v8781_v43 = vsub.s32 0, %v8772_v30 }
 0x3bc   :  { %v401_v3 = vmul.f32 %v5685_v0, %v393_v1  ;;  %v524_v28 = vrot.slane %v503_v27, %v8781_v43 }
 0x3bd   :  { %v7590_v4 = vpop.eup %7589 }
 0x3be   :  { %v394_v5 = vmul.f32 %v7590_v4, %v378_v47  ;;  %v409_v6 = vadd.f32 %v5686_v2, %v401_v3  ;;  %v8784_v47 = vadd.f32 %v524_v28, %v519_v45  ;;  %v8786_v48 = vadd.f32 %v524_v28, %v518_v46 }
 0x3c0   :  { %v402_v7 = vmul.f32 %v5685_v0, %v394_v5  ;;  %6167 = vmatprep.mubr.msk.f32.mxu1 %vm367_vm2, %v409_v6 }
 0x3c2   :  { %v410_v8 = vadd.f32 %v5686_v2, %v402_v7 }
 0x3c4   :  { %6168 = vmatmul.mubr.msk.f32.vlgmr.msra.gmra.mrb[0].mxu1 %vm367_vm2, %v410_v8 }
 0x3c5   :  { %6783 = vmatpush3.bf16.msra.mxu1 %v8716_v56 }
 0x3c6   :  { %6785 = vmatprep.subr.bf16.mxu1 %v8731_v11 }
 0x3c9   :  { %6787 = vmatpush3.bf16.msra.mxu1 %v8731_v11 }
 0x497   :  { %v6169_v13 = vpop.f32.mrb[0].mxu1 }
 0x498   :  { %v492_v14 = vpop.f32.mrb[1].mxu1  ;;  %v8737_v16 = vadd.f32 %v6169_v13, %v5687_v12 }
 0x499   :  { %v8735_v15 = vadd.f32 %v5687_v12, %v492_v14 }
 0x49b   :  { %6178 = vmatprep.mubr.msk.f32.mxu1 %vm539_vm3, %v8735_v15 }
 0x49c   :  { %6179 = vmatmul.mubr.msk.f32.vlgmr.msra.gmra.mrb[2].mxu1 %vm539_vm3, %v8737_v16 }
 0x56f   :  { %v6180_v18 = vpop.f32.mrb[2].mxu1 }
 0x570   :  { %v8746_v19 = vadd.f32 %v6180_v18, %v8743_v17  ;;  %v612_v20 = vpop.f32.mrb[3].mxu1 }
 0x571   :  { %v8749_v21 = vadd.f32 %v8743_v17, %v612_v20 }
 0x573   :  { %6185 = vmatprep.mubr.msk.f32.mxu1 %vm627_vm4, %v8749_v21  ;;  %v8755_v22 = vpack.i.bf16 %v8746_v19, %v8749_v21 }
 0x575   :  { %7498 = vrot.lane.b32.xlu1 %v8755_v22, %s8301_s28 }
 0x5e7   :  { %v7499_v23 = vpop.permute.xlu1 %7498 }
 0x5e8   :  { %v7501_v24 = vunpack.i.h.bf16 %v7499_v23  ;;  %v7500_v25 = vunpack.i.l.bf16 %v7499_v23 }
 0x5ea   :  { %v6788_v29 = vpack.c.bf16 %v7501_v24, %v7500_v25 }
 0x5ec   :  { %6790 = vmatprep.subr.msk.bf16.mxu1 %vm8761_vm5, %v6788_v29 }
 0x5ed   :  { %6793 = vmatpush3.bf16.xpose.msk.msra.mxu1 %vm8761_vm5, %v6788_v29 }
 0x5f4   :  { %6186 = vmatmul.mubr.msk.f32.vlgmr.msra.gmra.mrb[4].mxu1 %vm627_vm4, %v8746_v19 }
 0x6c7   :  { %v6187_v49 = vpop.f32.mrb[4].mxu1 }
 0x6c8   :  { %v712_v50 = vmul.f32 0.35355338, %v6187_v49  ;;  %v702_v51 = vpop.f32.mrb[5].mxu1 }
 0x6c9   :  { %v711_v52 = vmul.f32 0.35355338, %v702_v51 }
 0x6ca   :  { %v714_v53 = vadd.f32 %v712_v50, %v8784_v47 }
 0x6cb   :  { %v713_v54 = vadd.f32 %v711_v52, %v8786_v48 }
 0x6cc   :  { %v718_v55 = vsel %vm367_vm2, %v714_v53, -inf }
 0x6cd   :  { %719 = vmax.xlane.f32.xlu0 %v718_v55  ;;  %v715_v57 = vsel %vm367_vm2, %v713_v54, -inf }
 0x6ce   :  { %716 = vmax.xlane.f32.xlu1 %v715_v57 }
 0x6df   :  { %7508 = vrot.lane.b32.xlu1 %v8755_v22, %s8303_s13 }
 0x6e3   :  { %7503 = vrot.lane.b32.xlu0 %v8755_v22, %s8304_s4  ;;  %7518 = vrot.lane.b32.xlu1 %v8755_v22, %s8305_s7 }
 0x6e7   :  { %1030 = vrot.lane.b32.xlu1 %v8746_v19, %s8306_s18 }
 0x6eb   :  { %1234 = vrot.lane.b32.xlu1 %v8746_v19, %s8307_s8 }
 0x75a   :  { %v720_v58 = vpop.xlane.xlu0 %719 }
 0x75b   :  { %v722_v59 = vsub.f32 %v714_v53, %v720_v58  ;;  %v717_v60 = vpop.xlane.xlu1 %716 }
 0x75c   :  { %v721_v61 = vsub.f32 %v713_v54, %v717_v60 }
 0x75d   :  { %v725_v62 = vmul.f32 1.442695, %v722_v59 }
 0x75e   :  { %v723_v63 = vmul.f32 1.442695, %v721_v61  ;;  %v7504_v0 = vpop.permute.xlu0 %7503 }
 0x75f   :  { %7591 = vpow2.f32 %v725_v62  ;;  %v7506_v1 = vunpack.i.h.bf16 %v7504_v0  ;;  %v7505_v2 = vunpack.i.l.bf16 %v7504_v0  ;;  %v7509_v3 = vpop.permute.xlu1 %7508 }
 0x760   :  { %v7511_v4 = vunpack.i.h.bf16 %v7509_v3  ;;  %v7510_v5 = vunpack.i.l.bf16 %v7509_v3  ;;  %7593 = vpow2.f32 %v723_v63 }
 0x761   :  { %v6794_v6 = vpack.c.bf16 %v7506_v1, %v7505_v2 }
 0x762   :  { %v6798_v7 = vpack.c.bf16 %v7511_v4, %v7510_v5 }
 0x763   :  { %6795 = vmatprep.subr.bf16.mxu1 %v6794_v6  ;;  %v7519_v33 = vpop.permute.xlu1 %7518 }
 0x764   :  { %6797 = vmatpush3.bf16.msra.mxu1 %v6794_v6  ;;  %v7521_v34 = vunpack.i.h.bf16 %v7519_v33  ;;  %v7520_v35 = vunpack.i.l.bf16 %v7519_v33 }
 0x765   :  { %6800 = vmatprep.subr.msk.bf16.mxu1 %vm8761_vm5, %v6798_v7 }
 0x766   :  { %v6818_v36 = vpack.c.bf16 %v7521_v34, %v7520_v35 }
 0x767   :  { %v1031_v38 = vpop.permute.xlu1 %1030 }
 0x769   :  { %v7592_v8 = vpop.eup %7591 }
 0x76a   :  { %v730_v9 = vsel %vm367_vm2, %v7592_v8, 0.0  ;;  %v7594_v10 = vpop.eup %7593 }
 0x76b   :  { %731 = vadd.xlane.f32.xlu0 %v730_v9  ;;  %v727_v12 = vsel %vm367_vm2, %v7594_v10, 0.0  ;;  %v1235_v40 = vpop.permute.xlu1 %1234 }
 0x76f   :  { %728 = vadd.xlane.f32.xlu0 %v727_v12 }
 0x785   :  { %7513 = vrot.lane.b32.xlu0 %v8755_v22, %s8308_s19 }
 0x789   :  { %824 = vrot.lane.b32.xlu0 %v8749_v21, %s8309_s5 }
 0x78d   :  { %826 = vrot.lane.b32.xlu0 %v8746_v19, %s8309_s5 }
 0x791   :  { %1028 = vrot.lane.b32.xlu0 %v8749_v21, %s8306_s18 }
 0x795   :  { %1232 = vrot.lane.b32.xlu0 %v8749_v21, %s8307_s8 }
 0x7f8   :  { %v732_v13 = vpop.xlane.xlu0 %731 }
 0x7f9   :  { %7595 = vrcp.f32 %v732_v13 }
 0x7fc   :  { %v729_v14 = vpop.xlane.xlu0 %728 }
 0x7fd   :  { %7597 = vrcp.f32 %v729_v14 }
 0x800   :  { %v7514_v18 = vpop.permute.xlu0 %7513 }
 0x801   :  { %v7516_v24 = vunpack.i.h.bf16 %v7514_v18  ;;  %v7515_v25 = vunpack.i.l.bf16 %v7514_v18 }
 0x803   :  { %v7596_v20 = vpop.eup %7595  ;;  %v6808_v19 = vpack.c.bf16 %v7516_v24, %v7515_v25 }
 0x804   :  { %v825_v29 = vpop.permute.xlu0 %824  ;;  %v736_v32 = vmul.f32 %v7596_v20, %v7592_v8 }
 0x807   :  { %v7598_v23 = vpop.eup %7597 }
 0x808   :  { %v735_v31 = vmul.f32 %v7598_v23, %v7594_v10  ;;  %v827_v21 = vpop.permute.xlu0 %826 }
 0x80a   :  { %6192 = vmatprep.mubr.msk.f32.mxu1 %vm367_vm2, %v735_v31 }
 0x80b   :  { %6193 = vmatmul.mubr.msk.f32.vlgmr.msra.gmra.mrb[6].mxu1 %vm367_vm2, %v736_v32 }
 0x80c   :  { %6803 = vmatpush3.bf16.xpose.msk.msra.mxu1 %vm8761_vm5, %v6798_v7  ;;  %6199 = vmatprep.mubr.msk.f32.mxu1 %vm627_vm4, %v825_v29  ;;  %v1029_v37 = vpop.permute.xlu0 %1028 }
 0x80d   :  { %6810 = vmatprep.subr.msk.bf16.mxu1 %vm8761_vm5, %v6808_v19 }
 0x810   :  { %v1233_v39 = vpop.permute.xlu0 %1232 }
 0x813   :  { %6200 = vmatmul.mubr.msk.f32.vlgmr.msra.gmra.mrb[8].mxu1 %vm627_vm4, %v827_v21 }
 0x814   :  { %6813 = vmatpush3.bf16.xpose.msk.msra.mxu1 %vm8761_vm5, %v6808_v19  ;;  %6213 = vmatprep.mubr.msk.f32.mxu1 %vm627_vm4, %v1029_v37 }
 0x815   :  { %6820 = vmatprep.subr.msk.bf16.mxu1 %vm8761_vm5, %v6818_v36 }
 0x81b   :  { %6214 = vmatmul.mubr.msk.f32.vlgmr.msra.gmra.mrb[10].mxu1 %vm627_vm4, %v1031_v38 }
 0x81c   :  { %6823 = vmatpush3.bf16.xpose.msk.msra.mxu1 %vm8761_vm5, %v6818_v36  ;;  %6227 = vmatprep.mubr.msk.f32.mxu1 %vm627_vm4, %v1233_v39 }
 0x823   :  { %6228 = vmatmul.mubr.msk.f32.vlgmr.msra.gmra.mrb[12].mxu1 %vm627_vm4, %v1235_v40 }
 0x8de   :  { %v8834_v41 = vpop.f32.mrb[6].mxu1 }
 0x8df   :  { %v8836_v42 = vpop.f32.mrb[7].mxu1 }
 0x8e6   :  { %v6201_v27 = vpop.f32.mrb[8].mxu1 }
 0x8e7   :  { %v916_v28 = vmul.f32 0.35355338, %v6201_v27  ;;  %v906_v44 = vpop.f32.mrb[9].mxu1 }
 0x8e8   :  { %v915_v45 = vmul.f32 0.35355338, %v906_v44 }
 0x8e9   :  { %v918_v46 = vadd.f32 %v916_v28, %v8784_v47 }
 0x8ea   :  { %v917_v49 = vadd.f32 %v915_v45, %v8786_v48 }
 0x8eb   :  { %v922_v50 = vsel %vm367_vm2, %v918_v46, -inf }
 0x8ec   :  { %923 = vmax.xlane.f32.xlu1 %v922_v50  ;;  %v919_v51 = vsel %vm367_vm2, %v917_v49, -inf }
 0x8ed   :  { %920 = vmax.xlane.f32.xlu0 %v919_v51 }
 0x8ee   :  { %v6215_v52 = vpop.f32.mrb[10].mxu1 }
 0x8ef   :  { %v1120_v53 = vmul.f32 0.35355338, %v6215_v52  ;;  %v1110_v54 = vpop.f32.mrb[11].mxu1 }
 0x8f0   :  { %v1119_v55 = vmul.f32 0.35355338, %v1110_v54 }
 0x8f1   :  { %v1122_v57 = vadd.f32 %v1120_v53, %v8784_v47 }
 0x8f2   :  { %v1121_v59 = vadd.f32 %v1119_v55, %v8786_v48 }
 0x8f3   :  { %v1126_v58 = vsel %vm367_vm2, %v1122_v57, -inf }
 0x8f4   :  { %1127 = vmax.xlane.f32.xlu0 %v1126_v58  ;;  %v1123_v63 = vsel %vm367_vm2, %v1121_v59, -inf }
 0x8f6   :  { %v6229_v60 = vpop.f32.mrb[12].mxu1 }
 0x8f7   :  { %v1324_v61 = vmul.f32 0.35355338, %v6229_v60  ;;  %v1314_v62 = vpop.f32.mrb[13].mxu1 }
 0x8f8   :  { %v1323_v0 = vmul.f32 0.35355338, %v1314_v62  ;;  %1124 = vmax.xlane.f32.xlu0 %v1123_v63 }
 0x8f9   :  { %v1326_v1 = vadd.f32 %v1324_v61, %v8784_v47 }
 0x8fa   :  { %v1325_v2 = vadd.f32 %v1323_v0, %v8786_v48 }
 0x8fb   :  { %v1330_v3 = vsel %vm367_vm2, %v1326_v1, -inf }
 0x8fc   :  { %1331 = vmax.xlane.f32.xlu0 %v1330_v3  ;;  %v1327_v4 = vsel %vm367_vm2, %v1325_v2, -inf }
 0x8fd   :  { %1328 = vmax.xlane.f32.xlu1 %v1327_v4 }
 0x90e   :  { %7523 = vrot.lane.b32.xlu1 %v8755_v22, %s8310_s9 }
 0x979   :  { %v924_v5 = vpop.xlane.xlu1 %923 }
 0x97a   :  { %v926_v6 = vsub.f32 %v918_v46, %v924_v5  ;;  %v921_v7 = vpop.xlane.xlu0 %920 }
 0x97b   :  { %v925_v8 = vsub.f32 %v917_v49, %v921_v7 }
 0x97c   :  { %v929_v9 = vmul.f32 1.442695, %v926_v6 }
 0x97d   :  { %v927_v10 = vmul.f32 1.442695, %v925_v8 }
 0x97e   :  { %7599 = vpow2.f32 %v929_v9 }
 0x97f   :  { %7601 = vpow2.f32 %v927_v10 }
 0x981   :  { %v1128_v12 = vpop.xlane.xlu0 %1127 }
 0x982   :  { %v1130_v13 = vsub.f32 %v1122_v57, %v1128_v12 }
 0x984   :  { %v1133_v14 = vmul.f32 1.442695, %v1130_v13 }
 0x985   :  { %v1125_v18 = vpop.xlane.xlu0 %1124 }
 0x986   :  { %7603 = vpow2.f32 %v1133_v14  ;;  %v1129_v20 = vsub.f32 %v1121_v59, %v1125_v18  ;;  %v1467_v14 = vld [vmem:[%s10022_s3] sm:$0xff]  ;;  %v1468_v18 = vld [vmem:[%s10022_s3 + $0x8] sm:$0xff] }
 0x988   :  { %v7600_v23 = vpop.eup %7599  ;;  %v1131_v24 = vmul.f32 1.442695, %v1129_v20  ;;  %v8874_v20 = vpack.c.bf16 %v1468_v18, %v1467_v14  ;;  %v8935_v14 = vld [vmem:[#allocation10] ss:$0 sm:$0xff] }
 0x989   :  { %v7602_v25 = vpop.eup %7601  ;;  %v1332_v29 = vpop.xlane.xlu0 %1331  ;;  %v934_v31 = vsel %vm367_vm2, %v7600_v23, 0.0 }
 0x98a   :  { %7605 = vpow2.f32 %v1131_v24  ;;  %v1334_v32 = vsub.f32 %v1326_v1, %v1332_v29  ;;  %v1329_v19 = vpop.xlane.xlu1 %1328  ;;  %935 = vadd.xlane.f32.xlu0 %v934_v31  ;;  %v931_v33 = vsel %vm367_vm2, %v7602_v25, 0.0  ;;  %v1470_v29 = vld [vmem:[%s10022_s3 + $0x18] sm:$0xff] }
 0x98b   :  { %v1333_v21 = vsub.f32 %v1325_v2, %v1329_v19  ;;  %932 = vadd.xlane.f32.xlu1 %v931_v33 }
 0x98c   :  { %v1337_v34 = vmul.f32 1.442695, %v1334_v32 }
 0x98d   :  { %v1335_v35 = vmul.f32 1.442695, %v1333_v21 }
 0x98e   :  { %7607 = vpow2.f32 %v1337_v34  ;;  %v7524_v36 = vpop.permute.xlu1 %7523 }
 0x98f   :  { %7609 = vpow2.f32 %v1335_v35  ;;  %v7526_v37 = vunpack.i.h.bf16 %v7524_v36  ;;  %v7525_v38 = vunpack.i.l.bf16 %v7524_v36 }
 0x990   :  { %v7604_v39 = vpop.eup %7603 }
 0x991   :  { %v1138_v40 = vsel %vm367_vm2, %v7604_v39, 0.0  ;;  %v6804_v27 = vpack.c.bf16 %v7526_v37, %v7525_v38 }
 0x992   :  { %1139 = vadd.xlane.f32.xlu0 %v1138_v40 }
 0x993   :  { %6805 = vmatprep.subr.bf16.mxu0 %v6804_v27 }
 0x994   :  { %v7606_v28 = vpop.eup %7605  ;;  %6807 = vmatpush3.bf16.msra.mxu0 %v6804_v27 }
 0x995   :  { %v1135_v44 = vsel %vm367_vm2, %v7606_v28, 0.0 }
 0x996   :  { %1136 = vadd.xlane.f32.xlu1 %v1135_v44 }
 0x998   :  { %v7608_v45 = vpop.eup %7607 }
 0x999   :  { %v7610_v46 = vpop.eup %7609  ;;  %v1342_v49 = vsel %vm367_vm2, %v7608_v45, 0.0 }
 0x99a   :  { %1343 = vadd.xlane.f32.xlu0 %v1342_v49  ;;  %v1339_v50 = vsel %vm367_vm2, %v7610_v46, 0.0  ;;  %v8904_v49 = vld [vmem:[#allocation8] ss:$0 sm:$0xff] }
 0x99b   :  { %1340 = vadd.xlane.f32.xlu1 %v1339_v50 }
 0x9ac   :  { %7533 = vrot.lane.b32.xlu1 %v8755_v22, %s8311_s24 }
 0x9b0   :  { %7528 = vrot.lane.b32.xlu0 %v8755_v22, %s8312_s29 }
 0xa17   :  { %v936_v51 = vpop.xlane.xlu0 %935 }
 0xa18   :  { %7611 = vrcp.f32 %v936_v51  ;;  %v933_v52 = vpop.xlane.xlu1 %932 }
 0xa19   :  { %7613 = vrcp.f32 %v933_v52 }
 0xa1f   :  { %v1140_v54 = vpop.xlane.xlu0 %1139 }
 0xa22   :  { %v7612_v53 = vpop.eup %7611 }
 0xa23   :  { %v7614_v55 = vpop.eup %7613  ;;  %v1137_v57 = vpop.xlane.xlu1 %1136  ;;  %v940_v59 = vmul.f32 %v7612_v53, %v7600_v23 }
 0xa24   :  { %7615 = vrcp.f32 %v1137_v57  ;;  %v939_v58 = vmul.f32 %v7614_v55, %v7602_v25  ;;  %v1469_v25 = vld [vmem:[%s10022_s3 + $0x10] sm:$0xff] }
 0xa25   :  { %7617 = vrcp.f32 %v1140_v54  ;;  %v8886_v31 = vpack.c.bf16 %v1470_v29, %v1469_v25  ;;  %v8937_v25 = vld [vmem:[#allocation11] ss:$0 sm:$0xff] }
 0xa26   :  { %6206 = vmatprep.mubr.msk.f32.mxu0 %vm367_vm2, %v939_v58 }
 0xa27   :  { %6207 = vmatmul.mubr.msk.f32.vlgmr.msra.gmra.mrb[2].mxu0 %vm367_vm2, %v940_v59  ;;  %v1344_v60 = vpop.xlane.xlu0 %1343 }
 0xa28   :  { %7619 = vrcp.f32 %v1344_v60  ;;  %v1341_v61 = vpop.xlane.xlu1 %1340 }
 0xa29   :  { %7621 = vrcp.f32 %v1341_v61 }
 0xa2b   :  { %v7529_v22 = vpop.permute.xlu0 %7528 }
 0xa2c   :  { %v7531_v62 = vunpack.i.h.bf16 %v7529_v22  ;;  %v7530_v63 = vunpack.i.l.bf16 %v7529_v22  ;;  %v7534_v0 = vpop.permute.xlu1 %7533 }
 0xa2d   :  { %v7536_v1 = vunpack.i.h.bf16 %v7534_v0  ;;  %v7535_v2 = vunpack.i.l.bf16 %v7534_v0 }
 0xa2e   :  { %v7616_v3 = vpop.eup %7615  ;;  %v6814_v4 = vpack.c.bf16 %v7531_v62, %v7530_v63 }
 0xa2f   :  { %v7618_v5 = vpop.eup %7617  ;;  %v1143_v6 = vmul.f32 %v7616_v3, %v7606_v28  ;;  %v6824_v7 = vpack.c.bf16 %v7536_v1, %v7535_v2  ;;  %v1607_v1 = vld [vmem:[%s9976_s15 + $0x8] sm:$0xff]  ;;  %v1608_v3 = vld [vmem:[%s9976_s15 + $0x10] sm:$0xff] }
 0xa30   :  { %6815 = vmatprep.subr.bf16.mxu0 %v6814_v4  ;;  %v1144_v9 = vmul.f32 %v7618_v5, %v7604_v39 }
 0xa31   :  { %6817 = vmatpush3.bf16.msra.mxu0 %v6814_v4  ;;  %6220 = vmatprep.mubr.msk.f32.mxu0 %vm367_vm2, %v1143_v6  ;;  %v1609_v4 = vld [vmem:[%s9976_s15 + $0x18] sm:$0xff] }
 0xa32   :  { %v7620_v8 = vpop.eup %7619  ;;  %6825 = vmatprep.subr.bf16.mxu1 %v6824_v7  ;;  %v8929_v5 = vpack.c.bf16 %v1609_v4, %v1608_v3 }
 0xa33   :  { %v7622_v10 = vpop.eup %7621  ;;  %6827 = vmatpush3.bf16.msra.mxu1 %v6824_v7  ;;  %v1348_v13 = vmul.f32 %v7620_v8, %v7608_v45 }
 0xa34   :  { %6221 = vmatmul.mubr.msk.f32.vlgmr.msra.gmra.mrb[4].mxu0 %vm367_vm2, %v1144_v9  ;;  %v1347_v12 = vmul.f32 %v7622_v10, %v7610_v46  ;;  %6829 = vmatprep.subr.bf16.mxu1 %v8874_v20 }
 0xa36   :  { %6234 = vmatprep.mubr.msk.f32.mxu1 %vm367_vm2, %v1347_v12 }
 0xa37   :  { %6235 = vmatmul.mubr.msk.f32.vlgmr.msra.gmra.mrb[14].mxu1 %vm367_vm2, %v1348_v13 }
 0xa38   :  { %6831 = vmatpush3.bf16.msra.mxu1 %v8874_v20 }
 0xa39   :  { %6833 = vmatprep.subr.bf16.mxu1 %v8886_v31 }
 0xa3c   :  { %6835 = vmatpush3.bf16.msra.mxu1 %v8886_v31 }
 0xafa   :  { %v6208_v23 = vpop.f32.mrb[2].mxu0 }
 0xafb   :  { %1440 = vrot.lane.b32.xlu0 %v6208_v23, %s8313_s11  ;;  %v1019_v24 = vpop.f32.mrb[3].mxu0 }
 0xafc   :  { %1438 = vrot.lane.b32.xlu1 %v1019_v24, %s8313_s11 }
 0xb07   :  { %v6222_v32 = vpop.f32.mrb[4].mxu0 }
 0xb08   :  { %1448 = vrot.lane.b32.xlu0 %v6222_v32, %s8314_s0  ;;  %v1223_v19 = vpop.f32.mrb[5].mxu0 }
 0xb09   :  { %1446 = vrot.lane.b32.xlu1 %v1223_v19, %s8314_s0 }
 0xb0a   :  { %v6236_v33 = vpop.f32.mrb[14].mxu1 }
 0xb0b   :  { %v1427_v21 = vpop.f32.mrb[15].mxu1 }
 0xb0c   :  { %1456 = vrot.lane.b32.xlu0 %v6236_v33, %s8290_s12 }
 0xb0d   :  { %1454 = vrot.lane.b32.xlu1 %v1427_v21, %s8290_s12  ;;  %v1716_v21 = vld [vmem:[%s9978_s17] sm:$0xff] }
 0xb6d   :  { %v1441_v34 = vpop.permute.xlu0 %1440 }
 0xb6e   :  { %v1439_v35 = vpop.permute.xlu1 %1438  ;;  %v1461_v40 = vsel %vm627_vm4, %v8834_v41, %v1441_v34  ;;  %v1717_v34 = vld [vmem:[%s9978_s17 + $0x8] sm:$0xff] }
 0xb6f   :  { %v1460_v38 = vsel %vm627_vm4, %v8836_v42, %v1439_v35  ;;  %v8960_v35 = vpack.c.bf16 %v1717_v34, %v1716_v21 }
 0xb71   :  { %6845 = vmatprep.subr.bf16.mxu1 %v8960_v35 }
 0xb7a   :  { %v1449_v36 = vpop.permute.xlu0 %1448 }
 0xb7b   :  { %v1447_v37 = vpop.permute.xlu1 %1446  ;;  %v1463_v44 = vsel %vm367_vm2, %v1461_v40, %v1449_v36  ;;  %v1722_v40 = vld [vmem:[%s9978_s17 + $0x30] sm:$0xff] }
 0xb7c   :  { %v1462_v27 = vsel %vm367_vm2, %v1460_v38, %v1447_v37  ;;  %v1720_v37 = vld [vmem:[%s9978_s17 + $0x20] sm:$0xff]  ;;  %v1721_v38 = vld [vmem:[%s9978_s17 + $0x28] sm:$0xff] }
 0xb7e   :  { %v1457_v39 = vpop.permute.xlu0 %1456 }
 0xb7f   :  { %v1455_v28 = vpop.permute.xlu1 %1454  ;;  %v1466_v46 = vsel %vm1464_vm8, %v1463_v44, %v1457_v39  ;;  %v8980_v39 = vpack.c.bf16 %v1721_v38, %v1720_v37  ;;  %v1724_v44 = vld [vmem:[%s9978_s17 + $0x40] sm:$0xff] }
 0xb80   :  { %v1465_v45 = vsel %vm1464_vm8, %v1462_v27, %v1455_v28  ;;  %v1723_v27 = vld [vmem:[%s9978_s17 + $0x38] sm:$0xff] }
 0xb81   :  { %6245 = vmatprep.mubr.msk.f32.mxu1 %vm539_vm3, %v1465_v45  ;;  %v8990_v28 = vpack.c.bf16 %v1723_v27, %v1722_v40  ;;  %v1725_v45 = vld [vmem:[%s9978_s17 + $0x48] sm:$0xff] }
 0xb82   :  { %6246 = vmatmul.mubr.msk.f32.vlgmr.msra.gmra.mrb[16].mxu1 %vm539_vm3, %v1466_v46  ;;  %v1726_v46 = vld [vmem:[%s9978_s17 + $0x50] sm:$0xff] }
 0xb83   :  { %6847 = vmatpush3.bf16.msra.mxu1 %v8960_v35 }
 0xc55   :  { %v6247_v42 = vpop.f32.mrb[16].mxu1 }
 0xc56   :  { %v1556_v50 = vadd.f32 %v6247_v42, %v8904_v49  ;;  %v1550_v51 = vpop.f32.mrb[17].mxu1  ;;  %v9003_v42 = vpack.c.bf16 %v1725_v45, %v1724_v44 }
 0xc57   :  { %v1551_v41 = vadd.f32 %v8904_v49, %v1550_v51 }
 0xc58   :  { %v1560_v52 = vadd.f32 %v1556_v50, %v8737_v16  ;;  %v1727_v50 = vld [vmem:[%s9978_s17 + $0x58] sm:$0xff] }
 0xc59   :  { %v1559_v53 = vadd.f32 %v1551_v41, %v8735_v15  ;;  %v1606_v15 = vld [vmem:[%s9976_s15] sm:$0xff]  ;;  %v9008_v51 = vpack.c.bf16 %v1727_v50, %v1726_v46 }
 0xc5a   :  { %v1566_v54 = vsel %vm539_vm3, %v1560_v52, 0.0  ;;  %v8920_v2 = vpack.c.bf16 %v1607_v1, %v1606_v15  ;;  %v1728_v41 = vld [vmem:[%s9978_s17 + $0x60] sm:$0xff] }
 0xc5b   :  { %1567 = vadd.xlane.f32.xlu0 %v1566_v54  ;;  %v1563_v55 = vsel %vm539_vm3, %v1559_v53, 0.0  ;;  %v1730_v54 = vld [vmem:[%s9978_s17 + $0x70] sm:$0xff] }
 0xc5c   :  { %1564 = vadd.xlane.f32.xlu1 %v1563_v55  ;;  %6837 = vmatprep.subr.bf16.mxu0 %v8920_v2  ;;  %v1731_v55 = vld [vmem:[%s9978_s17 + $0x78] sm:$0xff] }
 0xc5d   :  { %6839 = vmatpush3.bf16.msra.mxu0 %v8920_v2 }
 0xc5e   :  { %6841 = vmatprep.subr.bf16.mxu0 %v8929_v5 }
 0xc61   :  { %6843 = vmatpush3.bf16.msra.mxu0 %v8929_v5 }
 0xc62   :  { %6877 = vmatprep.subr.bf16.mxu0 %v8716_v56 }
 0xce8   :  { %v1568_v57 = vpop.xlane.xlu0 %1567 }
 0xce9   :  { %v1571_v58 = vmul.f32 0.03125, %v1568_v57  ;;  %v1565_v59 = vpop.xlane.xlu1 %1564  ;;  %v9029_v57 = vpack.c.bf16 %v1731_v55, %v1730_v54 }
 0xcea   :  { %v1570_v60 = vmul.f32 0.03125, %v1565_v59 }
 0xceb   :  { %v1573_v61 = vsub.f32 %v1560_v52, %v1571_v58  ;;  %v1729_v52 = vld [vmem:[%s9978_s17 + $0x68] sm:$0xff] }
 0xcec   :  { %v1572_v22 = vsub.f32 %v1559_v53, %v1570_v60  ;;  %v9019_v53 = vpack.c.bf16 %v1729_v52, %v1728_v41  ;;  %v9034_v58 = vld [vmem:[#allocation13] ss:$0 sm:$0xff] }
 0xced   :  { %v1575_v62 = vmul.f32 %v1573_v61, %v1573_v61 }
 0xcee   :  { %v1574_v63 = vmul.f32 %v1572_v22, %v1572_v22 }
 0xcef   :  { %v1579_v0 = vsel %vm539_vm3, %v1575_v62, 0.0 }
 0xcf0   :  { %1580 = vadd.xlane.f32.xlu1 %v1579_v0  ;;  %v1576_v16 = vsel %vm539_vm3, %v1574_v63, 0.0 }
 0xcf1   :  { %1577 = vadd.xlane.f32.xlu0 %v1576_v16 }
 0xd7d   :  { %v1581_v6 = vpop.xlane.xlu1 %1580 }
 0xd7e   :  { %v1583_v7 = vmul.f32 0.03125, %v1581_v6  ;;  %v1578_v8 = vpop.xlane.xlu0 %1577 }
 0xd7f   :  { %v1582_v9 = vmul.f32 0.03125, %v1578_v8 }
 0xd80   :  { %v1585_v10 = vadd.f32 1e-12, %v1583_v7 }
 0xd81   :  { %v1584_v12 = vadd.f32 1e-12, %v1582_v9 }
 0xd82   :  { %7623 = vrsqrt.f32 %v1585_v10 }
 0xd83   :  { %7625 = vrsqrt.f32 %v1584_v12 }
 0xd8c   :  { %v7624_v13 = vpop.eup %7623 }
 0xd8d   :  { %v7626_v18 = vpop.eup %7625  ;;  %v1589_v23 = vmul.f32 %v7624_v13, %v1573_v61 }
 0xd8e   :  { %v1588_v24 = vmul.f32 %v7626_v18, %v1572_v22 }
 0xd8f   :  { %v1597_v29 = vmul.f32 %v8935_v14, %v1589_v23 }
 0xd90   :  { %v1596_v32 = vmul.f32 %v8935_v14, %v1588_v24 }
 0xd91   :  { %v8945_v33 = vadd.f32 %v8937_v25, %v1597_v29  ;;  %v9038_v29 = vld [vmem:[#allocation14] ss:$0 sm:$0xff] }
 0xd92   :  { %v8942_v19 = vadd.f32 %v8937_v25, %v1596_v32 }
 0xd94   :  { %6256 = vmatprep.mubr.msk.f32.mxu0 %vm539_vm3, %v8942_v19 }
 0xd95   :  { %6257 = vmatmul.mubr.msk.f32.vlgmr.msra.gmra.mrb[6].mxu0 %vm539_vm3, %v8945_v33 }
 0xd96   :  { %6879 = vmatpush3.bf16.msra.mxu0 %v8716_v56  ;;  %v1718_v56 = vld [vmem:[%s9978_s17 + $0x10] sm:$0xff] }
 0xd97   :  { %6881 = vmatprep.subr.bf16.mxu0 %v8731_v11 }
 0xd9a   :  { %6883 = vmatpush3.bf16.msra.mxu0 %v8731_v11  ;;  %v1719_v11 = vld [vmem:[%s9978_s17 + $0x18] sm:$0xff] }
 0xd9b   :  { %v8970_v36 = vpack.c.bf16 %v1719_v11, %v1718_v56 }
 0xd9d   :  { %6849 = vmatprep.subr.bf16.mxu1 %v8970_v36 }
 0xd9e   :  { %6851 = vmatpush3.bf16.msra.mxu1 %v8970_v36 }
 0xd9f   :  { %6853 = vmatprep.subr.bf16.mxu1 %v8980_v39 }
 0xda2   :  { %6855 = vmatpush3.bf16.msra.mxu1 %v8980_v39 }
 0xda3   :  { %6857 = vmatprep.subr.bf16.mxu1 %v8990_v28 }
 0xda6   :  { %6859 = vmatpush3.bf16.msra.mxu1 %v8990_v28 }
 0xda7   :  { %6861 = vmatprep.subr.bf16.mxu1 %v9003_v42 }
 0xdaa   :  { %6863 = vmatpush3.bf16.msra.mxu1 %v9003_v42 }
 0xdab   :  { %6865 = vmatprep.subr.bf16.mxu1 %v9008_v51 }
 0xdae   :  { %6867 = vmatpush3.bf16.msra.mxu1 %v9008_v51 }
 0xdaf   :  { %6869 = vmatprep.subr.bf16.mxu1 %v9019_v53 }
 0xdb2   :  { %6871 = vmatpush3.bf16.msra.mxu1 %v9019_v53 }
 0xdb3   :  { %6873 = vmatprep.subr.bf16.mxu1 %v9029_v57 }
 0xdb6   :  { %6875 = vmatpush3.bf16.msra.mxu1 %v9029_v57 }
 0xe68   :  { %v6258_v59 = vpop.f32.mrb[6].mxu0 }
 0xe69   :  { %v1695_v60 = vadd.f32 %v6258_v59, %v9034_v58  ;;  %v1689_v61 = vpop.f32.mrb[7].mxu0 }
 0xe6a   :  { %v1690_v22 = vadd.f32 %v9034_v58, %v1689_v61 }
 0xe6b   :  { %v1699_v62 = vmul.f32 %v1695_v60, %v1695_v60 }
 0xe6c   :  { %v1698_v63 = vmul.f32 %v1690_v22, %v1690_v22 }
 0xe6d   :  { %v1701_v0 = vmul.f32 %v1699_v62, %v1695_v60 }
 0xe6e   :  { %v1700_v16 = vmul.f32 %v1698_v63, %v1690_v22 }
 0xe6f   :  { %v1703_v15 = vmul.f32 0.044715, %v1701_v0  ;;  %v9048_v0 = vld [vmem:[#allocation16] ss:$0 sm:$0xff] }
 0xe70   :  { %v1702_v1 = vmul.f32 0.044715, %v1700_v16 }
 0xe71   :  { %v1705_v3 = vadd.f32 %v1703_v15, %v1695_v60 }
 0xe72   :  { %v1704_v4 = vadd.f32 %v1702_v1, %v1690_v22 }
 0xe73   :  { %v1707_v6 = vmul.f32 0.7978846, %v1705_v3  ;;  %v9050_v3 = vld [vmem:[#allocation17] ss:$0 sm:$0xff] }
 0xe74   :  { %v1706_v7 = vmul.f32 0.7978846, %v1704_v4 }
 0xe75   :  { %7627 = vtanh.f32 %v1707_v6 }
 0xe76   :  { %7629 = vtanh.f32 %v1706_v7 }
 0xe7f   :  { %v7628_v8 = vpop.eup %7627 }
 0xe80   :  { %v7630_v9 = vpop.eup %7629  ;;  %v1711_v10 = vadd.f32 1.0, %v7628_v8 }
 0xe81   :  { %v1710_v12 = vadd.f32 1.0, %v7630_v9 }
 0xe82   :  { %v1713_v13 = vmul.f32 0.5, %v1711_v10 }
 0xe83   :  { %v1712_v18 = vmul.f32 0.5, %v1710_v12 }
 0xe84   :  { %v1715_v24 = vmul.f32 %v1713_v13, %v1695_v60 }
 0xe85   :  { %v1714_v23 = vmul.f32 %v1712_v18, %v1690_v22 }
 0xe87   :  { %6291 = vmatprep.mubr.f32.mxu1 %v1714_v23 }
 0xe88   :  { %6292 = vmatmul.mubr.f32.vlgmr.msra.gmra.mrb[18].mxu1 %v1715_v24 }
 0xf5b   :  { %v6293_v32 = vpop.f32.mrb[18].mxu1 }
 0xf5c   :  { %v1811_v21 = vadd.f32 %v6293_v32, %v9038_v29  ;;  %v1805_v34 = vpop.f32.mrb[19].mxu1 }
 0xf5d   :  { %v1806_v56 = vadd.f32 %v9038_v29, %v1805_v34 }
 0xf5e   :  { %v1815_v11 = vadd.f32 %v1811_v21, %v8945_v33 }
 0xf5f   :  { %v1814_v37 = vadd.f32 %v1806_v56, %v8942_v19 }
 0xf60   :  { %v1821_v38 = vsel %vm539_vm3, %v1815_v11, 0.0 }
 0xf61   :  { %1822 = vadd.xlane.f32.xlu1 %v1821_v38  ;;  %v1818_v40 = vsel %vm539_vm3, %v1814_v37, 0.0 }
 0xf62   :  { %1819 = vadd.xlane.f32.xlu0 %v1818_v40 }
 0xfee   :  { %v1823_v27 = vpop.xlane.xlu1 %1822 }
 0xfef   :  { %v1825_v44 = vmul.f32 0.03125, %v1823_v27  ;;  %v1820_v45 = vpop.xlane.xlu0 %1819 }
 0xff0   :  { %v1824_v46 = vmul.f32 0.03125, %v1820_v45 }
 0xff1   :  { %v1827_v50 = vsub.f32 %v1815_v11, %v1825_v44 }
 0xff2   :  { %v1826_v41 = vsub.f32 %v1814_v37, %v1824_v46 }
 0xff3   :  { %v1829_v52 = vmul.f32 %v1827_v50, %v1827_v50 }
 0xff4   :  { %v1828_v54 = vmul.f32 %v1826_v41, %v1826_v41 }
 0xff5   :  { %v1833_v55 = vsel %vm539_vm3, %v1829_v52, 0.0 }
 0xff6   :  { %1834 = vadd.xlane.f32.xlu1 %v1833_v55  ;;  %v1830_v33 = vsel %vm539_vm3, %v1828_v54, 0.0 }
 0xff7   :  { %1831 = vadd.xlane.f32.xlu0 %v1830_v33 }
0x1083   :  { %v1835_v19 = vpop.xlane.xlu1 %1834 }
0x1084   :  { %v1837_v59 = vmul.f32 0.03125, %v1835_v19  ;;  %v1832_v60 = vpop.xlane.xlu0 %1831 }
0x1085   :  { %v1836_v61 = vmul.f32 0.03125, %v1832_v60 }
0x1086   :  { %v1839_v22 = vadd.f32 1e-12, %v1837_v59 }
0x1087   :  { %v1838_v62 = vadd.f32 1e-12, %v1836_v61 }
0x1088   :  { %7631 = vrsqrt.f32 %v1839_v22 }
0x1089   :  { %7633 = vrsqrt.f32 %v1838_v62 }
0x1092   :  { %v7632_v63 = vpop.eup %7631 }
0x1093   :  { %v7634_v16 = vpop.eup %7633  ;;  %v1843_v15 = vmul.f32 %v7632_v63, %v1827_v50 }
0x1094   :  { %v1842_v1 = vmul.f32 %v7634_v16, %v1826_v41 }
0x1095   :  { %v1851_v4 = vmul.f32 %v9048_v0, %v1843_v15 }
0x1096   :  { %v1850_v6 = vmul.f32 %v9048_v0, %v1842_v1 }
0x1097   :  { %v9058_v8 = vadd.f32 %v9050_v3, %v1851_v4 }
0x1098   :  { %v9055_v7 = vadd.f32 %v9050_v3, %v1850_v6 }
0x109a   :  { %6302 = vmatprep.mubr.msk.f32.mxu0 %vm539_vm3, %v9055_v7 }
0x109b   :  { %6303 = vmatmul.mubr.msk.f32.vlgmr.msra.gmra.mrb[8].mxu0 %vm539_vm3, %v9058_v8 }
0x116e   :  { %v6304_v9 = vpop.f32.mrb[8].mxu0 }
0x116f   :  { %v9065_v10 = vadd.f32 %v6304_v9, %v8743_v17  ;;  %v1932_v12 = vpop.f32.mrb[9].mxu0 }
0x1170   :  { %v9068_v13 = vadd.f32 %v8743_v17, %v1932_v12 }
0x1172   :  { %6309 = vmatprep.mubr.msk.f32.mxu0 %vm627_vm4, %v9068_v13  ;;  %v9074_v18 = vpack.i.bf16 %v9065_v10, %v9068_v13 }
0x1174   :  { %7538 = vrot.lane.b32.xlu0 %v9074_v18, %s8301_s28 }
0x1178   :  { %7548 = vrot.lane.b32.xlu0 %v9074_v18, %s8303_s13 }
0x117c   :  { %2143 = vrot.lane.b32.xlu0 %v9068_v13, %s8309_s5 }
0x1180   :  { %7553 = vrot.lane.b32.xlu0 %v9074_v18, %s8308_s19 }
0x1184   :  { %2145 = vrot.lane.b32.xlu0 %v9065_v10, %s8309_s5 }
0x1188   :  { %2349 = vrot.lane.b32.xlu0 %v9065_v10, %s8306_s18 }
0x11e6   :  { %v7539_v17 = vpop.permute.xlu0 %7538 }
0x11e7   :  { %v7541_v23 = vunpack.i.h.bf16 %v7539_v17  ;;  %v7540_v24 = vunpack.i.l.bf16 %v7539_v17 }
0x11e9   :  { %v6884_v32 = vpack.c.bf16 %v7541_v23, %v7540_v24 }
0x11ea   :  { %v7549_v21 = vpop.permute.xlu0 %7548 }
0x11eb   :  { %6886 = vmatprep.subr.msk.bf16.mxu0 %vm8761_vm5, %v6884_v32  ;;  %v7551_v6 = vunpack.i.h.bf16 %v7549_v21  ;;  %v7550_v9 = vunpack.i.l.bf16 %v7549_v21 }
0x11ec   :  { %6889 = vmatpush3.bf16.xpose.msk.msra.mxu0 %vm8761_vm5, %v6884_v32 }
0x11ed   :  { %v6894_v32 = vpack.c.bf16 %v7551_v6, %v7550_v9 }
0x11ee   :  { %v2144_v34 = vpop.permute.xlu0 %2143 }
0x11f2   :  { %v7554_v56 = vpop.permute.xlu0 %7553 }
0x11f3   :  { %v7556_v11 = vunpack.i.h.bf16 %v7554_v56  ;;  %v7555_v37 = vunpack.i.l.bf16 %v7554_v56  ;;  %6310 = vmatmul.mubr.msk.f32.vlgmr.msra.gmra.mrb[10].mxu0 %vm627_vm4, %v9065_v10 }
0x11f5   :  { %v6904_v38 = vpack.c.bf16 %v7556_v11, %v7555_v37 }
0x11f6   :  { %v2146_v1 = vpop.permute.xlu0 %2145 }
0x11f7   :  { %6906 = vmatprep.subr.msk.bf16.mxu1 %vm8761_vm5, %v6904_v38 }
0x11f8   :  { %6909 = vmatpush3.bf16.xpose.msk.msra.mxu1 %vm8761_vm5, %v6904_v38 }
0x11fa   :  { %v2350_v56 = vpop.permute.xlu0 %2349 }
0x12c6   :  { %v6311_v40 = vpop.f32.mrb[10].mxu0 }
0x12c7   :  { %v2021_v27 = vpop.f32.mrb[11].mxu0  ;;  %v2031_v44 = vmul.f32 0.35355338, %v6311_v40 }
0x12c8   :  { %v2030_v45 = vmul.f32 0.35355338, %v2021_v27 }
0x12c9   :  { %v2033_v41 = vadd.f32 %v2031_v44, %v8784_v47 }
0x12ca   :  { %v2032_v46 = vadd.f32 %v2030_v45, %v8786_v48 }
0x12cb   :  { %v2037_v52 = vsel %vm367_vm2, %v2033_v41, -inf }
0x12cc   :  { %v2034_v50 = vsel %vm367_vm2, %v2032_v46, -inf }
0x12cd   :  { %2035 = vmax.xlane.f32.xlu1 %v2034_v50 }
0x12d1   :  { %2038 = vmax.xlane.f32.xlu1 %v2037_v52 }
0x135a   :  { %v2036_v54 = vpop.xlane.xlu1 %2035 }
0x135b   :  { %v2040_v55 = vsub.f32 %v2032_v46, %v2036_v54 }
0x135d   :  { %v2042_v59 = vmul.f32 1.442695, %v2040_v55 }
0x135e   :  { %v2039_v33 = vpop.xlane.xlu1 %2038 }
0x135f   :  { %v2041_v19 = vsub.f32 %v2033_v41, %v2039_v33 }
0x1361   :  { %v2044_v60 = vmul.f32 1.442695, %v2041_v19 }
0x1363   :  { %7635 = vpow2.f32 %v2044_v60 }
0x1364   :  { %7637 = vpow2.f32 %v2042_v59 }
0x136d   :  { %v7636_v61 = vpop.eup %7635 }
0x136e   :  { %v2049_v22 = vsel %vm367_vm2, %v7636_v61, 0.0  ;;  %v7638_v62 = vpop.eup %7637 }
0x136f   :  { %2050 = vadd.xlane.f32.xlu1 %v2049_v22  ;;  %v2046_v63 = vsel %vm367_vm2, %v7638_v62, 0.0 }
0x1373   :  { %2047 = vadd.xlane.f32.xlu1 %v2046_v63 }
0x1384   :  { %7543 = vrot.lane.b32.xlu1 %v9074_v18, %s8304_s4 }
0x1388   :  { %2347 = vrot.lane.b32.xlu1 %v9068_v13, %s8306_s18 }
0x13fc   :  { %v2051_v16 = vpop.xlane.xlu1 %2050 }
0x13fd   :  { %7639 = vrcp.f32 %v2051_v16 }
0x1400   :  { %v2048_v15 = vpop.xlane.xlu1 %2047 }
0x1401   :  { %7641 = vrcp.f32 %v2048_v15 }
0x1404   :  { %v7544_v4 = vpop.permute.xlu1 %7543 }
0x1405   :  { %v7546_v12 = vunpack.i.h.bf16 %v7544_v4  ;;  %v7545_v17 = vunpack.i.l.bf16 %v7544_v4 }
0x1407   :  { %v6890_v23 = vpack.c.bf16 %v7546_v12, %v7545_v17  ;;  %v7640_v11 = vpop.eup %7639 }
0x1408   :  { %v2348_v24 = vpop.permute.xlu1 %2347  ;;  %v2055_v40 = vmul.f32 %v7640_v11, %v7636_v61 }
0x1409   :  { %6891 = vmatprep.subr.bf16.mxu0 %v6890_v23  ;;  %6337 = vmatprep.mubr.msk.f32.mxu1 %vm627_vm4, %v2348_v24 }
0x140a   :  { %6893 = vmatpush3.bf16.msra.mxu0 %v6890_v23  ;;  %6338 = vmatmul.mubr.msk.f32.vlgmr.msra.gmra.mrb[20].mxu1 %vm627_vm4, %v2350_v56 }
0x140b   :  { %v7642_v37 = vpop.eup %7641  ;;  %6896 = vmatprep.subr.msk.bf16.mxu0 %vm8761_vm5, %v6894_v32 }
0x140c   :  { %v2054_v38 = vmul.f32 %v7642_v37, %v7638_v62 }
0x140e   :  { %6316 = vmatprep.mubr.msk.f32.mxu0 %vm367_vm2, %v2054_v38 }
0x140f   :  { %6317 = vmatmul.mubr.msk.f32.vlgmr.msra.gmra.mrb[12].mxu0 %vm367_vm2, %v2055_v40 }
0x1410   :  { %6323 = vmatprep.mubr.msk.f32.mxu0 %vm627_vm4, %v2144_v34 }
0x1413   :  { %6899 = vmatpush3.bf16.xpose.msk.msra.mxu0 %vm8761_vm5, %v6894_v32 }
0x141a   :  { %6324 = vmatmul.mubr.msk.f32.vlgmr.msra.gmra.mrb[14].mxu0 %vm627_vm4, %v2146_v1 }
0x14dd   :  { %v6339_v21 = vpop.f32.mrb[20].mxu1 }
0x14de   :  { %v2429_v27 = vpop.f32.mrb[21].mxu1  ;;  %v2439_v54 = vmul.f32 0.35355338, %v6339_v21 }
0x14df   :  { %v2438_v50 = vmul.f32 0.35355338, %v2429_v27 }
0x14e0   :  { %v2441_v61 = vadd.f32 %v2439_v54, %v8784_v47 }
0x14e1   :  { %v2440_v59 = vadd.f32 %v2438_v50, %v8786_v48 }
0x14e2   :  { %v9118_v44 = vpop.f32.mrb[12].mxu0  ;;  %v2445_v62 = vsel %vm367_vm2, %v2441_v61, -inf }
0x14e3   :  { %v9120_v45 = vpop.f32.mrb[13].mxu0  ;;  %v2442_v22 = vsel %vm367_vm2, %v2440_v59, -inf }
0x14ed   :  { %v6325_v46 = vpop.f32.mrb[14].mxu0 }
0x14ee   :  { %v2235_v41 = vmul.f32 0.35355338, %v6325_v46  ;;  %v2225_v52 = vpop.f32.mrb[15].mxu0 }
0x14ef   :  { %v2234_v55 = vmul.f32 0.35355338, %v2225_v52 }
0x14f0   :  { %v2237_v33 = vadd.f32 %v2235_v41, %v8784_v47 }
0x14f1   :  { %v2236_v34 = vadd.f32 %v2234_v55, %v8786_v48 }
0x14f2   :  { %v2241_v19 = vsel %vm367_vm2, %v2237_v33, -inf }
0x14f3   :  { %2242 = vmax.xlane.f32.xlu0 %v2241_v19  ;;  %v2238_v60 = vsel %vm367_vm2, %v2236_v34, -inf }
0x14f4   :  { %2239 = vmax.xlane.f32.xlu1 %v2238_v60 }
0x14f7   :  { %2443 = vmax.xlane.f32.xlu0 %v2442_v22 }
0x14f8   :  { %2446 = vmax.xlane.f32.xlu1 %v2445_v62 }
0x1580   :  { %v2243_v63 = vpop.xlane.xlu0 %2242 }
0x1581   :  { %v2240_v16 = vpop.xlane.xlu1 %2239  ;;  %v2245_v1 = vsub.f32 %v2237_v33, %v2243_v63 }
0x1582   :  { %v2244_v15 = vsub.f32 %v2236_v34, %v2240_v16 }
0x1583   :  { %v2248_v24 = vmul.f32 1.442695, %v2245_v1 }
0x1584   :  { %v2444_v4 = vpop.xlane.xlu0 %2443  ;;  %v2246_v17 = vmul.f32 1.442695, %v2244_v15 }
0x1585   :  { %v2448_v6 = vsub.f32 %v2440_v59, %v2444_v4  ;;  %v2447_v9 = vpop.xlane.xlu1 %2446 }
0x1586   :  { %v2449_v12 = vsub.f32 %v2441_v61, %v2447_v9 }
0x1587   :  { %v2450_v23 = vmul.f32 1.442695, %v2448_v6 }
0x1588   :  { %v2452_v32 = vmul.f32 1.442695, %v2449_v12 }
0x1589   :  { %7643 = vpow2.f32 %v2450_v23 }
0x158a   :  { %7645 = vpow2.f32 %v2452_v32 }
0x158b   :  { %7647 = vpow2.f32 %v2246_v17 }
0x158c   :  { %7649 = vpow2.f32 %v2248_v24 }
0x1593   :  { %v7644_v56 = vpop.eup %7643 }
0x1594   :  { %v7646_v11 = vpop.eup %7645  ;;  %v2454_v37 = vsel %vm367_vm2, %v7644_v56, 0.0 }
0x1595   :  { %v7648_v38 = vpop.eup %7647  ;;  %2455 = vadd.xlane.f32.xlu0 %v2454_v37  ;;  %v2457_v40 = vsel %vm367_vm2, %v7646_v11, 0.0 }
0x1596   :  { %v7650_v21 = vpop.eup %7649  ;;  %2458 = vadd.xlane.f32.xlu1 %v2457_v40  ;;  %v2250_v27 = vsel %vm367_vm2, %v7648_v38, 0.0 }
0x1597   :  { %v2253_v46 = vsel %vm367_vm2, %v7650_v21, 0.0 }
0x1599   :  { %2251 = vadd.xlane.f32.xlu0 %v2250_v27 }
0x159a   :  { %2254 = vadd.xlane.f32.xlu1 %v2253_v46 }
0x15ab   :  { %7563 = vrot.lane.b32.xlu1 %v9074_v18, %s8312_s29 }
0x15af   :  { %7558 = vrot.lane.b32.xlu0 %v9074_v18, %s8310_s9  ;;  %7568 = vrot.lane.b32.xlu1 %v9074_v18, %s8305_s7 }
0x15b3   :  { %2551 = vrot.lane.b32.xlu0 %v9068_v13, %s8307_s8  ;;  %2553 = vrot.lane.b32.xlu1 %v9065_v10, %s8307_s8 }
0x1622   :  { %v2456_v50 = vpop.xlane.xlu0 %2455 }
0x1623   :  { %v2459_v41 = vpop.xlane.xlu1 %2458  ;;  %7651 = vrcp.f32 %v2456_v50 }
0x1626   :  { %v2252_v52 = vpop.xlane.xlu0 %2251 }
0x1627   :  { %7653 = vrcp.f32 %v2252_v52  ;;  %v2255_v54 = vpop.xlane.xlu1 %2254 }
0x1628   :  { %7655 = vrcp.f32 %v2255_v54 }
0x1629   :  { %7657 = vrcp.f32 %v2459_v41 }
0x162a   :  { %v7559_v55 = vpop.permute.xlu0 %7558 }
0x162b   :  { %v7561_v33 = vunpack.i.h.bf16 %v7559_v55  ;;  %v7560_v34 = vunpack.i.l.bf16 %v7559_v55  ;;  %v7564_v19 = vpop.permute.xlu1 %7563 }
0x162c   :  { %v7566_v59 = vunpack.i.h.bf16 %v7564_v19  ;;  %v7565_v60 = vunpack.i.l.bf16 %v7564_v19 }
0x162d   :  { %v6900_v61 = vpack.c.bf16 %v7561_v33, %v7560_v34  ;;  %v7652_v62 = vpop.eup %7651 }
0x162e   :  { %v6910_v22 = vpack.c.bf16 %v7566_v59, %v7565_v60  ;;  %v2462_v9 = vmul.f32 %v7652_v62, %v7644_v56  ;;  %v2552_v23 = vpop.permute.xlu0 %2551 }
0x162f   :  { %6901 = vmatprep.subr.bf16.mxu0 %v6900_v61  ;;  %v7569_v13 = vpop.permute.xlu1 %7568 }
0x1630   :  { %6903 = vmatpush3.bf16.msra.mxu0 %v6900_v61  ;;  %v7571_v63 = vunpack.i.h.bf16 %v7569_v13  ;;  %v7570_v16 = vunpack.i.l.bf16 %v7569_v13 }
0x1631   :  { %v7654_v10 = vpop.eup %7653  ;;  %6911 = vmatprep.subr.bf16.mxu0 %v6910_v22 }
0x1632   :  { %v7656_v15 = vpop.eup %7655  ;;  %v2258_v1 = vmul.f32 %v7654_v10, %v7648_v38  ;;  %v6914_v12 = vpack.c.bf16 %v7571_v63, %v7570_v16 }
0x1633   :  { %v2259_v4 = vmul.f32 %v7656_v15, %v7650_v21  ;;  %v7658_v6 = vpop.eup %7657  ;;  %v2554_v24 = vpop.permute.xlu1 %2553 }
0x1634   :  { %6330 = vmatprep.mubr.msk.f32.mxu0 %vm367_vm2, %v2258_v1  ;;  %v2463_v17 = vmul.f32 %v7658_v6, %v7646_v11 }
0x1635   :  { %6331 = vmatmul.mubr.msk.f32.vlgmr.msra.gmra.mrb[16].mxu0 %vm367_vm2, %v2259_v4 }
0x1636   :  { %6913 = vmatpush3.bf16.msra.mxu0 %v6910_v22  ;;  %6344 = vmatprep.mubr.msk.f32.mxu0 %vm367_vm2, %v2462_v9 }
0x1637   :  { %6916 = vmatprep.subr.msk.bf16.mxu0 %vm8761_vm5, %v6914_v12 }
0x1639   :  { %6345 = vmatmul.mubr.msk.f32.vlgmr.msra.gmra.mrb[18].mxu0 %vm367_vm2, %v2463_v17 }
0x163a   :  { %6351 = vmatprep.mubr.msk.f32.mxu0 %vm627_vm4, %v2552_v23 }
0x163f   :  { %6919 = vmatpush3.bf16.xpose.msk.msra.mxu0 %vm8761_vm5, %v6914_v12 }
0x1640   :  { %6933 = vmatprep.subr.bf16.mxu0 %v8920_v2 }
0x1646   :  { %6352 = vmatmul.mubr.msk.f32.vlgmr.msra.gmra.mrb[20].mxu0 %vm627_vm4, %v2554_v24 }
0x1647   :  { %6935 = vmatpush3.bf16.msra.mxu0 %v8920_v2 }
0x1648   :  { %6937 = vmatprep.subr.bf16.mxu0 %v8929_v5 }
0x164b   :  { %6939 = vmatpush3.bf16.msra.mxu0 %v8929_v5 }
0x1708   :  { %v6332_v32 = vpop.f32.mrb[16].mxu0 }
0x1709   :  { %v2338_v56 = vpop.f32.mrb[17].mxu0 }
0x170c   :  { %v6346_v11 = vpop.f32.mrb[18].mxu0 }
0x170d   :  { %v2542_v37 = vpop.f32.mrb[19].mxu0 }
0x1719   :  { %v6353_v38 = vpop.f32.mrb[20].mxu0 }
0x171a   :  { %v2643_v40 = vmul.f32 0.35355338, %v6353_v38  ;;  %v2633_v21 = vpop.f32.mrb[21].mxu0 }
0x171b   :  { %v2642_v26 = vmul.f32 0.35355338, %v2633_v21 }
0x171c   :  { %v2645_v27 = vadd.f32 %v2643_v40, %v8784_v47 }
0x171d   :  { %v2644_v46 = vadd.f32 %v2642_v26, %v8786_v48 }
0x171e   :  { %v2649_v50 = vsel %vm367_vm2, %v2645_v27, -inf }
0x171f   :  { %2650 = vmax.xlane.f32.xlu1 %v2649_v50  ;;  %v2646_v2 = vsel %vm367_vm2, %v2644_v46, -inf }
0x1720   :  { %2647 = vmax.xlane.f32.xlu0 %v2646_v2 }
0x1730   :  { %7573 = vrot.lane.b32.xlu1 %v9074_v18, %s8311_s24 }
0x1734   :  { %2759 = vrot.lane.b32.xlu1 %v6332_v32, %s8313_s11 }
0x1738   :  { %2765 = vrot.lane.b32.xlu1 %v2542_v37, %s8314_s0 }
0x17ac   :  { %v2651_v5 = vpop.xlane.xlu1 %2650 }
0x17ad   :  { %v2653_v41 = vsub.f32 %v2645_v27, %v2651_v5  ;;  %v2648_v52 = vpop.xlane.xlu0 %2647 }
0x17ae   :  { %v2652_v54 = vsub.f32 %v2644_v46, %v2648_v52 }
0x17af   :  { %v2656_v47 = vmul.f32 1.442695, %v2653_v41 }
0x17b0   :  { %v2654_v55 = vmul.f32 1.442695, %v2652_v54  ;;  %v7574_v48 = vpop.permute.xlu1 %7573 }
0x17b1   :  { %v7576_v33 = vunpack.i.h.bf16 %v7574_v48  ;;  %v7575_v34 = vunpack.i.l.bf16 %v7574_v48 }
0x17b2   :  { %7659 = vpow2.f32 %v2654_v55 }
0x17b3   :  { %v6920_v19 = vpack.c.bf16 %v7576_v33, %v7575_v34  ;;  %7661 = vpow2.f32 %v2656_v47 }
0x17b4   :  { %v2760_v6 = vpop.permute.xlu1 %2759 }
0x17b5   :  { %6921 = vmatprep.subr.bf16.mxu1 %v6920_v19  ;;  %v2780_v23 = vsel %vm627_vm4, %v9118_v44, %v2760_v6 }
0x17b6   :  { %6923 = vmatpush3.bf16.msra.mxu1 %v6920_v19 }
0x17b7   :  { %6925 = vmatprep.subr.bf16.mxu1 %v8874_v20 }
0x17b8   :  { %v2766_v12 = vpop.permute.xlu1 %2765 }
0x17bc   :  { %v7660_v18 = vpop.eup %7659 }
0x17bd   :  { %v2658_v59 = vsel %vm367_vm2, %v7660_v18, 0.0  ;;  %v7662_v60 = vpop.eup %7661 }
0x17be   :  { %2659 = vadd.xlane.f32.xlu0 %v2658_v59  ;;  %v2661_v61 = vsel %vm367_vm2, %v7662_v60, 0.0 }
0x17c2   :  { %2662 = vadd.xlane.f32.xlu0 %v2661_v61 }
0x17d8   :  { %2757 = vrot.lane.b32.xlu0 %v2338_v56, %s8313_s11 }
0x17dc   :  { %2767 = vrot.lane.b32.xlu0 %v6346_v11, %s8314_s0 }
0x184b   :  { %v2660_v22 = vpop.xlane.xlu0 %2659 }
0x184c   :  { %7663 = vrcp.f32 %v2660_v22 }
0x184f   :  { %v2663_v13 = vpop.xlane.xlu0 %2662 }
0x1850   :  { %7665 = vrcp.f32 %v2663_v13 }
0x1853   :  { %v2758_v4 = vpop.permute.xlu0 %2757 }
0x1854   :  { %v2779_v17 = vsel %vm627_vm4, %v9120_v45, %v2758_v4 }
0x1855   :  { %v2781_v24 = vsel %vm367_vm2, %v2779_v17, %v2766_v12 }
0x1856   :  { %v7664_v62 = vpop.eup %7663 }
0x1857   :  { %v2666_v10 = vmul.f32 %v7664_v62, %v7660_v18  ;;  %v2768_v9 = vpop.permute.xlu0 %2767 }
0x1858   :  { %v2782_v32 = vsel %vm367_vm2, %v2780_v23, %v2768_v9 }
0x1859   :  { %6358 = vmatprep.mubr.msk.f32.mxu1 %vm367_vm2, %v2666_v10 }
0x185a   :  { %v7666_v63 = vpop.eup %7665 }
0x185b   :  { %v2667_v16 = vmul.f32 %v7666_v63, %v7662_v60 }
0x185d   :  { %6359 = vmatmul.mubr.msk.f32.vlgmr.msra.gmra.mrb[22].mxu1 %vm367_vm2, %v2667_v16  ;;  %vm5582_vm2 = vcmask 1040384  }
0x185e   :  { %6927 = vmatpush3.bf16.msra.mxu1 %v8874_v20 }
0x185f   :  { %6929 = vmatprep.subr.bf16.mxu1 %v8886_v31 }
0x1862   :  { %6931 = vmatpush3.bf16.msra.mxu1 %v8886_v31 }
0x1863   :  { %6941 = vmatprep.subr.bf16.mxu1 %v8960_v35 }
0x1930   :  { %v6360_v15 = vpop.f32.mrb[22].mxu1 }
0x1931   :  { %2775 = vrot.lane.b32.xlu0 %v6360_v15, %s8290_s12  ;;  %v2746_v1 = vpop.f32.mrb[23].mxu1 }
0x1932   :  { %2773 = vrot.lane.b32.xlu1 %v2746_v1, %s8290_s12 }
0x19a3   :  { %v2776_v20 = vpop.permute.xlu0 %2775 }
0x19a4   :  { %v2774_v31 = vpop.permute.xlu1 %2773  ;;  %v2784_v11 = vsel %vm1464_vm8, %v2782_v32, %v2776_v20 }
0x19a5   :  { %v2783_v56 = vsel %vm1464_vm8, %v2781_v24, %v2774_v31 }
0x19a6   :  { %6369 = vmatprep.mubr.msk.f32.mxu1 %vm539_vm3, %v2783_v56 }
0x19a7   :  { %6370 = vmatmul.mubr.msk.f32.vlgmr.msra.gmra.mrb[24].mxu1 %vm539_vm3, %v2784_v11 }
0x19a8   :  { %6943 = vmatpush3.bf16.msra.mxu1 %v8960_v35 }
0x19a9   :  { %6945 = vmatprep.subr.bf16.mxu1 %v8970_v36 }
0x19ac   :  { %6947 = vmatpush3.bf16.msra.mxu1 %v8970_v36 }
0x19ad   :  { %6949 = vmatprep.subr.bf16.mxu1 %v8980_v39 }
0x19b0   :  { %6951 = vmatpush3.bf16.msra.mxu1 %v8980_v39 }
0x19b1   :  { %6953 = vmatprep.subr.bf16.mxu1 %v8990_v28 }
0x19b4   :  { %6955 = vmatpush3.bf16.msra.mxu1 %v8990_v28 }
0x19b5   :  { %6957 = vmatprep.subr.bf16.mxu1 %v9003_v42 }
0x19b8   :  { %6959 = vmatpush3.bf16.msra.mxu1 %v9003_v42 }
0x19b9   :  { %6961 = vmatprep.subr.bf16.mxu1 %v9008_v51 }
0x19bc   :  { %6963 = vmatpush3.bf16.msra.mxu1 %v9008_v51 }
0x19bd   :  { %6965 = vmatprep.subr.bf16.mxu1 %v9019_v53 }
0x19c0   :  { %6967 = vmatpush3.bf16.msra.mxu1 %v9019_v53 }
0x19c1   :  { %6969 = vmatprep.subr.bf16.mxu1 %v9029_v57 }
0x19c4   :  { %6971 = vmatpush3.bf16.msra.mxu1 %v9029_v57 }
0x1a7a   :  { %v6371_v35 = vpop.f32.mrb[24].mxu1 }
0x1a7b   :  { %v2863_v36 = vadd.f32 %v6371_v35, %v8904_v49  ;;  %v2857_v39 = vpop.f32.mrb[25].mxu1 }
0x1a7c   :  { %v2858_v28 = vadd.f32 %v8904_v49, %v2857_v39 }
0x1a7d   :  { %v2867_v42 = vadd.f32 %v2863_v36, %v9058_v8 }
0x1a7e   :  { %v2866_v44 = vadd.f32 %v2858_v28, %v9055_v7  ;;  %v3293_v28 = vld [vmem:[#allocation20 + $0x10] sm:$0xff] }
0x1a7f   :  { %v2871_v51 = vsel %vm539_vm3, %v2867_v42, 0.0 }
0x1a80   :  { %2872 = vadd.xlane.f32.xlu0 %v2871_v51  ;;  %v2868_v45 = vsel %vm539_vm3, %v2866_v44, 0.0 }
0x1a81   :  { %2869 = vadd.xlane.f32.xlu1 %v2868_v45 }
0x1b0d   :  { %v2873_v53 = vpop.xlane.xlu0 %2872 }
0x1b0e   :  { %v2875_v37 = vmul.f32 0.03125, %v2873_v53  ;;  %v2870_v38 = vpop.xlane.xlu1 %2869 }
0x1b0f   :  { %v2874_v57 = vmul.f32 0.03125, %v2870_v38 }
0x1b10   :  { %v2877_v40 = vsub.f32 %v2867_v42, %v2875_v37  ;;  %v3296_v42 = vld [vmem:[#allocation20 + $0x28] sm:$0xff] }
0x1b11   :  { %v2876_v21 = vsub.f32 %v2866_v44, %v2874_v57  ;;  %v8315_v44 = vmov 0.0|0.0   ;;  %v9225_v51 = vpack.c.bf16 %v3296_v42, %v3293_v28  ;;  %v3112_v42 = vld [vmem:[%s9982_s21 + $0x40] sm:$0xff] }
0x1b12   :  { %v2879_v26 = vmul.f32 %v2877_v40, %v2877_v40  ;;  %7020 = vmatprep.subr.bf16.mxu1 %v8315_v44 }
0x1b13   :  { %v2878_v27 = vmul.f32 %v2876_v21, %v2876_v21 }
0x1b14   :  { %v2883_v49 = vsel %vm539_vm3, %v2879_v26, 0.0 }
0x1b15   :  { %2884 = vadd.xlane.f32.xlu1 %v2883_v49  ;;  %v2880_v8 = vsel %vm539_vm3, %v2878_v27, 0.0  ;;  %v3299_v49 = vld [vmem:[#allocation20 + $0x40] sm:$0xff] }
0x1b16   :  { %2881 = vadd.xlane.f32.xlu0 %v2880_v8  ;;  %v3302_v8 = vld [vmem:[#allocation20 + $0x58] sm:$0xff] }
0x1ba2   :  { %v2885_v7 = vpop.xlane.xlu1 %2884 }
0x1ba3   :  { %v2887_v46 = vmul.f32 0.03125, %v2885_v7  ;;  %v2882_v50 = vpop.xlane.xlu0 %2881  ;;  %v9239_v7 = vpack.c.bf16 %v3302_v8, %v3299_v49  ;;  %v3294_v49 = vld [vmem:[#allocation20 + $0x18] sm:$0xff] }
0x1ba4   :  { %v2886_v2 = vmul.f32 0.03125, %v2882_v50  ;;  %v3308_v50 = vld [vmem:[#allocation20 + $0x88] sm:$0xff]  ;;  %v3298_v8 = vld [vmem:[#allocation20 + $0x38] sm:$0xff] }
0x1ba5   :  { %v2889_v5 = vadd.f32 1e-12, %v2887_v46  ;;  %v3305_v46 = vld [vmem:[#allocation20 + $0x70] sm:$0xff] }
0x1ba6   :  { %v2888_v41 = vadd.f32 1e-12, %v2886_v2  ;;  %v9243_v2 = vpack.c.bf16 %v3308_v50, %v3305_v46  ;;  %v3301_v46 = vld [vmem:[#allocation20 + $0x50] sm:$0xff] }
0x1ba7   :  { %7667 = vrsqrt.f32 %v2889_v5  ;;  %v3311_v5 = vld [vmem:[#allocation20 + $0xa0] sm:$0xff]  ;;  %v9340_v50 = vpack.c.bf16 %v3301_v46, %v3298_v8  ;;  %v3116_v8 = vld [vmem:[#allocation19] sm:$0x7]  ;;  %v3124_v46 = vsub.s32 1, %v8772_v30 }
0x1ba8   :  { %7669 = vrsqrt.f32 %v2888_v41  ;;  %v3314_v41 = vld [vmem:[#allocation20 + $0xb8] sm:$0xff] }
0x1bb1   :  { %v7668_v52 = vpop.eup %7667 }
0x1bb2   :  { %v7670_v54 = vpop.eup %7669  ;;  %v2893_v47 = vmul.f32 %v7668_v52, %v2877_v40  ;;  %v9247_v52 = vpack.c.bf16 %v3314_v41, %v3311_v5  ;;  %v3297_v5 = vld [vmem:[#allocation20 + $0x30] sm:$0xff]  ;;  %v3300_v41 = vld [vmem:[#allocation20 + $0x48] sm:$0xff] }
0x1bb3   :  { %v2892_v55 = vmul.f32 %v7670_v54, %v2876_v21  ;;  %v3105_v54 = vld [vmem:[%s9982_s21 + $0x8] sm:$0xff] }
0x1bb4   :  { %v2895_v48 = vmul.f32 %v8935_v14, %v2893_v47  ;;  %v3108_v47 = vld [vmem:[%s9982_s21 + $0x20] sm:$0xff] }
0x1bb5   :  { %v2894_v33 = vmul.f32 %v8935_v14, %v2892_v55  ;;  %v3317_v55 = vld [vmem:[#allocation20 + $0xd0] sm:$0xff] }
0x1bb6   :  { %v2897_v19 = vadd.f32 %v8937_v25, %v2895_v48  ;;  %v6972_v48 = vpack.c.bf16 %v3108_v47, %v3105_v54  ;;  %v3307_v54 = vld [vmem:[#allocation20 + $0x80] sm:$0xff]  ;;  %v9344_v47 = vpack.c.bf16 %v3300_v41, %v3297_v5  ;;  %v3121_v41 = vrot.slane %v3116_v8, %v8781_v43 }
0x1bb7   :  { %v2896_v34 = vadd.f32 %v8937_v25, %v2894_v33  ;;  %v3320_v33 = vld [vmem:[#allocation20 + $0xe8] sm:$0xff]  ;;  %v3339_v5 = vld [vmem:[#allocation22] sm:$0x7] }
0x1bb8   :  { %6973 = vmatprep.subr.bf16.mxu0 %v6972_v48  ;;  %v3303_v48 = vld [vmem:[#allocation20 + $0x60] sm:$0xff] }
0x1bb9   :  { %6380 = vmatprep.mubr.msk.f32.mxu0 %vm539_vm3, %v2896_v34 }
0x1bba   :  { %6381 = vmatmul.mubr.msk.f32.vlgmr.msra.gmra.mrb[22].mxu0 %vm539_vm3, %v2897_v19 }
0x1c8d   :  { %v6382_v18 = vpop.f32.mrb[22].mxu0 }
0x1c8e   :  { %v2976_v59 = vadd.f32 %v6382_v18, %v9034_v58  ;;  %v2970_v60 = vpop.f32.mrb[23].mxu0  ;;  %v9263_v18 = vpack.c.bf16 %v3320_v33, %v3317_v55  ;;  %v3306_v33 = vld [vmem:[#allocation20 + $0x78] sm:$0xff] }
0x1c8f   :  { %v2971_v61 = vadd.f32 %v9034_v58, %v2970_v60  ;;  %v3111_v60 = vld [vmem:[%s9982_s21 + $0x38] sm:$0xff] }
0x1c90   :  { %v2980_v22 = vmul.f32 %v2976_v59, %v2976_v59 }
0x1c91   :  { %v2979_v13 = vmul.f32 %v2971_v61, %v2971_v61 }
0x1c92   :  { %v2982_v62 = vmul.f32 %v2980_v22, %v2976_v59  ;;  %v3323_v22 = vld [vmem:[#allocation20 + $0x100] sm:$0xff] }
0x1c93   :  { %v2981_v10 = vmul.f32 %v2979_v13, %v2971_v61 }
0x1c94   :  { %v2984_v63 = vmul.f32 0.044715, %v2982_v62  ;;  %v3326_v62 = vld [vmem:[#allocation20 + $0x118] sm:$0xff] }
0x1c95   :  { %v2983_v14 = vmul.f32 0.044715, %v2981_v10  ;;  %v3110_v10 = vld [vmem:[%s9982_s21 + $0x30] sm:$0xff] }
0x1c96   :  { %v2986_v16 = vadd.f32 %v2984_v63, %v2976_v59  ;;  %v3113_v63 = vld [vmem:[%s9982_s21 + $0x48] sm:$0xff] }
0x1c97   :  { %v2985_v15 = vadd.f32 %v2983_v14, %v2971_v61  ;;  %v9279_v14 = vpack.c.bf16 %v3326_v62, %v3323_v22  ;;  %v3312_v22 = vld [vmem:[#allocation20 + $0xa8] sm:$0xff]  ;;  %v3319_v62 = vld [vmem:[#allocation20 + $0xe0] sm:$0xff] }
0x1c98   :  { %v2988_v1 = vmul.f32 0.7978846, %v2986_v16  ;;  %v6978_v16 = vpack.c.bf16 %v3113_v63, %v3110_v10 }
0x1c99   :  { %v2987_v25 = vmul.f32 0.7978846, %v2985_v15  ;;  %v3106_v15 = vld [vmem:[%s9982_s21 + $0x10] sm:$0xff] }
0x1c9a   :  { %7671 = vtanh.f32 %v2988_v1  ;;  %v3109_v1 = vld [vmem:[%s9982_s21 + $0x28] sm:$0xff] }
0x1c9b   :  { %7673 = vtanh.f32 %v2987_v25  ;;  %v3329_v25 = vld [vmem:[#allocation20 + $0x130] sm:$0xff] }
0x1ca4   :  { %v7672_v4 = vpop.eup %7671 }
0x1ca5   :  { %v7674_v6 = vpop.eup %7673  ;;  %v2992_v9 = vadd.f32 1.0, %v7672_v4  ;;  %v8316_v4 = vmov 0.0  }
0x1ca6   :  { %v2991_v12 = vadd.f32 1.0, %v7674_v6  ;;  %3203 = vmatprep.mubr.f32.mxu0 %v8316_v4  ;;  %v6980_v6 = vpack.c.bf16 %v3109_v1, %v3106_v15  ;;  %v3318_v15 = vld [vmem:[#allocation20 + $0xd8] sm:$0xff] }
0x1ca7   :  { %v2994_v17 = vmul.f32 0.5, %v2992_v9  ;;  %v3332_v9 = vld [vmem:[#allocation20 + $0x148] sm:$0xff]  ;;  %v3322_v1 = vld [vmem:[#allocation20 + $0xf8] sm:$0xff] }
0x1ca8   :  { %v2993_v20 = vmul.f32 0.5, %v2991_v12  ;;  %v9289_v12 = vpack.c.bf16 %v3332_v9, %v3329_v25  ;;  %v3325_v25 = vld [vmem:[#allocation20 + $0x110] sm:$0xff] }
0x1ca9   :  { %v2996_v58 = vmul.f32 %v2994_v17, %v2976_v59  ;;  %v3335_v17 = vld [vmem:[#allocation20 + $0x160] sm:$0xff]  ;;  %v9366_v9 = vpack.c.bf16 %v3325_v25, %v3322_v1 }
0x1caa   :  { %v2995_v23 = vmul.f32 %v2993_v20, %v2971_v61  ;;  %v3114_v61 = vld [vmem:[%s9982_s21 + $0x50] sm:$0xff] }
0x1cab   :  { %v6976_v13 = vpack.c.bf16 %v3114_v61, %v3111_v60  ;;  %v3338_v20 = vld [vmem:[#allocation20 + $0x178] sm:$0xff]  ;;  %v3309_v61 = vld [vmem:[#allocation20 + $0x90] sm:$0xff] }
0x1cac   :  { %6415 = vmatprep.mubr.f32.mxu1 %v2995_v23  ;;  %v9294_v23 = vpack.c.bf16 %v3338_v20, %v3335_v17  ;;  %v9357_v10 = vpack.c.bf16 %v3312_v22, %v3309_v61  ;;  %v3321_v17 = vld [vmem:[#allocation20 + $0xf0] sm:$0xff]  ;;  %v3324_v20 = vld [vmem:[#allocation20 + $0x108] sm:$0xff] }
0x1cad   :  { %6416 = vmatmul.mubr.f32.vlgmr.msra.gmra.mrb[26].mxu1 %v2996_v58 }
0x1cae   :  { %7022 = vmatpush3.bf16.msra.mxu1 %v9225_v51  ;;  %6461 = vmatprep.mubr.msk.f32.mxu1 %vm8317_vm9, %v8316_v4 }
0x1caf   :  { %7023 = vmatprep.subr.bf16.mxu1 %v8315_v44 }
0x1cb2   :  { %7025 = vmatpush3.bf16.msra.mxu1 %v9239_v7 }
0x1cb3   :  { %7026 = vmatprep.subr.bf16.mxu1 %v8315_v44 }
0x1cb6   :  { %7028 = vmatpush3.bf16.msra.mxu1 %v9243_v2 }
0x1cb7   :  { %7029 = vmatprep.subr.bf16.mxu1 %v8315_v44 }
0x1cba   :  { %7031 = vmatpush3.bf16.msra.mxu1 %v9247_v52 }
0x1cbb   :  { %7032 = vmatprep.subr.bf16.mxu1 %v8315_v44 }
0x1cbe   :  { %7034 = vmatpush3.bf16.msra.mxu1 %v9263_v18 }
0x1cbf   :  { %7035 = vmatprep.subr.bf16.mxu1 %v8315_v44 }
0x1cc2   :  { %7037 = vmatpush3.bf16.msra.mxu1 %v9279_v14 }
0x1cc3   :  { %7038 = vmatprep.subr.bf16.mxu1 %v8315_v44 }
0x1cc6   :  { %7040 = vmatpush3.bf16.msra.mxu1 %v9289_v12 }
0x1cc7   :  { %7041 = vmatprep.subr.bf16.mxu1 %v8315_v44 }
0x1cca   :  { %7043 = vmatpush3.bf16.msra.mxu1 %v9294_v23 }
0x1ccb   :  { %7076 = vmatprep.subr.bf16.mxu1 %v8315_v44 }
0x1ccd   :  { %6462 = vmatmul.mubr.f32.vlgmr.msra.gmra.mrb[28].mxu1 %v8316_v4 }
0x1cce   :  { %7078 = vmatpush3.bf16.msra.mxu1 %v9225_v51  ;;  %6496 = vmatprep.mubr.msk.f32.mxu1 %vm8317_vm9, %v8316_v4 }
0x1ccf   :  { %7079 = vmatprep.subr.bf16.mxu1 %v8315_v44 }
0x1cd2   :  { %7081 = vmatpush3.bf16.msra.mxu1 %v9239_v7 }
0x1cd3   :  { %7082 = vmatprep.subr.bf16.mxu1 %v8315_v44 }
0x1cd6   :  { %7084 = vmatpush3.bf16.msra.mxu1 %v9243_v2 }
0x1cd7   :  { %7085 = vmatprep.subr.bf16.mxu1 %v8315_v44 }
0x1cda   :  { %7087 = vmatpush3.bf16.msra.mxu1 %v9247_v52 }
0x1cdb   :  { %7088 = vmatprep.subr.bf16.mxu1 %v8315_v44 }
0x1cde   :  { %7090 = vmatpush3.bf16.msra.mxu1 %v9263_v18 }
0x1cdf   :  { %7091 = vmatprep.subr.bf16.mxu1 %v8315_v44 }
0x1ce2   :  { %7093 = vmatpush3.bf16.msra.mxu1 %v9279_v14 }
0x1ce3   :  { %7094 = vmatprep.subr.bf16.mxu1 %v8315_v44 }
0x1ce6   :  { %7096 = vmatpush3.bf16.msra.mxu1 %v9289_v12 }
0x1ce7   :  { %7097 = vmatprep.subr.bf16.mxu1 %v8315_v44 }
0x1cea   :  { %7099 = vmatpush3.bf16.msra.mxu1 %v9294_v23 }
0x1ceb   :  { %7132 = vmatprep.subr.bf16.mxu1 %v8315_v44 }
0x1d80   :  { %v6417_v31 = vpop.f32.mrb[26].mxu1 }
0x1d81   :  { %v3069_v24 = vadd.f32 %v6417_v31, %v9038_v29  ;;  %v3063_v32 = vpop.f32.mrb[27].mxu1 }
0x1d82   :  { %v3064_v56 = vadd.f32 %v9038_v29, %v3063_v32 }
0x1d83   :  { %v3073_v11 = vadd.f32 %v3069_v24, %v2897_v19  ;;  %v3107_v19 = vld [vmem:[%s9982_s21 + $0x18] sm:$0xff] }
0x1d84   :  { %v3072_v35 = vadd.f32 %v3064_v56, %v2896_v34  ;;  %v3104_v34 = vld [vmem:[%s9982_s21] sm:$0xff] }
0x1d85   :  { %v3077_v36 = vsel %vm539_vm3, %v3073_v11, 0.0  ;;  %v6974_v59 = vpack.c.bf16 %v3107_v19, %v3104_v34  ;;  %v3310_v34 = vld [vmem:[#allocation20 + $0x98] sm:$0xff]  ;;  %v3313_v19 = vld [vmem:[#allocation20 + $0xb0] sm:$0xff] }
0x1d86   :  { %3078 = vadd.xlane.f32.xlu1 %v3077_v36  ;;  %v3074_v39 = vsel %vm539_vm3, %v3072_v35, 0.0  ;;  %v9354_v60 = vpack.c.bf16 %v3313_v19, %v3310_v34 }
0x1d87   :  { %3075 = vadd.xlane.f32.xlu0 %v3074_v39  ;;  %6975 = vmatpush1.bf16.msra.mxu0 %v6974_v59  ;;  %v9351_v59 = vpack.c.bf16 %v3306_v33, %v3303_v48  ;;  %v3125_v48 = vrot.slane %v3116_v8, %v3124_v46 }
0x1d88   :  { %6977 = vmatprep.subr.bf16.mxu0 %v6976_v13  ;;  %v3316_v13 = vld [vmem:[#allocation20 + $0xc8] sm:$0xff] }
0x1d89   :  { %v9360_v63 = vpack.c.bf16 %v3319_v62, %v3316_v13 }
0x1d8b   :  { %6979 = vmatpush1.bf16.msra.mxu0 %v6978_v16  ;;  %v3315_v16 = vld [vmem:[#allocation20 + $0xc0] sm:$0xff] }
0x1d8c   :  { %6981 = vmatprep.subr.bf16.mxu0 %v6980_v6 }
0x1e13   :  { %v3079_v29 = vpop.xlane.xlu1 %3078 }
0x1e14   :  { %v3081_v45 = vmul.f32 0.03125, %v3079_v29  ;;  %v3076_v53 = vpop.xlane.xlu0 %3075  ;;  %v3115_v29 = vld [vmem:[%s9982_s21 + $0x58] sm:$0xff] }
0x1e15   :  { %v3080_v37 = vmul.f32 0.03125, %v3076_v53 }
0x1e16   :  { %v9229_v38 = vsub.f32 %v3073_v11, %v3081_v45 }
0x1e17   :  { %v9231_v57 = vsub.f32 %v3072_v35, %v3080_v37  ;;  %v6984_v37 = vpack.c.bf16 %v3115_v29, %v3112_v42  ;;  %v3333_v42 = vld [vmem:[#allocation20 + $0x150] sm:$0xff]  ;;  %v3336_v29 = vld [vmem:[#allocation20 + $0x168] sm:$0xff] }
0x1e18   :  { %v3085_v40 = vmul.f32 %v9229_v38, %v9229_v38 }
0x1e19   :  { %v3084_v21 = vmul.f32 %v9231_v57, %v9231_v57 }
0x1e1a   :  { %v3089_v26 = vsel %vm539_vm3, %v3085_v40, 0.0 }
0x1e1b   :  { %3090 = vadd.xlane.f32.xlu1 %v3089_v26  ;;  %v3086_v27 = vsel %vm539_vm3, %v3084_v21, 0.0  ;;  %v3292_v21 = vld [vmem:[#allocation20 + $0x8] sm:$0xff]  ;;  %v3295_v26 = vld [vmem:[#allocation20 + $0x20] sm:$0xff] }
0x1e1c   :  { %3087 = vadd.xlane.f32.xlu0 %v3086_v27  ;;  %v3291_v27 = vld [vmem:[#allocation20] sm:$0xff] }
0x1ea8   :  { %v3091_v58 = vpop.xlane.xlu1 %3090 }
0x1ea9   :  { %v3093_v31 = vmul.f32 0.03125, %v3091_v58  ;;  %v3088_v24 = vpop.xlane.xlu0 %3087  ;;  %v3328_v58 = vld [vmem:[#allocation20 + $0x128] sm:$0xff] }
0x1eaa   :  { %v3092_v32 = vmul.f32 0.03125, %v3088_v24  ;;  %v9369_v24 = vpack.c.bf16 %v3324_v20, %v3321_v17 }
0x1eab   :  { %v3095_v56 = vadd.f32 1e-12, %v3093_v31  ;;  %v3331_v31 = vld [vmem:[#allocation20 + $0x140] sm:$0xff] }
0x1eac   :  { %v3094_v11 = vadd.f32 1e-12, %v3092_v32  ;;  %v9372_v32 = vpack.c.bf16 %v3331_v31, %v3328_v58 }
0x1ead   :  { %7675 = vrsqrt.f32 %v3095_v56  ;;  %v3327_v56 = vld [vmem:[#allocation20 + $0x120] sm:$0xff] }
0x1eae   :  { %7677 = vrsqrt.f32 %v3094_v11  ;;  %v3330_v11 = vld [vmem:[#allocation20 + $0x138] sm:$0xff] }
0x1eb7   :  { %v7676_v35 = vpop.eup %7675 }
0x1eb8   :  { %v7678_v36 = vpop.eup %7677  ;;  %v3099_v28 = vmul.f32 %v7676_v35, %v9229_v38  ;;  %v3334_v35 = vld [vmem:[#allocation20 + $0x158] sm:$0xff] }
0x1eb9   :  { %v3098_v39 = vmul.f32 %v7678_v36, %v9231_v57  ;;  %v9333_v57 = vpack.c.bf16 %v3295_v26, %v3292_v21  ;;  %v3337_v36 = vld [vmem:[#allocation20 + $0x170] sm:$0xff] }
0x1eba   :  { %v3101_v40 = vmul.f32 %v9048_v0, %v3099_v28  ;;  %v9378_v28 = vpack.c.bf16 %v3337_v36, %v3334_v35 }
0x1ebb   :  { %v3100_v45 = vmul.f32 %v9048_v0, %v3098_v39  ;;  %v9337_v0 = vpack.c.bf16 %v3294_v49, %v3291_v27  ;;  %v9375_v39 = vpack.c.bf16 %v3330_v11, %v3327_v56 }
0x1ebc   :  { %v3103_v38 = vadd.f32 %v9050_v3, %v3101_v40 }
0x1ebd   :  { %v3102_v53 = vadd.f32 %v9050_v3, %v3100_v45  ;;  %v3304_v3 = vld [vmem:[#allocation20 + $0x68] sm:$0xff]  ;;  %v9381_v45 = vpack.c.bf16 %v3336_v29, %v3333_v42 }
0x1ebe   :  { %v9348_v55 = vpack.c.bf16 %v3307_v54, %v3304_v3  ;;  %v9407_v3 = vrot.slane %v3339_v5, %v8781_v43  ;;  %v9409_v54 = vrot.slane %v3339_v5, %v3124_v46 }
0x1ebf   :  { %5758 = vmatmul.mubr.msk.f32.vlgmr.msra.gmra.mrb[24].mxu0 %vm539_vm3, %v3102_v53 }
0x1ec0   :  { %6983 = vmatpush3.bf16.msra.mxu0 %v6980_v6  ;;  %3209 = vmatprep.mubr.f32.mxu0 %v8316_v4  ;;  %v9363_v6 = vpack.c.bf16 %v3318_v15, %v3315_v16 }
0x1ec1   :  { %6985 = vmatprep.subr.bf16.mxu0 %v6984_v37 }
0x1ec3   :  { %5759 = vmatmul.mubr.msk.f32.gmra.mrb[26].mxu0 %vm539_vm3, %v3103_v38 }
0x1ec4   :  { %6987 = vmatpush3.bf16.msra.mxu0 %v6984_v37  ;;  %6426 = vmatprep.mubr.msk.f32.mxu0 %vm539_vm3, %v3102_v53  ;;  %v3493_v53 = vpop.f32.mrb[28].mxu1 }
0x1ec5   :  { %6989 = vmatprep.subr.bf16.mxu0 %v9333_v57  ;;  %v6463_v37 = vpop.f32.mrb[29].mxu1 }
0x1ec7   :  { %6427 = vmatmul.mubr.msk.f32.vlgmr.msra.gmra.mrb[28].mxu0 %vm539_vm3, %v3103_v38 }
0x1ec8   :  { %6991 = vmatpush1.bf16.msra.mxu0 %v9337_v0  ;;  %3420 = vmatprep.mubr.f32.mxu0 %v8316_v4 }
0x1ec9   :  { %6993 = vmatprep.subr.bf16.mxu0 %v9340_v50 }
0x1ecc   :  { %6995 = vmatpush1.bf16.msra.mxu0 %v9344_v47 }
0x1ecd   :  { %6997 = vmatprep.subr.bf16.mxu0 %v9348_v55 }
0x1ed0   :  { %6999 = vmatpush1.bf16.msra.mxu0 %v9351_v59 }
0x1ed1   :  { %7001 = vmatprep.subr.bf16.mxu0 %v9354_v60 }
0x1ed4   :  { %7003 = vmatpush1.bf16.msra.mxu0 %v9357_v10 }
0x1ed5   :  { %7005 = vmatprep.subr.bf16.mxu0 %v9360_v63 }
0x1ed8   :  { %7007 = vmatpush1.bf16.msra.mxu0 %v9363_v6 }
0x1ed9   :  { %7009 = vmatprep.subr.bf16.mxu0 %v9366_v9 }
0x1edc   :  { %7011 = vmatpush1.bf16.msra.mxu0 %v9369_v24 }
0x1edd   :  { %7013 = vmatprep.subr.bf16.mxu0 %v9372_v32 }
0x1ee0   :  { %7015 = vmatpush1.bf16.msra.mxu0 %v9375_v39 }
0x1ee1   :  { %7017 = vmatprep.subr.bf16.mxu0 %v9378_v28 }
0x1ee4   :  { %7019 = vmatpush1.bf16.msra.mxu0 %v9381_v45 }
0x1ee5   :  { %7045 = vmatprep.subr.bf16.mxu0 %v9333_v57 }
0x1ee7   :  { %3421 = vmatmul.mubr.f32.vlgmr.msra.gmra.mrb[30].mxu0 %v8316_v4 }
0x1ee8   :  { %7047 = vmatpush1.bf16.msra.mxu0 %v9337_v0  ;;  %3680 = vmatprep.mubr.f32.mxu0 %v8316_v4 }
0x1ee9   :  { %7049 = vmatprep.subr.bf16.mxu0 %v9340_v50 }
0x1eec   :  { %7051 = vmatpush1.bf16.msra.mxu0 %v9344_v47 }
0x1eed   :  { %7053 = vmatprep.subr.bf16.mxu0 %v9348_v55 }
0x1ef0   :  { %7055 = vmatpush1.bf16.msra.mxu0 %v9351_v59 }
0x1ef1   :  { %7057 = vmatprep.subr.bf16.mxu0 %v9354_v60 }
0x1ef4   :  { %7059 = vmatpush1.bf16.msra.mxu0 %v9357_v10 }
0x1ef5   :  { %7061 = vmatprep.subr.bf16.mxu0 %v9360_v63 }
0x1ef8   :  { %7063 = vmatpush1.bf16.msra.mxu0 %v9363_v6 }
0x1ef9   :  { %7065 = vmatprep.subr.bf16.mxu0 %v9366_v9 }
0x1efc   :  { %7067 = vmatpush1.bf16.msra.mxu0 %v9369_v24 }
0x1efd   :  { %7069 = vmatprep.subr.bf16.mxu0 %v9372_v32 }
0x1f00   :  { %7071 = vmatpush1.bf16.msra.mxu0 %v9375_v39 }
0x1f01   :  { %7073 = vmatprep.subr.bf16.mxu0 %v9378_v28 }
0x1f04   :  { %7075 = vmatpush1.bf16.msra.mxu0 %v9381_v45 }
0x1f05   :  { %7101 = vmatprep.subr.bf16.mxu0 %v9333_v57 }
0x1f92   :  { %v3205_v40 = vpop.f32.mrb[24].mxu0 }
0x1f93   :  { %v3207_v21 = vpop.f32.mrb[25].mxu0  ;;  %v9411_v34 = vadd.f32 %v3205_v40, %v3121_v41  ;;  %v3128_v40 = vsub.s32 2, %v8772_v30 }
0x1f94   :  { %v9418_v15 = vadd.f32 %v3207_v21, %v3125_v48 }
0x1f96   :  { %v3211_v26 = vpop.f32.mrb[26].mxu0 }
0x1f97   :  { %v3213_v38 = vpop.f32.mrb[27].mxu0  ;;  %v9415_v13 = vadd.f32 %v3211_v26, %v3121_v41  ;;  %v9426_v41 = vrot.slane %v3339_v5, %v3128_v40 }
0x1f98   :  { %v9420_v43 = vadd.f32 %v3213_v38, %v3125_v48 }
0x1f99   :  { %v3494_v48 = vadd.f32 %v3493_v53, %v9426_v41 }
0x1f9a   :  { %v6428_v27 = vpop.f32.mrb[28].mxu0 }
0x1f9b   :  { %v3282_v49 = vpop.f32.mrb[29].mxu0 }
0x1fba   :  { %v3422_v33 = vpop.f32.mrb[30].mxu0 }
0x1fbb   :  { %v3423_v19 = vadd.f32 %v3422_v33, %v9407_v3  ;;  %v3424_v61 = vpop.f32.mrb[31].mxu0 }
0x1fbc   :  { %v3425_v22 = vadd.f32 %v3424_v61, %v9409_v54 }
0x1fbd   :  { %v3498_v62 = vrot.slane %v3423_v19, 1  ;;  %v3501_v16 = vadd.f32 %v3423_v19, %v9411_v34  ;;  %v3129_v19 = vrot.slane %v3116_v8, %v3128_v40 }
0x1fbe   :  { %v3516_v1 = vrot.slane %v3425_v22, 1  ;;  %v3541_v25 = vrot.slane %v3425_v22, 2 }
0x1fbf   :  { %v3502_v17 = vadd.f32 %v3498_v62, %v9415_v13  ;;  %v5762_v20 = vmul.f32 -1.442695, %v3501_v16  ;;  %v3558_v16 = vrot.slane %v3494_v48, 1  ;;  %v9432_v5 = vadd.f32 %v6428_v27, %v3129_v19 }
0x1fc0   :  { %v3543_v58 = vadd.f32 %v3516_v1, %v9418_v15  ;;  %v3544_v31 = vadd.f32 %v3541_v25, %v9420_v43 }
0x1fc1   :  { %7679 = vpow2.f32 %v5762_v20  ;;  %v5763_v56 = vmul.f32 -1.442695, %v3502_v17  ;;  %v3559_v17 = vrot.slane %v3494_v48, 2 }
0x1fc2   :  { %v5764_v11 = vmul.f32 -1.442695, %v3543_v58  ;;  %v5765_v35 = vmul.f32 -1.442695, %v3544_v31  ;;  %v9429_v58 = vadd.f32 %v3282_v49, %v3129_v19 }
0x1fc3   :  { %7681 = vpow2.f32 %v5763_v56 }
0x1fc4   :  { %7683 = vpow2.f32 %v5764_v11  ;;  %v3562_v27 = vadd.f32 %v3558_v16, %v9429_v58 }
0x1fc5   :  { %7685 = vpow2.f32 %v5765_v35 }
0x1fcb   :  { %v7680_v36 = vpop.eup %7679 }
0x1fcc   :  { %v3509_v42 = vadd.f32 1.0, %v7680_v36 }
0x1fcd   :  { %v7682_v29 = vpop.eup %7681 }
0x1fce   :  { %v7684_v37 = vpop.eup %7683  ;;  %v3510_v21 = vadd.f32 1.0, %v7682_v29  ;;  %7687 = vrcp.f32 %v3509_v42  ;;  %v5766_v42 = vmul.f32 -1.442695, %v3562_v27  ;;  %v3563_v29 = vadd.f32 %v3559_v17, %v9432_v5 }
0x1fcf   :  { %v7686_v26 = vpop.eup %7685  ;;  %v3551_v38 = vadd.f32 1.0, %v7684_v37 }
0x1fd0   :  { %7689 = vrcp.f32 %v3510_v21  ;;  %v3552_v46 = vadd.f32 1.0, %v7686_v26  ;;  %v5767_v37 = vmul.f32 -1.442695, %v3563_v29 }
0x1fd1   :  { %7691 = vrcp.f32 %v3551_v38 }
0x1fd2   :  { %7693 = vrcp.f32 %v3552_v46 }
0x1fd8   :  { %v7688_v33 = vpop.eup %7687 }
0x1fd9   :  { %v3519_v61 = vmul.f32 %v7688_v33, %v3425_v22 }
0x1fda   :  { %v7690_v62 = vpop.eup %7689 }
0x1fdb   :  { %v7692_v25 = vpop.eup %7691  ;;  %v3520_v30 = vmul.f32 %v7690_v62, %v3516_v1  ;;  %v3521_v53 = vadd.f32 %v3519_v61, %v9418_v15  ;;  %v3526_v48 = vsub.f32 1.0, %v7690_v62 }
0x1fdc   :  { %v7694_v20 = vpop.eup %7693  ;;  %v3576_v31 = vmul.f32 %v7692_v25, %v3558_v16 }
0x1fdd   :  { %v3522_v56 = vadd.f32 %v3520_v30, %v9420_v43  ;;  %v3577_v11 = vmul.f32 %v7694_v20, %v3559_v17  ;;  %v3538_v30 = vmul.f32 0.0, %v7690_v62  ;;  %v3525_v17 = vsub.f32 1.0, %v7688_v33 }
0x1fde   :  { %v3578_v35 = vadd.f32 %v3576_v31, %v9429_v58 }
0x1fdf   :  { %7695 = vtanh.f32 %v3522_v56  ;;  %v3579_v8 = vadd.f32 %v3577_v11, %v9432_v5 }
0x1fe0   :  { %7697 = vtanh.f32 %v3578_v35 }
0x1fe1   :  { %7699 = vtanh.f32 %v3521_v53 }
0x1fe2   :  { %7701 = vtanh.f32 %v3579_v8  ;;  %v3537_v8 = vmul.f32 0.0, %v7688_v33 }
0x1fe3   :  { %7703 = vpow2.f32 %v5766_v42 }
0x1fe4   :  { %7705 = vpow2.f32 %v5767_v37 }
0x1fe9   :  { %v7696_v22 = vpop.eup %7695 }
0x1fea   :  { %v7698_v1 = vpop.eup %7697  ;;  %3531 = vrot.lane.b32.xlu0 %v7696_v22, %s8304_s4 }
0x1feb   :  { %3586 = vrot.lane.b32.xlu1 %v7698_v1, %s8304_s4  ;;  %v7700_v49 = vpop.eup %7699 }
0x1fec   :  { %v7702_v36 = vpop.eup %7701 }
0x1fed   :  { %v7704_v40 = vpop.eup %7703 }
0x1fee   :  { %3529 = vrot.lane.b32.xlu0 %v7700_v49, %s8304_s4  ;;  %v3570_v21 = vadd.f32 1.0, %v7704_v40  ;;  %v7706_v26 = vpop.eup %7705 }
0x1fef   :  { %3588 = vrot.lane.b32.xlu1 %v7702_v36, %s8304_s4  ;;  %v3571_v38 = vadd.f32 1.0, %v7706_v26 }
0x1ff0   :  { %7707 = vrcp.f32 %v3570_v21 }
0x1ff1   :  { %7709 = vrcp.f32 %v3571_v38 }
0x1ffa   :  { %v7708_v46 = vpop.eup %7707 }
0x1ffb   :  { %v3582_v61 = vsub.f32 1.0, %v7708_v46  ;;  %v7710_v25 = vpop.eup %7709  ;;  %v3594_v11 = vmul.f32 0.0, %v7708_v46 }
0x1ffc   :  { %v3583_v53 = vsub.f32 1.0, %v7710_v25  ;;  %v3595_v36 = vmul.f32 0.0, %v7710_v25 }
0x205c   :  { %v3532_v19 = vpop.permute.xlu0 %3531 }
0x205d   :  { %v3536_v20 = vmul.f32 %v3532_v19, %v3526_v48  ;;  %v3587_v16 = vpop.permute.xlu1 %3586 }
0x205e   :  { %v3592_v31 = vmul.f32 %v3587_v16, %v3582_v61 }
0x205f   :  { %v3540_v56 = vadd.f32 %v3538_v30, %v3536_v20 }
0x2060   :  { %v3530_v35 = vpop.permute.xlu0 %3529  ;;  %v3596_v49 = vadd.f32 %v3594_v11, %v3592_v31 }
0x2061   :  { %v3535_v22 = vmul.f32 %v3530_v35, %v3525_v17  ;;  %v3589_v1 = vpop.permute.xlu1 %3588  ;;  %v3600_v42 = vrot.slane %v3540_v56, 7 }
0x2062   :  { %v3593_v27 = vmul.f32 %v3589_v1, %v3583_v53  ;;  %v3608_v62 = vrot.slane %v3596_v49, 7 }
0x2063   :  { %v3539_v29 = vadd.f32 %v3537_v8, %v3535_v22 }
0x2064   :  { %v3597_v37 = vadd.f32 %v3595_v36, %v3593_v27 }
0x2065   :  { %v3602_v40 = vsel %vm3601_vm10, %v3600_v42, %v3539_v29 }
0x2066   :  { %v3609_v21 = vrot.slane %v3597_v37, 6  ;;  %3603 = vrot.lane.b32.xlu1 %v3602_v40, %s8304_s4 }
0x2068   :  { %v3610_v26 = vsel %vm3601_vm10, %v3609_v21, %v3608_v62 }
0x2069   :  { %3611 = vrot.lane.b32.xlu0 %v3610_v26, %s8304_s4 }
0x20d8   :  { %v3604_v38 = vpop.permute.xlu1 %3603 }
0x20db   :  { %v3612_v33 = vpop.permute.xlu0 %3611 }
0x20dc   :  { %v9446_v46 = vsel %vm3614_vm11, %v3604_v38, %v3612_v33 }
0x20dd   :  { %3801 = vrot.lane.b32.xlu0 %v9446_v46, %s8304_s4  ;;  %3681 = vmatmul.mubr.f32.vlgmr.msra.gmra.mrb[32].mxu0 %v9446_v46  ;;  %v3864_v48 = vrot.slane %v9446_v46, 2  ;;  %v3865_v19 = vrot.slane %v9446_v46, 3 }
0x20de   :  { %6497 = vmatmul.mubr.f32.vlgmr.msra.gmra.mrb[30].mxu1 %v9446_v46  ;;  %7103 = vmatpush1.bf16.msra.mxu0 %v9337_v0 }
0x20df   :  { %3866 = vrot.lane.b32.xlu1 %v3864_v48, %s8304_s4  ;;  %7134 = vmatpush3.bf16.msra.mxu1 %v9225_v51 }
0x20e0   :  { %7105 = vmatprep.subr.bf16.mxu0 %v9340_v50  ;;  %7135 = vmatprep.subr.bf16.mxu1 %v8315_v44 }
0x20e1   :  { %3868 = vrot.lane.b32.xlu0 %v3865_v19, %s8304_s4  ;;  %3960 = vmatprep.mubr.f32.mxu0 %v8316_v4 }
0x20e2   :  { %7107 = vmatpush1.bf16.msra.mxu0 %v9344_v47  ;;  %6531 = vmatprep.mubr.msk.f32.mxu1 %vm8317_vm9, %v8316_v4 }
0x20e3   :  { %7137 = vmatpush3.bf16.msra.mxu1 %v9239_v7  ;;  %7109 = vmatprep.subr.bf16.mxu0 %v9348_v55 }
0x20e4   :  { %7138 = vmatprep.subr.bf16.mxu1 %v8315_v44 }
0x20e6   :  { %7111 = vmatpush1.bf16.msra.mxu0 %v9351_v59 }
0x20e7   :  { %7140 = vmatpush3.bf16.msra.mxu1 %v9243_v2  ;;  %7113 = vmatprep.subr.bf16.mxu0 %v9354_v60 }
0x20e8   :  { %7141 = vmatprep.subr.bf16.mxu1 %v8315_v44 }
0x20ea   :  { %7115 = vmatpush1.bf16.msra.mxu0 %v9357_v10 }
0x20eb   :  { %7143 = vmatpush3.bf16.msra.mxu1 %v9247_v52  ;;  %7117 = vmatprep.subr.bf16.mxu0 %v9360_v63 }
0x20ec   :  { %7144 = vmatprep.subr.bf16.mxu1 %v8315_v44 }
0x20ee   :  { %7119 = vmatpush1.bf16.msra.mxu0 %v9363_v6 }
0x20ef   :  { %7146 = vmatpush3.bf16.msra.mxu1 %v9263_v18  ;;  %7121 = vmatprep.subr.bf16.mxu0 %v9366_v9 }
0x20f0   :  { %7147 = vmatprep.subr.bf16.mxu1 %v8315_v44 }
0x20f2   :  { %7123 = vmatpush1.bf16.msra.mxu0 %v9369_v24 }
0x20f3   :  { %7149 = vmatpush3.bf16.msra.mxu1 %v9279_v14  ;;  %7125 = vmatprep.subr.bf16.mxu0 %v9372_v32 }
0x20f4   :  { %7150 = vmatprep.subr.bf16.mxu1 %v8315_v44 }
0x20f6   :  { %7127 = vmatpush1.bf16.msra.mxu0 %v9375_v39 }
0x20f7   :  { %7152 = vmatpush3.bf16.msra.mxu1 %v9289_v12  ;;  %7129 = vmatprep.subr.bf16.mxu0 %v9378_v28 }
0x20f8   :  { %7153 = vmatprep.subr.bf16.mxu1 %v8315_v44 }
0x20fa   :  { %7131 = vmatpush1.bf16.msra.mxu0 %v9381_v45 }
0x20fb   :  { %7155 = vmatpush3.bf16.msra.mxu1 %v9294_v23  ;;  %7157 = vmatprep.subr.bf16.mxu0 %v9333_v57 }
0x20fc   :  { %7188 = vmatprep.subr.bf16.mxu1 %v8315_v44 }
0x21b0   :  { %v3682_v61 = vpop.f32.mrb[32].mxu0 }
0x21b1   :  { %v3683_v25 = vadd.f32 %v3682_v61, %v9407_v3  ;;  %v3753_v30 = vpop.f32.mrb[30].mxu1  ;;  %v3684_v20 = vpop.f32.mrb[33].mxu0 }
0x21b2   :  { %v3685_v16 = vadd.f32 %v3684_v20, %v9409_v54  ;;  %v6498_v31 = vpop.f32.mrb[31].mxu1  ;;  %v3754_v48 = vadd.f32 %v3753_v30, %v9426_v41 }
0x21b3   :  { %v3758_v56 = vrot.slane %v3683_v25, 7  ;;  %v3762_v17 = vadd.f32 %v3683_v25, %v9415_v13 }
0x21b4   :  { %v3809_v11 = vrot.slane %v3685_v16, 2  ;;  %v3810_v8 = vrot.slane %v3685_v16, 3  ;;  %v3828_v20 = vrot.slane %v3754_v48, 2  ;;  %v3776_v31 = vrot.slane %v3685_v16, 7 }
0x21b5   :  { %v3761_v35 = vadd.f32 %v3758_v56, %v9411_v34  ;;  %v5769_v53 = vmul.f32 -1.442695, %v3762_v17  ;;  %v3829_v17 = vrot.slane %v3754_v48, 3 }
0x21b6   :  { %v3813_v22 = vadd.f32 %v3809_v11, %v9418_v15  ;;  %v3814_v49 = vadd.f32 %v3810_v8, %v9420_v43 }
0x21b7   :  { %v5768_v1 = vmul.f32 -1.442695, %v3761_v35  ;;  %7711 = vpow2.f32 %v5769_v53 }
0x21b8   :  { %v5770_v36 = vmul.f32 -1.442695, %v3813_v22  ;;  %v5771_v27 = vmul.f32 -1.442695, %v3814_v49 }
0x21b9   :  { %7713 = vpow2.f32 %v5768_v1 }
0x21ba   :  { %7715 = vpow2.f32 %v5770_v36 }
0x21bb   :  { %7717 = vpow2.f32 %v5771_v27 }
0x21c1   :  { %v7712_v42 = vpop.eup %7711 }
0x21c2   :  { %v3770_v29 = vadd.f32 1.0, %v7712_v42  ;;  %v3798_v42 = vrot.slane %v9446_v46, 7  ;;  %v3867_v46 = vpop.permute.xlu1 %3866 }
0x21c3   :  { %v7714_v37 = vpop.eup %7713 }
0x21c4   :  { %v3769_v40 = vadd.f32 1.0, %v7714_v37  ;;  %7719 = vrcp.f32 %v3770_v29  ;;  %v7716_v62 = vpop.eup %7715  ;;  %v3832_v29 = vadd.f32 %v3828_v20, %v9429_v58  ;;  %v3833_v37 = vadd.f32 %v3829_v17, %v9432_v5 }
0x21c5   :  { %v7718_v21 = vpop.eup %7717  ;;  %v3821_v26 = vadd.f32 1.0, %v7716_v62 }
0x21c6   :  { %7721 = vrcp.f32 %v3769_v40  ;;  %v3822_v38 = vadd.f32 1.0, %v7718_v21  ;;  %v5772_v40 = vmul.f32 -1.442695, %v3832_v29  ;;  %v5773_v62 = vmul.f32 -1.442695, %v3833_v37 }
0x21c7   :  { %7723 = vrcp.f32 %v3821_v26 }
0x21c8   :  { %7725 = vrcp.f32 %v3822_v38 }
0x21ce   :  { %v7720_v33 = vpop.eup %7719 }
0x21cf   :  { %v3780_v19 = vmul.f32 %v7720_v33, %v3685_v16 }
0x21d0   :  { %v9498_v61 = vpop.eup %7721 }
0x21d1   :  { %v3782_v25 = vadd.f32 %v3780_v19, %v9420_v43  ;;  %v7724_v56 = vpop.eup %7723  ;;  %v3779_v35 = vmul.f32 %v9498_v61, %v3776_v31  ;;  %v3802_v19 = vpop.permute.xlu0 %3801 }
0x21d2   :  { %v7726_v11 = vpop.eup %7725  ;;  %v3846_v53 = vmul.f32 %v7724_v56, %v3828_v20 }
0x21d3   :  { %7727 = vtanh.f32 %v3782_v25  ;;  %v3847_v8 = vmul.f32 %v7726_v11, %v3829_v17  ;;  %v3781_v30 = vadd.f32 %v3779_v35, %v9418_v15  ;;  %v3786_v35 = vsub.f32 1.0, %v7720_v33 }
0x21d4   :  { %v3848_v22 = vadd.f32 %v3846_v53, %v9429_v58 }
0x21d5   :  { %v3849_v1 = vadd.f32 %v3847_v8, %v9432_v5  ;;  %v3869_v11 = vpop.permute.xlu0 %3868 }
0x21d6   :  { %7729 = vtanh.f32 %v3848_v22 }
0x21d7   :  { %7731 = vtanh.f32 %v3849_v1 }
0x21d8   :  { %7733 = vtanh.f32 %v3781_v30 }
0x21d9   :  { %7735 = vpow2.f32 %v5772_v40 }
0x21da   :  { %7737 = vpow2.f32 %v5773_v62 }
0x21dd   :  { %v7728_v49 = vpop.eup %7727 }
0x21de   :  { %3791 = vrot.lane.b32.xlu1 %v7728_v49, %s8304_s4  ;;  %v3806_v49 = vmul.f32 %v7720_v33, %v3802_v19 }
0x21e0   :  { %v7730_v16 = vpop.eup %7729 }
0x21e1   :  { %v7732_v36 = vpop.eup %7731 }
0x21e2   :  { %3856 = vrot.lane.b32.xlu1 %v7730_v16, %s8304_s4  ;;  %3858 = vrot.lane.b32.xlu0 %v7732_v36, %s8304_s4  ;;  %v7734_v27 = vpop.eup %7733 }
0x21e3   :  { %v7736_v21 = vpop.eup %7735 }
0x21e4   :  { %v7738_v26 = vpop.eup %7737  ;;  %v3840_v38 = vadd.f32 1.0, %v7736_v21 }
0x21e5   :  { %v3841_v48 = vadd.f32 1.0, %v7738_v26 }
0x21e6   :  { %3789 = vrot.lane.b32.xlu1 %v7734_v27, %s8304_s4  ;;  %3799 = vrot.lane.b32.xlu0 %v3798_v42, %s8304_s4  ;;  %7739 = vrcp.f32 %v3840_v38  ;;  %v3785_v42 = vsub.f32 1.0, %v9498_v61 }
0x21e7   :  { %7741 = vrcp.f32 %v3841_v48 }
0x21f0   :  { %v7740_v31 = vpop.eup %7739 }
0x21f1   :  { %v7742_v56 = vpop.eup %7741  ;;  %v3852_v20 = vsub.f32 1.0, %v7740_v31  ;;  %v3872_v1 = vmul.f32 %v7740_v31, %v3867_v46 }
0x21f2   :  { %v3853_v17 = vsub.f32 1.0, %v7742_v56  ;;  %v3873_v16 = vmul.f32 %v7742_v56, %v3869_v11 }
0x2250   :  { %v3792_v25 = vpop.permute.xlu1 %3791 }
0x2251   :  { %v3796_v53 = vmul.f32 %v3792_v25, %v3786_v35 }
0x2253   :  { %v3808_v29 = vadd.f32 %v3806_v49, %v3796_v53 }
0x2254   :  { %v3857_v8 = vpop.permute.xlu1 %3856  ;;  %v3859_v22 = vpop.permute.xlu0 %3858 }
0x2255   :  { %v3862_v30 = vmul.f32 %v3857_v8, %v3852_v20  ;;  %v3863_v36 = vmul.f32 %v3859_v22, %v3853_v17  ;;  %v3878_v25 = vrot.slane %v3808_v29, 7 }
0x2257   :  { %v3874_v27 = vadd.f32 %v3872_v1, %v3862_v30  ;;  %v3875_v37 = vadd.f32 %v3873_v16, %v3863_v36 }
0x2258   :  { %v3790_v40 = vpop.permute.xlu1 %3789  ;;  %v3800_v21 = vpop.permute.xlu0 %3799 }
0x2259   :  { %v3886_v62 = vrot.slane %v3874_v27, 5  ;;  %v3795_v26 = vmul.f32 %v3790_v40, %v3785_v42  ;;  %v3887_v38 = vrot.slane %v3875_v37, 4  ;;  %v3805_v48 = vmul.f32 %v9498_v61, %v3800_v21 }
0x225b   :  { %v3807_v35 = vadd.f32 %v3805_v48, %v3795_v26  ;;  %v3888_v46 = vsel %vm3879_vm12, %v3887_v38, %v3886_v62 }
0x225c   :  { %3889 = vrot.lane.b32.xlu0 %v3888_v46, %s8304_s4 }
0x225d   :  { %v3880_v33 = vsel %vm3879_vm12, %v3878_v25, %v3807_v35 }
0x225e   :  { %3881 = vrot.lane.b32.xlu1 %v3880_v33, %s8304_s4 }
0x22ce   :  { %v3890_v19 = vpop.permute.xlu0 %3889 }
0x22d0   :  { %v3882_v31 = vpop.permute.xlu1 %3881 }
0x22d1   :  { %v9518_v56 = vsel %vm3614_vm11, %v3882_v31, %v3890_v19 }
0x22d2   :  { %4082 = vrot.lane.b32.xlu0 %v9518_v56, %s8304_s4  ;;  %v4145_v11 = vrot.slane %v9518_v56, 4  ;;  %v3894_v61 = vrot.slane %v9518_v56, 1  ;;  %v4146_v20 = vrot.slane %v9518_v56, 5 }
0x22d4   :  { %4147 = vrot.lane.b32.xlu1 %v4145_v11, %s8304_s4  ;;  %3961 = vmatmul.mubr.f32.vlgmr.msra.gmra.mrb[34].mxu0 %v3894_v61 }
0x22d5   :  { %6532 = vmatmul.mubr.f32.vlgmr.msra.gmra.mrb[32].mxu1 %v3894_v61  ;;  %7159 = vmatpush1.bf16.msra.mxu0 %v9337_v0 }
0x22d6   :  { %4149 = vrot.lane.b32.xlu0 %v4146_v20, %s8304_s4  ;;  %7190 = vmatpush3.bf16.msra.mxu1 %v9225_v51 }
0x22d7   :  { %7161 = vmatprep.subr.bf16.mxu0 %v9340_v50  ;;  %7191 = vmatprep.subr.bf16.mxu1 %v8315_v44 }
0x22d8   :  { %4241 = vmatprep.mubr.f32.mxu0 %v8316_v4  ;;  %6566 = vmatprep.mubr.msk.f32.mxu1 %vm8317_vm9, %v8316_v4 }
0x22d9   :  { %7163 = vmatpush1.bf16.msra.mxu0 %v9344_v47 }
0x22da   :  { %7193 = vmatpush3.bf16.msra.mxu1 %v9239_v7  ;;  %7165 = vmatprep.subr.bf16.mxu0 %v9348_v55 }
0x22db   :  { %7194 = vmatprep.subr.bf16.mxu1 %v8315_v44 }
0x22dd   :  { %7167 = vmatpush1.bf16.msra.mxu0 %v9351_v59 }
0x22de   :  { %7196 = vmatpush3.bf16.msra.mxu1 %v9243_v2  ;;  %7169 = vmatprep.subr.bf16.mxu0 %v9354_v60 }
0x22df   :  { %7197 = vmatprep.subr.bf16.mxu1 %v8315_v44 }
0x22e1   :  { %7171 = vmatpush1.bf16.msra.mxu0 %v9357_v10 }
0x22e2   :  { %7199 = vmatpush3.bf16.msra.mxu1 %v9247_v52  ;;  %7173 = vmatprep.subr.bf16.mxu0 %v9360_v63 }
0x22e3   :  { %7200 = vmatprep.subr.bf16.mxu1 %v8315_v44 }
0x22e5   :  { %7175 = vmatpush1.bf16.msra.mxu0 %v9363_v6 }
0x22e6   :  { %7202 = vmatpush3.bf16.msra.mxu1 %v9263_v18  ;;  %7177 = vmatprep.subr.bf16.mxu0 %v9366_v9 }
0x22e7   :  { %7203 = vmatprep.subr.bf16.mxu1 %v8315_v44 }
0x22e9   :  { %7179 = vmatpush1.bf16.msra.mxu0 %v9369_v24 }
0x22ea   :  { %7205 = vmatpush3.bf16.msra.mxu1 %v9279_v14  ;;  %7181 = vmatprep.subr.bf16.mxu0 %v9372_v32 }
0x22eb   :  { %7206 = vmatprep.subr.bf16.mxu1 %v8315_v44 }
0x22ed   :  { %7183 = vmatpush1.bf16.msra.mxu0 %v9375_v39 }
0x22ee   :  { %7208 = vmatpush3.bf16.msra.mxu1 %v9289_v12  ;;  %7185 = vmatprep.subr.bf16.mxu0 %v9378_v28 }
0x22ef   :  { %7209 = vmatprep.subr.bf16.mxu1 %v8315_v44 }
0x22f1   :  { %7187 = vmatpush1.bf16.msra.mxu0 %v9381_v45 }
0x22f2   :  { %7211 = vmatpush3.bf16.msra.mxu1 %v9294_v23  ;;  %7213 = vmatprep.subr.bf16.mxu0 %v9333_v57 }
0x22f3   :  { %7244 = vmatprep.subr.bf16.mxu1 %v8315_v44 }
0x23a7   :  { %v3962_v53 = vpop.f32.mrb[34].mxu0 }
0x23a8   :  { %v3963_v17 = vadd.f32 %v3962_v53, %v9407_v3  ;;  %v4033_v8 = vpop.f32.mrb[32].mxu1  ;;  %v3964_v22 = vpop.f32.mrb[35].mxu0 }
0x23a9   :  { %v3965_v1 = vadd.f32 %v3964_v22, %v9409_v54  ;;  %v6533_v30 = vpop.f32.mrb[33].mxu1  ;;  %v4034_v61 = vadd.f32 %v4033_v8, %v9426_v41 }
0x23aa   :  { %v4038_v49 = vrot.slane %v3963_v17, 6  ;;  %v4039_v16 = vrot.slane %v3963_v17, 7 }
0x23ab   :  { %v4090_v42 = vrot.slane %v3965_v1, 3  ;;  %v4091_v29 = vrot.slane %v3965_v1, 4  ;;  %v4058_v20 = vrot.slane %v3965_v1, 7  ;;  %v4109_v30 = vrot.slane %v4034_v61, 3 }
0x23ac   :  { %v4042_v36 = vadd.f32 %v4038_v49, %v9411_v34  ;;  %v4043_v27 = vadd.f32 %v4039_v16, %v9415_v13  ;;  %v4110_v16 = vrot.slane %v4034_v61, 4 }
0x23ad   :  { %v4094_v62 = vadd.f32 %v4090_v42, %v9418_v15  ;;  %v4095_v21 = vadd.f32 %v4091_v29, %v9420_v43 }
0x23ae   :  { %v5774_v37 = vmul.f32 -1.442695, %v4042_v36  ;;  %v5775_v40 = vmul.f32 -1.442695, %v4043_v27  ;;  %v4057_v36 = vrot.slane %v3965_v1, 6 }
0x23af   :  { %v5776_v26 = vmul.f32 -1.442695, %v4094_v62  ;;  %v5777_v38 = vmul.f32 -1.442695, %v4095_v21 }
0x23b0   :  { %7743 = vpow2.f32 %v5774_v37 }
0x23b1   :  { %7745 = vpow2.f32 %v5775_v40 }
0x23b2   :  { %7747 = vpow2.f32 %v5776_v26 }
0x23b3   :  { %7749 = vpow2.f32 %v5777_v38 }
0x23ba   :  { %v7744_v48 = vpop.eup %7743 }
0x23bb   :  { %v7746_v25 = vpop.eup %7745  ;;  %v4050_v35 = vadd.f32 1.0, %v7744_v48  ;;  %v4079_v48 = vrot.slane %v9518_v56, 7  ;;  %v4083_v56 = vpop.permute.xlu0 %4082 }
0x23bc   :  { %v4051_v46 = vadd.f32 1.0, %v7746_v25  ;;  %v7748_v33 = vpop.eup %7747 }
0x23bd   :  { %v7750_v19 = vpop.eup %7749  ;;  %v4102_v31 = vadd.f32 1.0, %v7748_v33 }
0x23be   :  { %7751 = vrcp.f32 %v4051_v46  ;;  %v4103_v11 = vadd.f32 1.0, %v7750_v19  ;;  %v4114_v46 = vadd.f32 %v4110_v16, %v9432_v5 }
0x23bf   :  { %7753 = vrcp.f32 %v4050_v35  ;;  %v4113_v35 = vadd.f32 %v4109_v30, %v9429_v58 }
0x23c0   :  { %7755 = vrcp.f32 %v4102_v31  ;;  %v5779_v19 = vmul.f32 -1.442695, %v4114_v46 }
0x23c1   :  { %7757 = vrcp.f32 %v4103_v11  ;;  %v5778_v33 = vmul.f32 -1.442695, %v4113_v35 }
0x23c8   :  { %v7752_v53 = vpop.eup %7751 }
0x23c9   :  { %v4062_v17 = vmul.f32 %v7752_v53, %v4058_v20  ;;  %v9569_v22 = vpop.eup %7753 }
0x23ca   :  { %v7756_v49 = vpop.eup %7755  ;;  %v4061_v37 = vmul.f32 %v9569_v22, %v4057_v36  ;;  %v4067_v46 = vsub.f32 1.0, %v9569_v22 }
0x23cb   :  { %v4064_v27 = vadd.f32 %v4062_v17, %v9420_v43  ;;  %v7758_v42 = vpop.eup %7757  ;;  %v4127_v29 = vmul.f32 %v7756_v49, %v4109_v30  ;;  %v4148_v17 = vpop.permute.xlu1 %4147 }
0x23cc   :  { %v4128_v40 = vmul.f32 %v7758_v42, %v4110_v16  ;;  %v4063_v21 = vadd.f32 %v4061_v37, %v9418_v15 }
0x23cd   :  { %7759 = vtanh.f32 %v4064_v27  ;;  %v4129_v62 = vadd.f32 %v4127_v29, %v9429_v58  ;;  %v4150_v27 = vpop.permute.xlu0 %4149  ;;  %v4068_v29 = vsub.f32 1.0, %v7752_v53 }
0x23ce   :  { %v4130_v8 = vadd.f32 %v4128_v40, %v9432_v5  ;;  %v4087_v40 = vmul.f32 %v7752_v53, %v4083_v56 }
0x23cf   :  { %7761 = vtanh.f32 %v4129_v62 }
0x23d0   :  { %7763 = vtanh.f32 %v4130_v8 }
0x23d1   :  { %7765 = vtanh.f32 %v4063_v21 }
0x23d2   :  { %7767 = vpow2.f32 %v5778_v33 }
0x23d3   :  { %7769 = vpow2.f32 %v5779_v19 }
0x23d7   :  { %v7760_v26 = vpop.eup %7759 }
0x23d8   :  { %4073 = vrot.lane.b32.xlu1 %v7760_v26, %s8304_s4 }
0x23d9   :  { %v7762_v1 = vpop.eup %7761 }
0x23da   :  { %v7764_v38 = vpop.eup %7763 }
0x23db   :  { %4139 = vrot.lane.b32.xlu0 %v7764_v38, %s8304_s4  ;;  %v7766_v25 = vpop.eup %7765 }
0x23dc   :  { %4137 = vrot.lane.b32.xlu1 %v7762_v1, %s8304_s4  ;;  %v7768_v31 = vpop.eup %7767 }
0x23dd   :  { %v7770_v11 = vpop.eup %7769  ;;  %v4121_v61 = vadd.f32 1.0, %v7768_v31 }
0x23de   :  { %v4122_v20 = vadd.f32 1.0, %v7770_v11 }
0x23df   :  { %4080 = vrot.lane.b32.xlu0 %v4079_v48, %s8304_s4  ;;  %7771 = vrcp.f32 %v4121_v61 }
0x23e0   :  { %4071 = vrot.lane.b32.xlu1 %v7766_v25, %s8304_s4  ;;  %7773 = vrcp.f32 %v4122_v20 }
0x23e9   :  { %v7772_v49 = vpop.eup %7771 }
0x23ea   :  { %v7774_v36 = vpop.eup %7773  ;;  %v4133_v16 = vsub.f32 1.0, %v7772_v49  ;;  %v4153_v1 = vmul.f32 %v7772_v49, %v4148_v17 }
0x23eb   :  { %v4134_v37 = vsub.f32 1.0, %v7774_v36  ;;  %v4154_v21 = vmul.f32 %v7774_v36, %v4150_v27 }
0x244a   :  { %v4074_v42 = vpop.permute.xlu1 %4073 }
0x244b   :  { %v4078_v30 = vmul.f32 %v4074_v42, %v4068_v29 }
0x244d   :  { %v4140_v62 = vpop.permute.xlu0 %4139  ;;  %v4089_v48 = vadd.f32 %v4087_v40, %v4078_v30 }
0x244e   :  { %v4138_v8 = vpop.permute.xlu1 %4137  ;;  %v4144_v26 = vmul.f32 %v4140_v62, %v4134_v37 }
0x244f   :  { %v4143_v38 = vmul.f32 %v4138_v8, %v4133_v16  ;;  %v4159_v53 = vrot.slane %v4089_v48, 7 }
0x2450   :  { %v4156_v25 = vadd.f32 %v4154_v21, %v4144_v26 }
0x2451   :  { %v4155_v35 = vadd.f32 %v4153_v1, %v4143_v38  ;;  %v4081_v33 = vpop.permute.xlu0 %4080 }
0x2452   :  { %v4072_v19 = vpop.permute.xlu1 %4071  ;;  %v4168_v31 = vrot.slane %v4156_v25, 2  ;;  %v4086_v61 = vmul.f32 %v9569_v22, %v4081_v33 }
0x2453   :  { %v4167_v11 = vrot.slane %v4155_v35, 3  ;;  %v4077_v20 = vmul.f32 %v4072_v19, %v4067_v46 }
0x2455   :  { %v4088_v56 = vadd.f32 %v4086_v61, %v4077_v20  ;;  %v4169_v42 = vsel %vm4160_vm13, %v4168_v31, %v4167_v11 }
0x2456   :  { %4170 = vrot.lane.b32.xlu0 %v4169_v42, %s8304_s4 }
0x2457   :  { %v4161_v17 = vsel %vm4160_vm13, %v4159_v53, %v4088_v56 }
0x2458   :  { %4162 = vrot.lane.b32.xlu1 %v4161_v17, %s8304_s4 }
0x24c8   :  { %v4171_v49 = vpop.permute.xlu0 %4170 }
0x24ca   :  { %v4163_v36 = vpop.permute.xlu1 %4162 }
0x24cb   :  { %v4173_v27 = vsel %vm3614_vm11, %v4163_v36, %v4171_v49 }
0x24cc   :  { %v4175_v29 = vrot.slane %v4173_v27, 2  ;;  %4363 = vrot.lane.b32.xlu0 %v4173_v27, %s8304_s4  ;;  %v4424_v30 = vrot.slane %v4173_v27, 6  ;;  %v4360_v22 = vrot.slane %v4173_v27, 7 }
0x24ce   :  { %4242 = vmatmul.mubr.f32.vlgmr.msra.gmra.mrb[36].mxu0 %v4175_v29  ;;  %6567 = vmatmul.mubr.f32.vlgmr.msra.gmra.mrb[34].mxu1 %v4175_v29 }
0x24cf   :  { %7215 = vmatpush1.bf16.msra.mxu0 %v9337_v0  ;;  %7246 = vmatpush3.bf16.msra.mxu1 %v9225_v51 }
0x24d0   :  { %4425 = vrot.lane.b32.xlu0 %v4424_v30, %s8304_s4  ;;  %7217 = vmatprep.subr.bf16.mxu0 %v9340_v50 }
0x24d1   :  { %7247 = vmatprep.subr.bf16.mxu1 %v8315_v44  ;;  %4515 = vmatprep.mubr.f32.mxu0 %v8316_v4 }
0x24d2   :  { %6601 = vmatprep.mubr.msk.f32.mxu1 %vm8317_vm9, %v8316_v4 }
0x24d3   :  { %7219 = vmatpush1.bf16.msra.mxu0 %v9344_v47  ;;  %7249 = vmatpush3.bf16.msra.mxu1 %v9239_v7 }
0x24d4   :  { %4361 = vrot.lane.b32.xlu0 %v4360_v22, %s8304_s4  ;;  %7221 = vmatprep.subr.bf16.mxu0 %v9348_v55 }
0x24d5   :  { %7250 = vmatprep.subr.bf16.mxu1 %v8315_v44 }
0x24d7   :  { %7223 = vmatpush1.bf16.msra.mxu0 %v9351_v59  ;;  %7252 = vmatpush3.bf16.msra.mxu1 %v9243_v2 }
0x24d8   :  { %7225 = vmatprep.subr.bf16.mxu0 %v9354_v60  ;;  %7253 = vmatprep.subr.bf16.mxu1 %v8315_v44 }
0x24db   :  { %7227 = vmatpush1.bf16.msra.mxu0 %v9357_v10  ;;  %7255 = vmatpush3.bf16.msra.mxu1 %v9247_v52 }
0x24dc   :  { %7229 = vmatprep.subr.bf16.mxu0 %v9360_v63  ;;  %7256 = vmatprep.subr.bf16.mxu1 %v8315_v44 }
0x24df   :  { %7231 = vmatpush1.bf16.msra.mxu0 %v9363_v6  ;;  %7258 = vmatpush3.bf16.msra.mxu1 %v9263_v18 }
0x24e0   :  { %7233 = vmatprep.subr.bf16.mxu0 %v9366_v9  ;;  %7259 = vmatprep.subr.bf16.mxu1 %v8315_v44 }
0x24e3   :  { %7235 = vmatpush1.bf16.msra.mxu0 %v9369_v24  ;;  %7261 = vmatpush3.bf16.msra.mxu1 %v9279_v14 }
0x24e4   :  { %7237 = vmatprep.subr.bf16.mxu0 %v9372_v32  ;;  %7262 = vmatprep.subr.bf16.mxu1 %v8315_v44 }
0x24e7   :  { %7239 = vmatpush1.bf16.msra.mxu0 %v9375_v39  ;;  %7264 = vmatpush3.bf16.msra.mxu1 %v9289_v12 }
0x24e8   :  { %7241 = vmatprep.subr.bf16.mxu0 %v9378_v28  ;;  %7265 = vmatprep.subr.bf16.mxu1 %v8315_v44 }
0x24eb   :  { %7243 = vmatpush1.bf16.msra.mxu0 %v9381_v45  ;;  %7267 = vmatpush3.bf16.msra.mxu1 %v9294_v23 }
0x24ec   :  { %7269 = vmatprep.subr.bf16.mxu0 %v9333_v57  ;;  %7300 = vmatprep.subr.bf16.mxu1 %v8315_v44 }
0x25a1   :  { %v4243_v37 = vpop.f32.mrb[36].mxu0  ;;  %v4314_v16 = vpop.f32.mrb[34].mxu1 }
0x25a2   :  { %v4244_v40 = vadd.f32 %v4243_v37, %v9407_v3  ;;  %v4245_v62 = vpop.f32.mrb[37].mxu0  ;;  %v6568_v8 = vpop.f32.mrb[35].mxu1  ;;  %v4315_v29 = vadd.f32 %v4314_v16, %v9426_v41 }
0x25a3   :  { %v4246_v21 = vadd.f32 %v4245_v62, %v9409_v54 }
0x25a4   :  { %v4319_v26 = vrot.slane %v4244_v40, 5  ;;  %v4320_v1 = vrot.slane %v4244_v40, 6  ;;  %v4388_v8 = vrot.slane %v4315_v29, 4 }
0x25a5   :  { %v4338_v38 = vrot.slane %v4246_v21, 5  ;;  %v4371_v48 = vrot.slane %v4246_v21, 4  ;;  %v4339_v22 = vrot.slane %v4246_v21, 6 }
0x25a6   :  { %v4323_v25 = vadd.f32 %v4319_v26, %v9411_v34  ;;  %v4324_v35 = vadd.f32 %v4320_v1, %v9415_v13  ;;  %v4389_v1 = vrot.slane %v4315_v29, 5 }
0x25a7   :  { %v4373_v46 = vadd.f32 %v4371_v48, %v9418_v15  ;;  %v4374_v33 = vadd.f32 %v4338_v38, %v9420_v43 }
0x25a8   :  { %v5780_v19 = vmul.f32 -1.442695, %v4323_v25  ;;  %v5781_v31 = vmul.f32 -1.442695, %v4324_v35 }
0x25a9   :  { %v5782_v11 = vmul.f32 -1.442695, %v4373_v46  ;;  %v5783_v61 = vmul.f32 -1.442695, %v4374_v33 }
0x25aa   :  { %7775 = vpow2.f32 %v5780_v19 }
0x25ab   :  { %7777 = vpow2.f32 %v5781_v31 }
0x25ac   :  { %7779 = vpow2.f32 %v5782_v11 }
0x25ad   :  { %7781 = vpow2.f32 %v5783_v61  ;;  %v4392_v61 = vadd.f32 %v4388_v8, %v9429_v58 }
0x25b4   :  { %v7776_v20 = vpop.eup %7775 }
0x25b5   :  { %v7778_v53 = vpop.eup %7777  ;;  %v4331_v56 = vadd.f32 1.0, %v7776_v20  ;;  %v4393_v20 = vadd.f32 %v4389_v1, %v9432_v5 }
0x25b6   :  { %v4332_v42 = vadd.f32 1.0, %v7778_v53  ;;  %v7780_v17 = vpop.eup %7779  ;;  %v5784_v53 = vmul.f32 -1.442695, %v4392_v61 }
0x25b7   :  { %7783 = vrcp.f32 %v4331_v56  ;;  %v7782_v49 = vpop.eup %7781  ;;  %v4381_v36 = vadd.f32 1.0, %v7780_v17  ;;  %v5785_v56 = vmul.f32 -1.442695, %v4393_v20 }
0x25b8   :  { %7785 = vrcp.f32 %v4332_v42  ;;  %v4382_v27 = vadd.f32 1.0, %v7782_v49 }
0x25b9   :  { %7787 = vrcp.f32 %v4381_v36  ;;  %v4364_v36 = vpop.permute.xlu0 %4363 }
0x25ba   :  { %7789 = vrcp.f32 %v4382_v27 }
0x25bd   :  { %v4426_v29 = vpop.permute.xlu0 %4425 }
0x25c1   :  { %v7784_v30 = vpop.eup %7783 }
0x25c2   :  { %v7786_v37 = vpop.eup %7785  ;;  %v4342_v40 = vmul.f32 %v7784_v30, %v4338_v38 }
0x25c3   :  { %v4343_v62 = vmul.f32 %v7786_v37, %v4339_v22  ;;  %v7788_v26 = vpop.eup %7787  ;;  %v4349_v22 = vsub.f32 1.0, %v7786_v37 }
0x25c4   :  { %v7790_v25 = vpop.eup %7789  ;;  %v4406_v35 = vmul.f32 %v7788_v26, %v4388_v8  ;;  %v4344_v46 = vadd.f32 %v4342_v40, %v9418_v15  ;;  %v4348_v8 = vsub.f32 1.0, %v7784_v30 }
0x25c5   :  { %v4345_v48 = vadd.f32 %v4343_v62, %v9420_v43  ;;  %v4407_v33 = vmul.f32 %v7790_v25, %v4389_v1  ;;  %v4368_v62 = vmul.f32 %v7786_v37, %v4364_v36  ;;  %v4362_v1 = vpop.permute.xlu0 %4361 }
0x25c6   :  { %v4408_v19 = vadd.f32 %v4406_v35, %v9429_v58 }
0x25c7   :  { %7791 = vtanh.f32 %v4345_v48  ;;  %v4409_v16 = vadd.f32 %v4407_v33, %v9432_v5 }
0x25c8   :  { %7793 = vtanh.f32 %v4344_v46  ;;  %v4367_v46 = vmul.f32 %v7784_v30, %v4362_v1 }
0x25c9   :  { %7795 = vtanh.f32 %v4408_v19 }
0x25ca   :  { %7797 = vtanh.f32 %v4409_v16 }
0x25cb   :  { %7799 = vpow2.f32 %v5784_v53 }
0x25cc   :  { %7801 = vpow2.f32 %v5785_v56 }
0x25d1   :  { %v7792_v21 = vpop.eup %7791 }
0x25d2   :  { %4354 = vrot.lane.b32.xlu1 %v7792_v21, %s8304_s4  ;;  %v7794_v38 = vpop.eup %7793 }
0x25d3   :  { %v7796_v31 = vpop.eup %7795 }
0x25d4   :  { %v7798_v11 = vpop.eup %7797 }
0x25d5   :  { %v7800_v42 = vpop.eup %7799 }
0x25d6   :  { %4352 = vrot.lane.b32.xlu1 %v7794_v38, %s8304_s4  ;;  %v4400_v17 = vadd.f32 1.0, %v7800_v42  ;;  %v7802_v49 = vpop.eup %7801 }
0x25d7   :  { %v4401_v27 = vadd.f32 1.0, %v7802_v49 }
0x25d8   :  { %7803 = vrcp.f32 %v4400_v17 }
0x25d9   :  { %7805 = vrcp.f32 %v4401_v27 }
0x25da   :  { %4416 = vrot.lane.b32.xlu1 %v7796_v31, %s8304_s4 }
0x25de   :  { %4418 = vrot.lane.b32.xlu1 %v7798_v11, %s8304_s4 }
0x25e2   :  { %v7804_v25 = vpop.eup %7803 }
0x25e3   :  { %v4412_v21 = vsub.f32 1.0, %v7804_v25  ;;  %v7806_v38 = vpop.eup %7805  ;;  %v4428_v11 = vmul.f32 %v7804_v25, %v4426_v29 }
0x25e4   :  { %v4413_v53 = vsub.f32 1.0, %v7806_v38  ;;  %v4429_v42 = vmul.f32 %v7806_v38, %v4362_v1 }
0x2644   :  { %v4355_v40 = vpop.permute.xlu1 %4354 }
0x2645   :  { %v4359_v26 = vmul.f32 %v4355_v40, %v4349_v22 }
0x2647   :  { %v4370_v48 = vadd.f32 %v4368_v62, %v4359_v26 }
0x2648   :  { %v4353_v35 = vpop.permute.xlu1 %4352 }
0x2649   :  { %v4358_v33 = vmul.f32 %v4353_v35, %v4348_v8  ;;  %v4434_v19 = vrot.slane %v4370_v48, 7 }
0x264b   :  { %v4369_v16 = vadd.f32 %v4367_v46, %v4358_v33 }
0x264c   :  { %v4417_v31 = vpop.permute.xlu1 %4416 }
0x264d   :  { %v4422_v61 = vmul.f32 %v4417_v31, %v4412_v21  ;;  %v4436_v20 = vsel %vm4435_vm14, %v4434_v19, %v4369_v16 }
0x264e   :  { %4437 = vrot.lane.b32.xlu0 %v4436_v20, %s8304_s4 }
0x264f   :  { %v4430_v37 = vadd.f32 %v4428_v11, %v4422_v61 }
0x2650   :  { %v4419_v56 = vpop.permute.xlu1 %4418 }
0x2651   :  { %v4423_v17 = vmul.f32 %v4419_v56, %v4413_v53  ;;  %v4442_v49 = vrot.slane %v4430_v37, 1 }
0x2653   :  { %v4431_v30 = vadd.f32 %v4429_v42, %v4423_v17 }
0x2655   :  { %v4443_v36 = vsel %vm4435_vm14, %v4431_v30, %v4442_v49 }
0x2656   :  { %4444 = vrot.lane.b32.xlu1 %v4443_v36, %s8304_s4 }
0x26c0   :  { %v4438_v27 = vpop.permute.xlu0 %4437 }
0x26c8   :  { %v4445_v22 = vpop.permute.xlu1 %4444 }
0x26c9   :  { %v9649_v29 = vsel %vm3614_vm11, %v4438_v27, %v4445_v22 }
0x26ca   :  { %v4449_v40 = vrot.slane %v9649_v29, 3  ;;  %v4698_v62 = vrot.slane %v9649_v29, 1  ;;  %4637 = vrot.lane.b32.xlu1 %v9649_v29, %s8304_s4 }
0x26cc   :  { %4699 = vrot.lane.b32.xlu0 %v4698_v62, %s8304_s4  ;;  %4516 = vmatmul.mubr.f32.vlgmr.msra.gmra.mrb[38].mxu0 %v4449_v40 }
0x26cd   :  { %6602 = vmatmul.mubr.f32.vlgmr.msra.gmra.mrb[36].mxu1 %v4449_v40  ;;  %7271 = vmatpush1.bf16.msra.mxu0 %v9337_v0 }
0x26ce   :  { %7302 = vmatpush3.bf16.msra.mxu1 %v9225_v51  ;;  %7273 = vmatprep.subr.bf16.mxu0 %v9340_v50 }
0x26cf   :  { %7303 = vmatprep.subr.bf16.mxu1 %v8315_v44  ;;  %4790 = vmatprep.mubr.f32.mxu0 %v8316_v4 }
0x26d0   :  { %6636 = vmatprep.mubr.msk.f32.mxu1 %vm8317_vm9, %v8316_v4 }
0x26d1   :  { %7275 = vmatpush1.bf16.msra.mxu0 %v9344_v47 }
0x26d2   :  { %7305 = vmatpush3.bf16.msra.mxu1 %v9239_v7  ;;  %7277 = vmatprep.subr.bf16.mxu0 %v9348_v55 }
0x26d3   :  { %7306 = vmatprep.subr.bf16.mxu1 %v8315_v44 }
0x26d5   :  { %7279 = vmatpush1.bf16.msra.mxu0 %v9351_v59 }
0x26d6   :  { %7308 = vmatpush3.bf16.msra.mxu1 %v9243_v2  ;;  %7281 = vmatprep.subr.bf16.mxu0 %v9354_v60 }
0x26d7   :  { %7309 = vmatprep.subr.bf16.mxu1 %v8315_v44 }
0x26d9   :  { %7283 = vmatpush1.bf16.msra.mxu0 %v9357_v10 }
0x26da   :  { %7311 = vmatpush3.bf16.msra.mxu1 %v9247_v52  ;;  %7285 = vmatprep.subr.bf16.mxu0 %v9360_v63 }
0x26db   :  { %7312 = vmatprep.subr.bf16.mxu1 %v8315_v44 }
0x26dd   :  { %7287 = vmatpush1.bf16.msra.mxu0 %v9363_v6 }
0x26de   :  { %7314 = vmatpush3.bf16.msra.mxu1 %v9263_v18  ;;  %7289 = vmatprep.subr.bf16.mxu0 %v9366_v9 }
0x26df   :  { %7315 = vmatprep.subr.bf16.mxu1 %v8315_v44 }
0x26e1   :  { %7291 = vmatpush1.bf16.msra.mxu0 %v9369_v24 }
0x26e2   :  { %7317 = vmatpush3.bf16.msra.mxu1 %v9279_v14  ;;  %7293 = vmatprep.subr.bf16.mxu0 %v9372_v32 }
0x26e3   :  { %7318 = vmatprep.subr.bf16.mxu1 %v8315_v44 }
0x26e5   :  { %7295 = vmatpush1.bf16.msra.mxu0 %v9375_v39 }
0x26e6   :  { %7320 = vmatpush3.bf16.msra.mxu1 %v9289_v12  ;;  %7297 = vmatprep.subr.bf16.mxu0 %v9378_v28 }
0x26e7   :  { %7321 = vmatprep.subr.bf16.mxu1 %v8315_v44 }
0x26e9   :  { %7299 = vmatpush1.bf16.msra.mxu0 %v9381_v45 }
0x26ea   :  { %7323 = vmatpush3.bf16.msra.mxu1 %v9294_v23  ;;  %7325 = vmatprep.subr.bf16.mxu0 %v9333_v57 }
0x26eb   :  { %7356 = vmatprep.subr.bf16.mxu1 %v8315_v44 }
0x279f   :  { %v4517_v26 = vpop.f32.mrb[38].mxu0 }
0x27a0   :  { %v4518_v48 = vadd.f32 %v4517_v26, %v9407_v3  ;;  %v4588_v8 = vpop.f32.mrb[36].mxu1  ;;  %v4519_v25 = vpop.f32.mrb[39].mxu0 }
0x27a1   :  { %v4520_v1 = vadd.f32 %v4519_v25, %v9409_v54  ;;  %v6603_v35 = vpop.f32.mrb[37].mxu1  ;;  %v4589_v40 = vadd.f32 %v4588_v8, %v9426_v41 }
0x27a2   :  { %v4593_v46 = vrot.slane %v4518_v48, 4  ;;  %v4594_v33 = vrot.slane %v4518_v48, 5 }
0x27a3   :  { %v4613_v19 = vrot.slane %v4520_v1, 5  ;;  %v4645_v38 = vrot.slane %v4520_v1, 6  ;;  %v4662_v25 = vrot.slane %v4589_v40, 5 }
0x27a4   :  { %v4597_v16 = vadd.f32 %v4593_v46, %v9411_v34  ;;  %v4598_v21 = vadd.f32 %v4594_v33, %v9415_v13  ;;  %v4663_v46 = vrot.slane %v4589_v40, 6  ;;  %v4612_v33 = vrot.slane %v4520_v1, 4 }
0x27a5   :  { %v4647_v31 = vadd.f32 %v4613_v19, %v9418_v15  ;;  %v4648_v20 = vadd.f32 %v4645_v38, %v9420_v43 }
0x27a6   :  { %v5786_v11 = vmul.f32 -1.442695, %v4597_v16  ;;  %v5787_v61 = vmul.f32 -1.442695, %v4598_v21 }
0x27a7   :  { %v5788_v37 = vmul.f32 -1.442695, %v4647_v31  ;;  %v5789_v53 = vmul.f32 -1.442695, %v4648_v20 }
0x27a8   :  { %7807 = vpow2.f32 %v5786_v11 }
0x27a9   :  { %7809 = vpow2.f32 %v5787_v61 }
0x27aa   :  { %7811 = vpow2.f32 %v5788_v37 }
0x27ab   :  { %7813 = vpow2.f32 %v5789_v53  ;;  %v4634_v53 = vrot.slane %v9649_v29, 7  ;;  %v4700_v29 = vpop.permute.xlu0 %4699 }
0x27b2   :  { %v7808_v56 = vpop.eup %7807 }
0x27b3   :  { %v7810_v42 = vpop.eup %7809  ;;  %v4605_v17 = vadd.f32 1.0, %v7808_v56 }
0x27b4   :  { %v4606_v49 = vadd.f32 1.0, %v7810_v42  ;;  %v7812_v30 = vpop.eup %7811  ;;  %v4666_v42 = vadd.f32 %v4662_v25, %v9429_v58 }
0x27b5   :  { %v7814_v36 = vpop.eup %7813  ;;  %v4655_v27 = vadd.f32 1.0, %v7812_v30 }
0x27b6   :  { %7815 = vrcp.f32 %v4606_v49  ;;  %v4656_v22 = vadd.f32 1.0, %v7814_v36  ;;  %v5790_v49 = vmul.f32 -1.442695, %v4666_v42 }
0x27b7   :  { %7817 = vrcp.f32 %v4605_v17  ;;  %v4667_v17 = vadd.f32 %v4663_v46, %v9432_v5 }
0x27b8   :  { %7819 = vrcp.f32 %v4655_v27 }
0x27b9   :  { %7821 = vrcp.f32 %v4656_v22  ;;  %v5791_v30 = vmul.f32 -1.442695, %v4667_v17 }
0x27c0   :  { %v7816_v62 = vpop.eup %7815 }
0x27c1   :  { %v4617_v26 = vmul.f32 %v7816_v62, %v4613_v19  ;;  %v9698_v48 = vpop.eup %7817 }
0x27c2   :  { %v7820_v35 = vpop.eup %7819  ;;  %v4616_v31 = vmul.f32 %v9698_v48, %v4612_v33  ;;  %v4638_v33 = vpop.permute.xlu1 %4637  ;;  %v4622_v42 = vsub.f32 1.0, %v9698_v48 }
0x27c3   :  { %v4619_v16 = vadd.f32 %v4617_v26, %v9420_v43  ;;  %v7822_v21 = vpop.eup %7821  ;;  %v4680_v38 = vmul.f32 %v7820_v35, %v4662_v25 }
0x27c4   :  { %v4681_v11 = vmul.f32 %v7822_v21, %v4663_v46  ;;  %v4618_v19 = vadd.f32 %v4616_v31, %v9418_v15  ;;  %v4623_v21 = vsub.f32 1.0, %v7816_v62  ;;  %v4642_v46 = vmul.f32 %v7816_v62, %v4638_v33 }
0x27c5   :  { %7823 = vtanh.f32 %v4619_v16  ;;  %v4682_v61 = vadd.f32 %v4680_v38, %v9429_v58 }
0x27c6   :  { %v4683_v8 = vadd.f32 %v4681_v11, %v9432_v5 }
0x27c7   :  { %7825 = vtanh.f32 %v4682_v61 }
0x27c8   :  { %7827 = vtanh.f32 %v4683_v8 }
0x27c9   :  { %7829 = vtanh.f32 %v4618_v19 }
0x27ca   :  { %7831 = vpow2.f32 %v5790_v49 }
0x27cb   :  { %7833 = vpow2.f32 %v5791_v30 }
0x27cf   :  { %v7824_v20 = vpop.eup %7823 }
0x27d0   :  { %4628 = vrot.lane.b32.xlu0 %v7824_v20, %s8304_s4 }
0x27d1   :  { %v7826_v1 = vpop.eup %7825 }
0x27d2   :  { %v7828_v37 = vpop.eup %7827 }
0x27d3   :  { %4692 = vrot.lane.b32.xlu1 %v7828_v37, %s8304_s4  ;;  %v7830_v56 = vpop.eup %7829 }
0x27d4   :  { %4690 = vrot.lane.b32.xlu0 %v7826_v1, %s8304_s4  ;;  %v7832_v36 = vpop.eup %7831 }
0x27d5   :  { %v7834_v27 = vpop.eup %7833  ;;  %v4674_v22 = vadd.f32 1.0, %v7832_v36 }
0x27d6   :  { %v4675_v40 = vadd.f32 1.0, %v7834_v27 }
0x27d7   :  { %4626 = vrot.lane.b32.xlu1 %v7830_v56, %s8304_s4  ;;  %7835 = vrcp.f32 %v4674_v22 }
0x27d8   :  { %4635 = vrot.lane.b32.xlu0 %v4634_v53, %s8304_s4  ;;  %7837 = vrcp.f32 %v4675_v40 }
0x27e1   :  { %v7836_v26 = vpop.eup %7835 }
0x27e2   :  { %v7838_v35 = vpop.eup %7837  ;;  %v4686_v31 = vsub.f32 1.0, %v7836_v26  ;;  %v4702_v20 = vmul.f32 %v7836_v26, %v4638_v33 }
0x27e3   :  { %v4687_v25 = vsub.f32 1.0, %v7838_v35  ;;  %v4703_v8 = vmul.f32 %v7838_v35, %v4700_v29 }
0x2842   :  { %v4629_v16 = vpop.permute.xlu0 %4628 }
0x2843   :  { %v4633_v38 = vmul.f32 %v4629_v16, %v4623_v21 }
0x2845   :  { %v4693_v11 = vpop.permute.xlu1 %4692  ;;  %v4644_v37 = vadd.f32 %v4642_v46, %v4633_v38 }
0x2846   :  { %v4691_v61 = vpop.permute.xlu0 %4690  ;;  %v4697_v19 = vmul.f32 %v4693_v11, %v4687_v25 }
0x2847   :  { %v4696_v1 = vmul.f32 %v4691_v61, %v4686_v31  ;;  %v4708_v62 = vrot.slane %v4644_v37, 7 }
0x2848   :  { %v4705_v53 = vadd.f32 %v4703_v8, %v4697_v19 }
0x2849   :  { %v4704_v56 = vadd.f32 %v4702_v20, %v4696_v1  ;;  %v4627_v17 = vpop.permute.xlu1 %4626 }
0x284a   :  { %v4636_v49 = vpop.permute.xlu0 %4635  ;;  %v4717_v30 = vrot.slane %v4705_v53, 6  ;;  %v4632_v27 = vmul.f32 %v4627_v17, %v4622_v42 }
0x284b   :  { %v4716_v36 = vrot.slane %v4704_v56, 7  ;;  %v4641_v22 = vmul.f32 %v9698_v48, %v4636_v49 }
0x284d   :  { %v4643_v40 = vadd.f32 %v4641_v22, %v4632_v27  ;;  %v4718_v16 = vsel %vm4709_vm15, %v4717_v30, %v4716_v36 }
0x284e   :  { %4719 = vrot.lane.b32.xlu0 %v4718_v16, %s8304_s4 }
0x284f   :  { %v4710_v29 = vsel %vm4709_vm15, %v4708_v62, %v4643_v40 }
0x2850   :  { %4711 = vrot.lane.b32.xlu1 %v4710_v29, %s8304_s4 }
0x28c0   :  { %v4720_v26 = vpop.permute.xlu0 %4719 }
0x28c2   :  { %v4712_v35 = vpop.permute.xlu1 %4711 }
0x28c3   :  { %v9718_v33 = vsel %vm3614_vm11, %v4712_v35, %v4720_v26 }
0x28c4   :  { %4912 = vrot.lane.b32.xlu0 %v9718_v33, %s8304_s4  ;;  %v4975_v21 = vrot.slane %v9718_v33, 2  ;;  %v4724_v48 = vrot.slane %v9718_v33, 4  ;;  %v4976_v38 = vrot.slane %v9718_v33, 3 }
0x28c6   :  { %4977 = vrot.lane.b32.xlu1 %v4975_v21, %s8304_s4  ;;  %4791 = vmatmul.mubr.f32.vlgmr.msra.gmra.mrb[40].mxu0 %v4724_v48 }
0x28c7   :  { %6637 = vmatmul.mubr.f32.vlgmr.msra.gmra.mrb[38].mxu1 %v4724_v48  ;;  %7327 = vmatpush1.bf16.msra.mxu0 %v9337_v0 }
0x28c8   :  { %4979 = vrot.lane.b32.xlu0 %v4976_v38, %s8304_s4  ;;  %7358 = vmatpush3.bf16.msra.mxu1 %v9225_v51 }
0x28c9   :  { %7329 = vmatprep.subr.bf16.mxu0 %v9340_v50  ;;  %7359 = vmatprep.subr.bf16.mxu1 %v8315_v44 }
0x28ca   :  { %5071 = vmatprep.mubr.f32.mxu0 %v8316_v4  ;;  %6671 = vmatprep.mubr.msk.f32.mxu1 %vm8317_vm9, %v8316_v4 }
0x28cb   :  { %7331 = vmatpush1.bf16.msra.mxu0 %v9344_v47 }
0x28cc   :  { %7361 = vmatpush3.bf16.msra.mxu1 %v9239_v7  ;;  %7333 = vmatprep.subr.bf16.mxu0 %v9348_v55 }
0x28cd   :  { %7362 = vmatprep.subr.bf16.mxu1 %v8315_v44 }
0x28cf   :  { %7335 = vmatpush1.bf16.msra.mxu0 %v9351_v59 }
0x28d0   :  { %7364 = vmatpush3.bf16.msra.mxu1 %v9243_v2  ;;  %7337 = vmatprep.subr.bf16.mxu0 %v9354_v60 }
0x28d1   :  { %7365 = vmatprep.subr.bf16.mxu1 %v8315_v44 }
0x28d3   :  { %7339 = vmatpush1.bf16.msra.mxu0 %v9357_v10 }
0x28d4   :  { %7367 = vmatpush3.bf16.msra.mxu1 %v9247_v52  ;;  %7341 = vmatprep.subr.bf16.mxu0 %v9360_v63 }
0x28d5   :  { %7368 = vmatprep.subr.bf16.mxu1 %v8315_v44 }
0x28d7   :  { %7343 = vmatpush1.bf16.msra.mxu0 %v9363_v6 }
0x28d8   :  { %7370 = vmatpush3.bf16.msra.mxu1 %v9263_v18  ;;  %7345 = vmatprep.subr.bf16.mxu0 %v9366_v9 }
0x28d9   :  { %7371 = vmatprep.subr.bf16.mxu1 %v8315_v44 }
0x28db   :  { %7347 = vmatpush1.bf16.msra.mxu0 %v9369_v24 }
0x28dc   :  { %7373 = vmatpush3.bf16.msra.mxu1 %v9279_v14  ;;  %7349 = vmatprep.subr.bf16.mxu0 %v9372_v32 }
0x28dd   :  { %7374 = vmatprep.subr.bf16.mxu1 %v8315_v44 }
0x28df   :  { %7351 = vmatpush1.bf16.msra.mxu0 %v9375_v39 }
0x28e0   :  { %7376 = vmatpush3.bf16.msra.mxu1 %v9289_v12  ;;  %7353 = vmatprep.subr.bf16.mxu0 %v9378_v28 }
0x28e1   :  { %7377 = vmatprep.subr.bf16.mxu1 %v8315_v44 }
0x28e3   :  { %7355 = vmatpush1.bf16.msra.mxu0 %v9381_v45 }
0x28e4   :  { %7379 = vmatpush3.bf16.msra.mxu1 %v9294_v23  ;;  %7381 = vmatprep.subr.bf16.mxu0 %v9333_v57 }
0x28e5   :  { %7412 = vmatprep.subr.bf16.mxu1 %v8315_v44 }
0x2999   :  { %v4792_v25 = vpop.f32.mrb[40].mxu0 }
0x299a   :  { %v4793_v31 = vadd.f32 %v4792_v25, %v9407_v3  ;;  %v4863_v46 = vpop.f32.mrb[38].mxu1  ;;  %v4794_v11 = vpop.f32.mrb[41].mxu0 }
0x299b   :  { %v4795_v61 = vadd.f32 %v4794_v11, %v9409_v54  ;;  %v6638_v8 = vpop.f32.mrb[39].mxu1  ;;  %v4864_v21 = vadd.f32 %v4863_v46, %v9426_v41 }
0x299c   :  { %v4868_v19 = vrot.slane %v4793_v31, 3  ;;  %v4869_v20 = vrot.slane %v4793_v31, 4 }
0x299d   :  { %v4920_v53 = vrot.slane %v4795_v61, 6  ;;  %v4921_v56 = vrot.slane %v4795_v61, 7  ;;  %v4888_v48 = vrot.slane %v4795_v61, 4  ;;  %v4939_v11 = vrot.slane %v4864_v21, 6 }
0x299e   :  { %v4872_v1 = vadd.f32 %v4868_v19, %v9411_v34  ;;  %v4873_v37 = vadd.f32 %v4869_v20, %v9415_v13  ;;  %v4940_v19 = vrot.slane %v4864_v21, 7  ;;  %v4887_v20 = vrot.slane %v4795_v61, 3 }
0x299f   :  { %v4924_v17 = vadd.f32 %v4920_v53, %v9418_v15  ;;  %v4925_v49 = vadd.f32 %v4921_v56, %v9420_v43 }
0x29a0   :  { %v5792_v42 = vmul.f32 -1.442695, %v4872_v1  ;;  %v5793_v57 = vmul.f32 -1.442695, %v4873_v37 }
0x29a1   :  { %v5794_v30 = vmul.f32 -1.442695, %v4924_v17  ;;  %v5795_v36 = vmul.f32 -1.442695, %v4925_v49 }
0x29a2   :  { %7839 = vpow2.f32 %v5792_v42 }
0x29a3   :  { %7841 = vpow2.f32 %v5793_v57 }
0x29a4   :  { %7843 = vpow2.f32 %v5794_v30 }
0x29a5   :  { %7845 = vpow2.f32 %v5795_v36  ;;  %v4909_v36 = vrot.slane %v9718_v33, 7  ;;  %v4913_v33 = vpop.permute.xlu0 %4912 }
0x29ac   :  { %v7840_v27 = vpop.eup %7839 }
0x29ad   :  { %v7842_v22 = vpop.eup %7841  ;;  %v4880_v62 = vadd.f32 1.0, %v7840_v27 }
0x29ae   :  { %v4881_v40 = vadd.f32 1.0, %v7842_v22  ;;  %v7844_v16 = vpop.eup %7843  ;;  %v4943_v22 = vadd.f32 %v4939_v11, %v9429_v58 }
0x29af   :  { %v7846_v29 = vpop.eup %7845  ;;  %v4932_v26 = vadd.f32 1.0, %v7844_v16 }
0x29b0   :  { %7847 = vrcp.f32 %v4881_v40  ;;  %v4933_v35 = vadd.f32 1.0, %v7846_v29  ;;  %v5796_v40 = vmul.f32 -1.442695, %v4943_v22 }
0x29b1   :  { %7849 = vrcp.f32 %v4880_v62  ;;  %v4944_v62 = vadd.f32 %v4940_v19, %v9432_v5 }
0x29b2   :  { %7851 = vrcp.f32 %v4932_v26 }
0x29b3   :  { %7853 = vrcp.f32 %v4933_v35  ;;  %v5797_v16 = vmul.f32 -1.442695, %v4944_v62 }
0x29ba   :  { %v7848_v38 = vpop.eup %7847 }
0x29bb   :  { %v4892_v25 = vmul.f32 %v7848_v38, %v4888_v48  ;;  %v9769_v31 = vpop.eup %7849  ;;  %v4978_v48 = vpop.permute.xlu1 %4977 }
0x29bc   :  { %v7852_v8 = vpop.eup %7851  ;;  %v4891_v56 = vmul.f32 %v9769_v31, %v4887_v20  ;;  %v4980_v20 = vpop.permute.xlu0 %4979  ;;  %v4897_v22 = vsub.f32 1.0, %v9769_v31 }
0x29bd   :  { %v4894_v1 = vadd.f32 %v4892_v25, %v9420_v43  ;;  %v7854_v37 = vpop.eup %7853  ;;  %v4957_v53 = vmul.f32 %v7852_v8, %v4939_v11 }
0x29be   :  { %v4958_v42 = vmul.f32 %v7854_v37, %v4940_v19  ;;  %v4893_v17 = vadd.f32 %v4891_v56, %v9418_v15  ;;  %v4898_v37 = vsub.f32 1.0, %v7848_v38  ;;  %v4917_v56 = vmul.f32 %v7848_v38, %v4913_v33 }
0x29bf   :  { %7855 = vtanh.f32 %v4894_v1  ;;  %v4959_v57 = vadd.f32 %v4957_v53, %v9429_v58 }
0x29c0   :  { %v4960_v46 = vadd.f32 %v4958_v42, %v9432_v5 }
0x29c1   :  { %7857 = vtanh.f32 %v4959_v57 }
0x29c2   :  { %7859 = vtanh.f32 %v4960_v46 }
0x29c3   :  { %7861 = vtanh.f32 %v4893_v17 }
0x29c4   :  { %7863 = vpow2.f32 %v5796_v40 }
0x29c5   :  { %7865 = vpow2.f32 %v5797_v16 }
0x29c9   :  { %v7856_v49 = vpop.eup %7855 }
0x29ca   :  { %4903 = vrot.lane.b32.xlu1 %v7856_v49, %s8304_s4 }
0x29cb   :  { %v7858_v61 = vpop.eup %7857 }
0x29cc   :  { %v7860_v30 = vpop.eup %7859 }
0x29cd   :  { %4969 = vrot.lane.b32.xlu0 %v7860_v30, %s8304_s4  ;;  %v7862_v27 = vpop.eup %7861 }
0x29ce   :  { %4967 = vrot.lane.b32.xlu1 %v7858_v61, %s8304_s4  ;;  %v7864_v29 = vpop.eup %7863 }
0x29cf   :  { %v7866_v26 = vpop.eup %7865  ;;  %v4951_v35 = vadd.f32 1.0, %v7864_v29 }
0x29d0   :  { %v4952_v21 = vadd.f32 1.0, %v7866_v26 }
0x29d1   :  { %4910 = vrot.lane.b32.xlu0 %v4909_v36, %s8304_s4  ;;  %7867 = vrcp.f32 %v4951_v35 }
0x29d2   :  { %4901 = vrot.lane.b32.xlu1 %v7862_v27, %s8304_s4  ;;  %7869 = vrcp.f32 %v4952_v21 }
0x29db   :  { %v7868_v25 = vpop.eup %7867 }
0x29dc   :  { %v7870_v8 = vpop.eup %7869  ;;  %v4963_v19 = vsub.f32 1.0, %v7868_v25  ;;  %v4983_v49 = vmul.f32 %v7868_v25, %v4978_v48 }
0x29dd   :  { %v4964_v53 = vsub.f32 1.0, %v7870_v8  ;;  %v4984_v46 = vmul.f32 %v7870_v8, %v4980_v20 }
0x2a3c   :  { %v4904_v1 = vpop.permute.xlu1 %4903 }
0x2a3d   :  { %v4908_v11 = vmul.f32 %v4904_v1, %v4898_v37 }
0x2a3f   :  { %v4970_v42 = vpop.permute.xlu0 %4969  ;;  %v4919_v30 = vadd.f32 %v4917_v56, %v4908_v11 }
0x2a40   :  { %v4968_v57 = vpop.permute.xlu1 %4967  ;;  %v4974_v17 = vmul.f32 %v4970_v42, %v4964_v53 }
0x2a41   :  { %v4973_v61 = vmul.f32 %v4968_v57, %v4963_v19  ;;  %v4989_v38 = vrot.slane %v4919_v30, 7 }
0x2a42   :  { %v4986_v36 = vadd.f32 %v4984_v46, %v4974_v17 }
0x2a43   :  { %v4985_v27 = vadd.f32 %v4983_v49, %v4973_v61  ;;  %v4911_v62 = vpop.permute.xlu0 %4910 }
0x2a44   :  { %v4902_v40 = vpop.permute.xlu1 %4901  ;;  %v4998_v16 = vrot.slane %v4986_v36, 4  ;;  %v4916_v26 = vmul.f32 %v9769_v31, %v4911_v62 }
0x2a45   :  { %v4997_v29 = vrot.slane %v4985_v27, 5  ;;  %v4907_v35 = vmul.f32 %v4902_v40, %v4897_v22 }
0x2a47   :  { %v4918_v21 = vadd.f32 %v4916_v26, %v4907_v35  ;;  %v4999_v33 = vsel %vm4990_vm0, %v4998_v16, %v4997_v29 }
0x2a48   :  { %5000 = vrot.lane.b32.xlu0 %v4999_v33, %s8304_s4 }
0x2a49   :  { %v4991_v48 = vsel %vm4990_vm0, %v4989_v38, %v4918_v21 }
0x2a4a   :  { %4992 = vrot.lane.b32.xlu1 %v4991_v48, %s8304_s4 }
0x2aba   :  { %v5001_v25 = vpop.permute.xlu0 %5000 }
0x2abc   :  { %v4993_v8 = vpop.permute.xlu1 %4992 }
0x2abd   :  { %v9789_v20 = vsel %vm3614_vm11, %v4993_v8, %v5001_v25 }
0x2abe   :  { %v5005_v1 = vrot.slane %v9789_v20, 5  ;;  %v5254_v37 = vrot.slane %v9789_v20, 4  ;;  %5193 = vrot.lane.b32.xlu0 %v9789_v20, %s8304_s4  ;;  %v5190_v38 = vrot.slane %v9789_v20, 7 }
0x2ac0   :  { %5255 = vrot.lane.b32.xlu1 %v5254_v37, %s8304_s4  ;;  %5072 = vmatmul.mubr.f32.vlgmr.msra.gmra.mrb[42].mxu0 %v5005_v1 }
0x2ac1   :  { %6672 = vmatmul.mubr.f32.vlgmr.msra.gmra.mrb[40].mxu1 %v5005_v1  ;;  %7383 = vmatpush1.bf16.msra.mxu0 %v9337_v0 }
0x2ac2   :  { %5257 = vrot.lane.b32.xlu0 %v5005_v1, %s8304_s4  ;;  %7414 = vmatpush3.bf16.msra.mxu1 %v9225_v51 }
0x2ac3   :  { %7385 = vmatprep.subr.bf16.mxu0 %v9340_v50  ;;  %7415 = vmatprep.subr.bf16.mxu1 %v8315_v44 }
0x2ac4   :  { %5349 = vmatprep.mubr.f32.mxu0 %v8316_v4  ;;  %6706 = vmatprep.mubr.msk.f32.mxu1 %vm8317_vm9, %v8316_v4 }
0x2ac5   :  { %7387 = vmatpush1.bf16.msra.mxu0 %v9344_v47 }
0x2ac6   :  { %7417 = vmatpush3.bf16.msra.mxu1 %v9239_v7  ;;  %7389 = vmatprep.subr.bf16.mxu0 %v9348_v55 }
0x2ac7   :  { %7418 = vmatprep.subr.bf16.mxu1 %v8315_v44 }
0x2ac9   :  { %7391 = vmatpush1.bf16.msra.mxu0 %v9351_v59 }
0x2aca   :  { %7420 = vmatpush3.bf16.msra.mxu1 %v9243_v2  ;;  %7393 = vmatprep.subr.bf16.mxu0 %v9354_v60 }
0x2acb   :  { %7421 = vmatprep.subr.bf16.mxu1 %v8315_v44 }
0x2acd   :  { %7395 = vmatpush1.bf16.msra.mxu0 %v9357_v10 }
0x2ace   :  { %7423 = vmatpush3.bf16.msra.mxu1 %v9247_v52  ;;  %7397 = vmatprep.subr.bf16.mxu0 %v9360_v63 }
0x2acf   :  { %7424 = vmatprep.subr.bf16.mxu1 %v8315_v44 }
0x2ad1   :  { %7399 = vmatpush1.bf16.msra.mxu0 %v9363_v6 }
0x2ad2   :  { %7426 = vmatpush3.bf16.msra.mxu1 %v9263_v18  ;;  %7401 = vmatprep.subr.bf16.mxu0 %v9366_v9 }
0x2ad3   :  { %7427 = vmatprep.subr.bf16.mxu1 %v8315_v44 }
0x2ad5   :  { %7403 = vmatpush1.bf16.msra.mxu0 %v9369_v24 }
0x2ad6   :  { %7429 = vmatpush3.bf16.msra.mxu1 %v9279_v14  ;;  %7405 = vmatprep.subr.bf16.mxu0 %v9372_v32 }
0x2ad7   :  { %7430 = vmatprep.subr.bf16.mxu1 %v8315_v44 }
0x2ad9   :  { %7407 = vmatpush1.bf16.msra.mxu0 %v9375_v39 }
0x2ada   :  { %7432 = vmatpush3.bf16.msra.mxu1 %v9289_v12  ;;  %7409 = vmatprep.subr.bf16.mxu0 %v9378_v28 }
0x2adb   :  { %7433 = vmatprep.subr.bf16.mxu1 %v8315_v44 }
0x2add   :  { %7411 = vmatpush1.bf16.msra.mxu0 %v9381_v45 }
0x2ade   :  { %7435 = vmatpush3.bf16.msra.mxu1 %v9294_v23  ;;  %7436 = vmatprep.subr.bf16.mxu0 %v8315_v44 }
0x2b30   :  { %v5194_v20 = vpop.permute.xlu0 %5193 }
0x2b93   :  { %v5073_v51 = vpop.f32.mrb[42].mxu0 }
0x2b94   :  { %v5074_v7 = vadd.f32 %v5073_v51, %v9407_v3  ;;  %v5144_v2 = vpop.f32.mrb[40].mxu1  ;;  %v5075_v52 = vpop.f32.mrb[43].mxu0 }
0x2b95   :  { %v5076_v18 = vadd.f32 %v5075_v52, %v9409_v54  ;;  %v6673_v14 = vpop.f32.mrb[41].mxu1  ;;  %v5145_v53 = vadd.f32 %v5144_v2, %v9426_v41  ;;  %v5256_v2 = vpop.permute.xlu1 %5255 }
0x2b96   :  { %v5149_v0 = vrot.slane %v5074_v7, 2  ;;  %v5150_v12 = vrot.slane %v5074_v7, 3 }
0x2b97   :  { %v5201_v55 = vrot.slane %v5076_v18, 7  ;;  %v5205_v59 = vadd.f32 %v5076_v18, %v9420_v43  ;;  %v5169_v19 = vrot.slane %v5076_v18, 3  ;;  %v5219_v57 = vrot.slane %v5145_v53, 7 }
0x2b98   :  { %v5153_v50 = vadd.f32 %v5149_v0, %v9411_v34  ;;  %v5154_v47 = vadd.f32 %v5150_v12, %v9415_v13  ;;  %v5168_v61 = vrot.slane %v5076_v18, 2  ;;  %v5223_v33 = vadd.f32 %v5145_v53, %v9432_v5  ;;  %v5258_v18 = vpop.permute.xlu0 %5257 }
0x2b99   :  { %v5204_v10 = vadd.f32 %v5201_v55, %v9418_v15  ;;  %v5801_v6 = vmul.f32 -1.442695, %v5205_v59  ;;  %v5222_v48 = vadd.f32 %v5219_v57, %v9429_v58 }
0x2b9a   :  { %v5798_v23 = vmul.f32 -1.442695, %v5153_v50  ;;  %v5799_v60 = vmul.f32 -1.442695, %v5154_v47  ;;  %v5803_v25 = vmul.f32 -1.442695, %v5223_v33 }
0x2b9b   :  { %v5800_v63 = vmul.f32 -1.442695, %v5204_v10  ;;  %v5802_v8 = vmul.f32 -1.442695, %v5222_v48 }
0x2b9c   :  { %7871 = vpow2.f32 %v5798_v23 }
0x2b9d   :  { %7873 = vpow2.f32 %v5799_v60 }
0x2b9e   :  { %7875 = vpow2.f32 %v5800_v63 }
0x2b9f   :  { %7877 = vpow2.f32 %v5801_v6 }
0x2ba6   :  { %v7872_v9 = vpop.eup %7871 }
0x2ba7   :  { %v7874_v24 = vpop.eup %7873  ;;  %v5161_v32 = vadd.f32 1.0, %v7872_v9 }
0x2ba8   :  { %v5162_v39 = vadd.f32 1.0, %v7874_v24  ;;  %v7876_v28 = vpop.eup %7875 }
0x2ba9   :  { %v7878_v45 = vpop.eup %7877  ;;  %v5212_v31 = vadd.f32 1.0, %v7876_v28 }
0x2baa   :  { %7879 = vrcp.f32 %v5162_v39  ;;  %v5213_v11 = vadd.f32 1.0, %v7878_v45 }
0x2bab   :  { %7881 = vrcp.f32 %v5161_v32 }
0x2bac   :  { %7883 = vrcp.f32 %v5212_v31 }
0x2bad   :  { %7885 = vrcp.f32 %v5213_v11 }
0x2bb4   :  { %v7880_v56 = vpop.eup %7879 }
0x2bb5   :  { %v9838_v42 = vpop.eup %7881  ;;  %v5173_v46 = vmul.f32 %v7880_v56, %v5169_v19  ;;  %v5179_v12 = vsub.f32 1.0, %v7880_v56  ;;  %v5198_v63 = vmul.f32 %v7880_v56, %v5194_v20 }
0x2bb6   :  { %v7884_v17 = vpop.eup %7883  ;;  %v5172_v22 = vmul.f32 %v9838_v42, %v5168_v61  ;;  %v5178_v45 = vsub.f32 1.0, %v9838_v42 }
0x2bb7   :  { %v7886_v49 = vpop.eup %7885  ;;  %v5175_v30 = vadd.f32 %v5173_v46, %v9420_v43  ;;  %v5236_v36 = vmul.f32 %v7884_v17, %v5219_v57 }
0x2bb8   :  { %v5237_v27 = vmul.f32 %v7886_v49, %v5145_v53  ;;  %v5174_v16 = vadd.f32 %v5172_v22, %v9418_v15 }
0x2bb9   :  { %7887 = vtanh.f32 %v5175_v30  ;;  %v5238_v62 = vadd.f32 %v5236_v36, %v9429_v58 }
0x2bba   :  { %v5239_v40 = vadd.f32 %v5237_v27, %v9432_v5 }
0x2bbc   :  { %7889 = vtanh.f32 %v5239_v40 }
0x2bbd   :  { %7891 = vtanh.f32 %v5238_v62 }
0x2bbe   :  { %7893 = vtanh.f32 %v5174_v16 }
0x2bbf   :  { %7895 = vpow2.f32 %v5803_v25 }
0x2bc0   :  { %7897 = vpow2.f32 %v5802_v8 }
0x2bc3   :  { %v7888_v29 = vpop.eup %7887 }
0x2bc4   :  { %5184 = vrot.lane.b32.xlu1 %v7888_v29, %s8304_s4 }
0x2bc6   :  { %v7890_v26 = vpop.eup %7889 }
0x2bc7   :  { %v7892_v35 = vpop.eup %7891  ;;  %5248 = vrot.lane.b32.xlu0 %v7890_v26, %s8304_s4 }
0x2bc8   :  { %5246 = vrot.lane.b32.xlu1 %v7892_v35, %s8304_s4  ;;  %v7894_v21 = vpop.eup %7893 }
0x2bc9   :  { %v7896_v1 = vpop.eup %7895 }
0x2bca   :  { %v7898_v37 = vpop.eup %7897  ;;  %v5231_v51 = vadd.f32 1.0, %v7896_v1 }
0x2bcb   :  { %5191 = vrot.lane.b32.xlu0 %v5190_v38, %s8304_s4  ;;  %v5230_v7 = vadd.f32 1.0, %v7898_v37 }
0x2bcc   :  { %5182 = vrot.lane.b32.xlu1 %v7894_v21, %s8304_s4  ;;  %7899 = vrcp.f32 %v5231_v51 }
0x2bcd   :  { %7901 = vrcp.f32 %v5230_v7 }
0x2bd6   :  { %v7900_v52 = vpop.eup %7899 }
0x2bd7   :  { %v7902_v14 = vpop.eup %7901  ;;  %v5243_v50 = vsub.f32 1.0, %v7900_v52  ;;  %v5262_v23 = vmul.f32 %v7900_v52, %v5258_v18 }
0x2bd8   :  { %v5242_v59 = vsub.f32 1.0, %v7902_v14  ;;  %v5261_v6 = vmul.f32 %v7902_v14, %v5256_v2 }
0x2c36   :  { %v5185_v0 = vpop.permute.xlu1 %5184 }
0x2c37   :  { %v5189_v55 = vmul.f32 %v5185_v0, %v5179_v12 }
0x2c39   :  { %v5249_v47 = vpop.permute.xlu0 %5248  ;;  %v5200_v32 = vadd.f32 %v5198_v63, %v5189_v55 }
0x2c3a   :  { %v5253_v60 = vmul.f32 %v5249_v47, %v5243_v50  ;;  %v5247_v10 = vpop.permute.xlu1 %5246 }
0x2c3b   :  { %v5252_v9 = vmul.f32 %v5247_v10, %v5242_v59  ;;  %v5267_v46 = vrot.slane %v5200_v32, 7 }
0x2c3c   :  { %v5264_v24 = vadd.f32 %v5262_v23, %v5253_v60 }
0x2c3d   :  { %v5192_v39 = vpop.permute.xlu0 %5191  ;;  %v5263_v28 = vadd.f32 %v5261_v6, %v5252_v9 }
0x2c3e   :  { %v5183_v31 = vpop.permute.xlu1 %5182  ;;  %v5276_v11 = vrot.slane %v5264_v24, 2  ;;  %v5197_v53 = vmul.f32 %v9838_v42, %v5192_v39  ;;  %v5557_v39 = vld [vmem:[%s9986_s25] sm:$0xff] }
0x2c3f   :  { %v5275_v19 = vrot.slane %v5263_v28, 3  ;;  %v5188_v57 = vmul.f32 %v5183_v31, %v5178_v45  ;;  %v5560_v45 = vld [vmem:[%s9986_s25 + $0x18] sm:$0xff] }
0x2c41   :  { %v5199_v17 = vadd.f32 %v5197_v53, %v5188_v57  ;;  %v5277_v49 = vsel %vm5268_vm1, %v5276_v11, %v5275_v19  ;;  %v5561_v53 = vld [vmem:[%s9986_s25 + $0x20] sm:$0xff]  ;;  %v5562_v19 = vld [vmem:[%s9986_s25 + $0x28] sm:$0xff] }
0x2c42   :  { %5278 = vrot.lane.b32.xlu0 %v5277_v49, %s8304_s4  ;;  %v5564_v49 = vld [vmem:[%s9986_s25 + $0x38] sm:$0xff] }
0x2c43   :  { %v5269_v56 = vsel %vm5268_vm1, %v5267_v46, %v5199_v17  ;;  %v7443_v46 = vpack.c.bf16 %v5562_v19, %v5561_v53  ;;  %v5563_v17 = vld [vmem:[%s9986_s25 + $0x30] sm:$0xff] }
0x2c44   :  { %5270 = vrot.lane.b32.xlu1 %v5269_v56, %s8304_s4  ;;  %v7446_v56 = vpack.c.bf16 %v5564_v49, %v5563_v17 }
0x2cb4   :  { %v5279_v61 = vpop.permute.xlu0 %5278 }
0x2cb6   :  { %v5271_v30 = vpop.permute.xlu1 %5270 }
0x2cb7   :  { %v5281_v36 = vsel %vm3614_vm11, %v5271_v30, %v5279_v61  ;;  %v5565_v61 = vld [vmem:[%s9986_s25 + $0x40] sm:$0xff]  ;;  %v5566_v30 = vld [vmem:[%s9986_s25 + $0x48] sm:$0xff] }
0x2cb8   :  { %v5283_v27 = vrot.slane %v5281_v36, 6  ;;  %5471 = vrot.lane.b32.xlu0 %v5281_v36, %s8304_s4  ;;  %v5468_v42 = vrot.slane %v5281_v36, 7  ;;  %v7449_v36 = vpack.c.bf16 %v5566_v30, %v5565_v61 }
0x2cba   :  { %5350 = vmatmul.mubr.f32.vlgmr.msra.gmra.mrb[44].mxu0 %v5283_v27  ;;  %6707 = vmatmul.mubr.f32.vlgmr.msra.gmra.mrb[42].mxu1 %v5283_v27 }
0x2cbb   :  { %6741 = vmatprep.mubr.msk.f32.mxu0 %vm8317_vm9, %v8316_v4 }
0x2cbc   :  { %5530 = vrot.lane.b32.xlu0 %v5283_v27, %s8304_s4  ;;  %v5567_v27 = vld [vmem:[%s9986_s25 + $0x50] sm:$0xff] }
0x2cc0   :  { %5469 = vrot.lane.b32.xlu0 %v5468_v42, %s8304_s4  ;;  %v5568_v42 = vld [vmem:[%s9986_s25 + $0x58] sm:$0xff] }
0x2d8d   :  { %v5351_v22 = vpop.f32.mrb[44].mxu0  ;;  %v5422_v62 = vpop.f32.mrb[42].mxu1 }
0x2d8e   :  { %v5352_v40 = vadd.f32 %v5351_v22, %v9407_v3  ;;  %v5353_v16 = vpop.f32.mrb[45].mxu0  ;;  %v6708_v29 = vpop.f32.mrb[43].mxu1  ;;  %v5423_v18 = vadd.f32 %v5422_v62, %v9426_v41  ;;  %v7452_v22 = vpack.c.bf16 %v5568_v42, %v5567_v27 }
0x2d8f   :  { %v5354_v26 = vadd.f32 %v5353_v16, %v9409_v54 }
0x2d90   :  { %v5427_v35 = vrot.slane %v5352_v40, 1  ;;  %v5428_v38 = vrot.slane %v5352_v40, 2  ;;  %v5495_v59 = vrot.slane %v5423_v18, 1  ;;  %v5498_v62 = vadd.f32 %v5423_v18, %v9429_v58 }
0x2d91   :  { %v5446_v21 = vrot.slane %v5354_v26, 1  ;;  %v5480_v33 = vadd.f32 %v5354_v26, %v9418_v15  ;;  %v5447_v12 = vrot.slane %v5354_v26, 2 }
0x2d92   :  { %v5431_v4 = vadd.f32 %v5427_v35, %v9411_v34  ;;  %v5432_v48 = vadd.f32 %v5428_v38, %v9415_v13  ;;  %v5808_v40 = vmul.f32 -1.442695, %v5498_v62  ;;  %v5499_v16 = vadd.f32 %v5495_v59, %v9432_v5 }
0x2d93   :  { %v5481_v25 = vadd.f32 %v5446_v21, %v9420_v43  ;;  %v5806_v8 = vmul.f32 -1.442695, %v5480_v33  ;;  %v5472_v33 = vpop.permute.xlu0 %5471 }
0x2d94   :  { %v5804_v1 = vmul.f32 -1.442695, %v5431_v4  ;;  %v5805_v37 = vmul.f32 -1.442695, %v5432_v48  ;;  %v5809_v29 = vmul.f32 -1.442695, %v5499_v16 }
0x2d95   :  { %7903 = vpow2.f32 %v5806_v8  ;;  %v5807_v3 = vmul.f32 -1.442695, %v5481_v25 }
0x2d96   :  { %7905 = vpow2.f32 %v5804_v1 }
0x2d97   :  { %7907 = vpow2.f32 %v5805_v37  ;;  %v5531_v25 = vpop.permute.xlu0 %5530 }
0x2d98   :  { %7909 = vpow2.f32 %v5807_v3 }
0x2d9f   :  { %v7904_v54 = vpop.eup %7903 }
0x2da0   :  { %v7906_v51 = vpop.eup %7905  ;;  %v5488_v7 = vadd.f32 1.0, %v7904_v54 }
0x2da1   :  { %v7908_v20 = vpop.eup %7907  ;;  %v5439_v2 = vadd.f32 1.0, %v7906_v51 }
0x2da2   :  { %v5440_v52 = vadd.f32 1.0, %v7908_v20  ;;  %7911 = vrcp.f32 %v5488_v7  ;;  %v7910_v34 = vpop.eup %7909 }
0x2da3   :  { %7913 = vrcp.f32 %v5439_v2  ;;  %v5489_v13 = vadd.f32 1.0, %v7910_v34  ;;  %v5470_v34 = vpop.permute.xlu0 %5469 }
0x2da4   :  { %7915 = vrcp.f32 %v5440_v52 }
0x2da5   :  { %7917 = vrcp.f32 %v5489_v13 }
0x2dac   :  { %v7912_v14 = vpop.eup %7911 }
0x2dad   :  { %v9870_v0 = vpop.eup %7913  ;;  %v5512_v50 = vmul.f32 %v7912_v14, %v5423_v18 }
0x2dae   :  { %v9872_v47 = vpop.eup %7915  ;;  %v5450_v55 = vmul.f32 %v9870_v0, %v5446_v21  ;;  %v5456_v2 = vsub.f32 1.0, %v9870_v0  ;;  %v5475_v14 = vmul.f32 %v9870_v0, %v5470_v34 }
0x2daf   :  { %v5451_v23 = vmul.f32 %v9872_v47, %v5447_v12  ;;  %v5514_v60 = vadd.f32 %v5512_v50, %v9429_v58  ;;  %v7918_v10 = vpop.eup %7917  ;;  %v5569_v58 = vld [vmem:[%s9986_s25 + $0x60] sm:$0xff]  ;;  %v5457_v8 = vsub.f32 1.0, %v9872_v47  ;;  %v5476_v54 = vmul.f32 %v9872_v47, %v5472_v33  ;;  %v5571_v50 = vld [vmem:[%s9986_s25 + $0x70] sm:$0xff]  ;;  %v5572_v47 = vld [vmem:[%s9986_s25 + $0x78] sm:$0xff] }
0x2db0   :  { %v5513_v6 = vmul.f32 %v7918_v10, %v5495_v59  ;;  %v5452_v41 = vadd.f32 %v5450_v55, %v9418_v15  ;;  %v5559_v15 = vld [vmem:[%s9986_s25 + $0x10] sm:$0xff] }
0x2db1   :  { %v5453_v63 = vadd.f32 %v5451_v23, %v9420_v43  ;;  %7919 = vtanh.f32 %v5514_v60  ;;  %v5558_v43 = vld [vmem:[%s9986_s25 + $0x8] sm:$0xff]  ;;  %v7440_v11 = vpack.c.bf16 %v5560_v45, %v5559_v15 }
0x2db2   :  { %v5515_v9 = vadd.f32 %v5513_v6, %v9432_v5  ;;  %v7437_v28 = vpack.c.bf16 %v5558_v43, %v5557_v39  ;;  %v5570_v5 = vld [vmem:[%s9986_s25 + $0x68] sm:$0xff]  ;;  %s8318_s25 = smov [#allocation25]  }
0x2db3   :  { %7921 = vtanh.f32 %v5453_v63  ;;  %v7455_v1 = vpack.c.bf16 %v5570_v5, %v5569_v58  ;;  %s5664_s17 = sshll.u32 %s8318_s25, 4  ;;  %s5665_s17 = int_to_ptr.vmem [resolvable:$true] %s5664_s17 }
0x2db4   :  { %7923 = vtanh.f32 %v5452_v41  ;;  %7438 = vmatpush3.bf16.msra.mxu0 %v7437_v28  ;;  %p8248_p1 = scmp.lt.s32.totalorder %s5665_s17, %s5665_s17 }
0x2db5   :  { %7925 = vtanh.f32 %v5515_v9  ;;  %7439 = vmatprep.subr.bf16.mxu0 %v8315_v44 }
0x2db6   :  { %7927 = vpow2.f32 %v5808_v40 }
0x2db7   :  { %7929 = vpow2.f32 %v5809_v29 }
0x2db8   :  { %7441 = vmatpush3.bf16.msra.mxu0 %v7440_v11 }
0x2db9   :  { %7442 = vmatprep.subr.bf16.mxu0 %v8315_v44 }
0x2dbb   :  { %v7920_v24 = vpop.eup %7919 }
0x2dbc   :  { %5522 = vrot.lane.b32.xlu1 %v7920_v24, %s8304_s4  ;;  %7444 = vmatpush3.bf16.msra.mxu0 %v7443_v46  ;;  %v5810_v46 = vld [vmem:[#allocation23] ss:$0 sm:$0xff] }
0x2dbd   :  { %v7922_v32 = vpop.eup %7921  ;;  %7445 = vmatprep.subr.bf16.mxu0 %v8315_v44 }
0x2dbe   :  { %v7924_v31 = vpop.eup %7923 }
0x2dbf   :  { %v7926_v57 = vpop.eup %7925 }
0x2dc0   :  { %5462 = vrot.lane.b32.xlu1 %v7922_v32, %s8304_s4  ;;  %7447 = vmatpush3.bf16.msra.mxu0 %v7446_v56  ;;  %v7928_v26 = vpop.eup %7927 }
0x2dc1   :  { %7448 = vmatprep.subr.bf16.mxu0 %v8315_v44  ;;  %v5506_v35 = vadd.f32 1.0, %v7928_v26  ;;  %v7930_v38 = vpop.eup %7929 }
0x2dc2   :  { %v5507_v21 = vadd.f32 1.0, %v7930_v38 }
0x2dc3   :  { %7931 = vrcp.f32 %v5506_v35 }
0x2dc4   :  { %5460 = vrot.lane.b32.xlu1 %v7924_v31, %s8304_s4  ;;  %7450 = vmatpush3.bf16.msra.mxu0 %v7449_v36  ;;  %7933 = vrcp.f32 %v5507_v21 }
0x2dc5   :  { %7451 = vmatprep.subr.bf16.mxu0 %v8315_v44 }
0x2dc8   :  { %5524 = vrot.lane.b32.xlu1 %v7926_v57, %s8304_s4  ;;  %7453 = vmatpush3.bf16.msra.mxu0 %v7452_v22 }
0x2dc9   :  { %7454 = vmatprep.subr.bf16.mxu0 %v8315_v44 }
0x2dcc   :  { %7456 = vmatpush3.bf16.msra.mxu0 %v7455_v1 }
0x2dcd   :  { %v7932_v48 = vpop.eup %7931  ;;  %7457 = vmatprep.subr.bf16.mxu0 %v8315_v44  ;;  %v7458_v44 = vpack.c.bf16 %v5572_v47, %v5571_v50 }
0x2dce   :  { %v5518_v3 = vsub.f32 1.0, %v7932_v48  ;;  %v7934_v52 = vpop.eup %7933  ;;  %v5533_v18 = vmul.f32 %v7932_v48, %v5531_v25 }
0x2dcf   :  { %v5519_v60 = vsub.f32 1.0, %v7934_v52  ;;  %v5534_v6 = vmul.f32 %v7934_v52, %v5470_v34 }
0x2dd0   :  { %7459 = vmatpush3.bf16.msra.mxu0 %v7458_v44 }
0x2e2e   :  { %v5523_v4 = vpop.permute.xlu1 %5522 }
0x2e2f   :  { %v5528_v7 = vmul.f32 %v5523_v4, %v5518_v3 }
0x2e31   :  { %v5535_v55 = vadd.f32 %v5533_v18, %v5528_v7 }
0x2e32   :  { %v5463_v37 = vpop.permute.xlu1 %5462 }
0x2e33   :  { %v5467_v51 = vmul.f32 %v5463_v37, %v5457_v8  ;;  %v5548_v0 = vrot.slane %v5535_v55, 1 }
0x2e35   :  { %v5478_v20 = vadd.f32 %v5476_v54, %v5467_v51 }
0x2e36   :  { %v5461_v13 = vpop.permute.xlu1 %5460 }
0x2e37   :  { %v5466_v12 = vmul.f32 %v5461_v13, %v5456_v2  ;;  %v5539_v59 = vrot.slane %v5478_v20, 7 }
0x2e39   :  { %v5477_v23 = vadd.f32 %v5475_v14, %v5466_v12 }
0x2e3a   :  { %v5525_v10 = vpop.permute.xlu1 %5524 }
0x2e3b   :  { %v7577_v63 = vpack.i.bf16 %v5539_v59, %v5477_v23  ;;  %v5529_v41 = vmul.f32 %v5525_v10, %v5519_v60 }
0x2e3d   :  { %v5536_v9 = vadd.f32 %v5534_v6, %v5529_v41  ;;  %7578 = vrot.lane.b32.xlu0 %v7577_v63, %s8304_s4 }
0x2e3f   :  { %v7582_v24 = vpack.i.bf16 %v5536_v9, %v5548_v0 }
0x2e41   :  { %7583 = vrot.lane.b32.xlu1 %v7582_v24, %s8304_s4  ;;  %s8243_s4 = scalar_lea.vmem %s5665_s17, 32 }
0x2e42   :  { %p8244_p0 = scmp.ne.s32.totalorder %s5665_s17, %s8243_s4  ;;  %p8249_p2 = scmp.lt.s32.totalorder %s8243_s4, %s8243_s4 }
0x2e44   :  { %p8250_p3 = por %p8249_p2, %p8248_p1 }
0x2e46   :  { %p8251_p4 = pnand %p8250_p3, %p8244_p0 }
0x2eaf   :  { %v7579_v32 = vpop.permute.xlu0 %7578 }
0x2eb0   :  { %v7581_v43 = vunpack.i.h.bf16 %v7579_v32  ;;  %v7580_v15 = vunpack.i.l.bf16 %v7579_v32 }
0x2eb3   :  { %v7584_v39 = vpop.permute.xlu1 %7583 }
0x2eb4   :  { %v7586_v28 = vunpack.i.h.bf16 %v7584_v39  ;;  %v7585_v45 = vunpack.i.l.bf16 %v7584_v39 }
0x2eb6   :  { %v5556_v31 = vsel %vm3614_vm11, %v7581_v43, %v7586_v28  ;;  %v5555_v11 = vsel %vm3614_vm11, %v7580_v15, %v7585_v45 }
0x2eb7   :  { %v5584_v53 = vrot.slane %v5556_v31, 7  ;;  %v5583_v19 = vrot.slane %v5555_v11, 7 }
0x2eb9   :  { %v5585_v57 = vsel %vm5582_vm2, %v5583_v19, %v5584_v53 }
0x2eba   :  { %6742 = vmatmul.mubr.f32.vlgmr.msra.gmra.mrb[46].mxu0 %v5585_v57 }
0x2f8d   :  { %v5653_v17 = vpop.f32.mrb[46].mxu0 }
0x2f8e   :  { %v5654_v49 = vadd.f32 %v5810_v46, %v5653_v17  ;;  %v6743_v56 = vpop.f32.mrb[47].mxu0 }
0x2f90   :  { %5657 = vst [vmem:[#allocation25] sm:$0x3] %v5654_v49 }
0x2f91   :  { %8254 = shalt.err (!%p8251_p4)
}
0x2f92   :  { %s8255_s13 = scalar_lea.hbm %s9988_s27, 32 }
0x2f93   :  { %p8256_p5 = scmp.ne.s32.totalorder %s9988_s27, %s8255_s13  ;;  %p8259_p6 = scmp.lt.u32.totalorder %s8255_s13, %s9988_s27 }
0x2f95   :  { %p8261_p7 = pnand %p8259_p6, %p8256_p5 }
0x2f97   :  { %8264 = shalt.err (!%p8261_p7)
}
0x2f98   :  { %5667 = dma.vmem_to_hbm [thread:$0]  %s5665_s17, 32, %s9988_s27, [#allocation4]  }
0x2f99   :  { %8281 = dma.done.wait [#allocation4], 32  }
0x2f9a   :  { %8282 = vsyncadd [#allocation4], 4294967264 }
0x2f9b   :  { %5671 = vsyncpa [#allocation3], 1 }
0x2f9c   :  { %5672 = vsyncpa [#allocation6], 1 }
0x2f9d   :  { %5673 = vsyncpa [#allocation9], 1 }
0x2f9e   :  { %5674 = vsyncpa [#allocation12], 1 }
0x2f9f   :  { %5675 = vsyncpa [#allocation15], 1 }
0x2fa0   :  { %5676 = vsyncpa [#allocation18], 1 }
0x2fa1   :  { %5677 = vsyncpa [#allocation21], 1 }
0x2fa2   :  { %5678 = vsyncpa [#allocation24], 1 }
0x2fa3   :  { %5679 = vsyncpa [#allocation4], 1 }

</bundles_post_ra>
